<compile_context>
chip_gen: v7x
topology: tpu7x:2x2x1
jax: 0.10.0
libtpu: 0.0.40
codegen_flags: <defaults>
</compile_context>

<pallas_src>
from functools import partial

import numpy as np
import jax
import jax.numpy as jnp
from jax import lax
from jax.experimental import pallas as pl
from jax.experimental.pallas import tpu as pltpu


# -----------------------------------------------------------------------------
# Graph-mask template construction (mirrors GraphMask / GraphMaskAttention).
# Deterministic numpy/JAX glue, not the hot path.
# -----------------------------------------------------------------------------
def self_matrix(size: int) -> np.ndarray:
    n = size * size
    return np.eye(n, dtype=np.float32)


def _grid_adjacency(size: int, offsets) -> np.ndarray:
    n = size * size
    m = np.zeros((n, n), dtype=np.float32)
    for i in range(size):
        for j in range(size):
            for di, dj in offsets:
                ii, jj = i + di, j + dj
                if 0 <= ii < size and 0 <= jj < size:
                    m[i * size + j, ii * size + jj] = 1.0
    return m


def nn_matrix(size: int) -> np.ndarray:
    return _grid_adjacency(size, [(-1, 0), (1, 0), (0, -1), (0, 1)])


def nnn_matrix(size: int) -> np.ndarray:
    return _grid_adjacency(size, [(-1, -1), (-1, 1), (1, -1), (1, 1)])


def graph_mask_attention_matrix(factors, size: int, graph_layer: str):
    """GraphMaskAttention.calculate_matrix(): 'sum'-mode templates scaled by factors."""
    m = factors[0] * jnp.asarray(self_matrix(size))
    if graph_layer in ("symm_nn", "symm_nnn"):
        m = m + factors[1] * jnp.asarray(nn_matrix(size))
    if graph_layer == "symm_nnn":
        m = m + factors[2] * jnp.asarray(nnn_matrix(size))
    return m.astype(jnp.float32)


# -----------------------------------------------------------------------------
# Fused attention kernel (one batch block per grid step).
# -----------------------------------------------------------------------------
def _attention_kernel(x_ref, wqkv_ref, bqkv_ref, wp_ref, bp_ref, *rest,
                      num_heads, scale, use_graph_mask, batch_block,
                      compute_dtype):
    if use_graph_mask:
        gm_ref, o_ref = rest
    else:
        (o_ref,) = rest

    C = wp_ref.shape[0]
    D = C // num_heads

    wqkv = wqkv_ref[...]                               # (C, 3C) compute dtype
    bqkv = bqkv_ref[...].astype(jnp.float32)           # (1, 3C)
    wp = wp_ref[...]                                   # (C, C)  compute dtype
    bp = bp_ref[...].astype(jnp.float32)               # (1, C)

    if use_graph_mask:
        gm = gm_ref[...]                               # (N, N) f32
        # Hoisted: batch/head-invariant additive -inf mask (gm == 0 -> -inf).
        neg = jnp.where(gm == 0.0, -jnp.inf, 0.0).astype(jnp.float32)

    def batch_body(b, carry):
        x = x_ref[b]                                   # (N, C) compute dtype

        # Lane-dense qkv projection: (N, C) @ (C, 3C), f32 accumulation.
        y = jnp.dot(x, wqkv, preferred_element_type=jnp.float32) + bqkv
        q = y[:, 0:C] * scale                          # fold scale in once (f32)
        k = y[:, C:2 * C]
        v = y[:, 2 * C:3 * C]

        ctx_heads = []
        for h in range(num_heads):                     # static unroll over heads
            lo = h * D
            qh = q[:, lo:lo + D].astype(compute_dtype)
            kh = k[:, lo:lo + D].astype(compute_dtype)
            vh = v[:, lo:lo + D].astype(compute_dtype)

            # scaled scores = (q*scale) @ k^T, contracting D without k^T.
            a = lax.dot_general(
                qh, kh, (((1,), (1,)), ((), ())),
                preferred_element_type=jnp.float32)                 # (N, N)

            if use_graph_mask:
                # GraphMaskAttention: elementwise mask; disallowed -> -inf.
                a = a * gm + neg

            # softmax along the last axis (rows always keep a finite entry).
            a = a - jnp.max(a, axis=-1, keepdims=True)
            e = jnp.exp(a)
            p = e * pl.reciprocal(jnp.sum(e, axis=-1, keepdims=True),
                                  approx=True)

            ctx_heads.append(jnp.dot(p.astype(compute_dtype), vh,
                                     preferred_element_type=jnp.float32))  # (N, D)

        # Single K=C output projection instead of num_heads K=D matmuls.
        ctx_all = jnp.concatenate(ctx_heads, axis=-1)                # (N, C) f32
        out = jnp.dot(ctx_all.astype(compute_dtype), wp,
                      preferred_element_type=jnp.float32) + bp       # (N, C)
        o_ref[b] = out.astype(o_ref.dtype)
        return carry

    lax.fori_loop(0, batch_block, batch_body, 0, unroll=True)


def attention_forward(x, wqkv_t, bqkv, wp_t, bp, graph_matrix=None, *,
                      num_heads, scale=None, batch_block=1,
                      compute_dtype=jnp.bfloat16):
    """Attention.forward.

    x:            (B, N, C)
    wqkv_t:       (C, 3C)  == torch qkv.weight.T
    bqkv:         (3C,) or None (qkv_bias=False)
    wp_t:         (C, C)   == torch proj.weight.T
    bp:           (C,)
    graph_matrix: (N, N) GraphMaskAttention matrix, or None for 'arbitrary'.
    """
    B, N, C = x.shape
    assert C % num_heads == 0
    D = C // num_heads
    if scale is None:
        scale = float(D) ** -0.5
    assert wqkv_t.shape == (C, 3 * C) and wp_t.shape == (C, C)
    assert B % batch_block == 0

    use_graph_mask = graph_matrix is not None
    if bqkv is None:
        bqkv = jnp.zeros((3 * C,), dtype=jnp.float32)

    out_dtype = x.dtype
    xk = x.astype(compute_dtype)
    wqkv_k = jnp.asarray(wqkv_t).astype(compute_dtype)
    wp_k = jnp.asarray(wp_t).astype(compute_dtype)
    bqkv2 = jnp.asarray(bqkv, jnp.float32).reshape(1, 3 * C)
    bp2 = jnp.asarray(bp, jnp.float32).reshape(1, C)

    in_specs = [
        pl.BlockSpec((batch_block, N, C), lambda b: (b, 0, 0)),   # x
        pl.BlockSpec((C, 3 * C), lambda b: (0, 0)),               # Wqkv^T
        pl.BlockSpec((1, 3 * C), lambda b: (0, 0)),               # bqkv
        pl.BlockSpec((C, C), lambda b: (0, 0)),                   # Wproj^T
        pl.BlockSpec((1, C), lambda b: (0, 0)),                   # bproj
    ]
    args = [xk, wqkv_k, bqkv2, wp_k, bp2]
    if use_graph_mask:
        gm = jnp.asarray(graph_matrix, jnp.float32)
        in_specs.append(pl.BlockSpec((N, N), lambda b: (0, 0)))   # graph mask
        args.append(gm)

    # Advisory cost estimate for XLA scheduling around the custom call.
    flops = B * (2 * N * C * 3 * C          # qkv projection
                 + 2 * N * N * C            # q @ k^T (all heads)
                 + 2 * N * N * C            # attn @ v (all heads)
                 + 2 * N * C * C)           # output projection
    transcendentals = B * num_heads * N * N
    bytes_accessed = int(sum(a.size * jnp.dtype(a.dtype).itemsize for a in args)
                         + B * N * C * jnp.dtype(out_dtype).itemsize)

    kernel = partial(_attention_kernel,
                     num_heads=num_heads, scale=float(scale),
                     use_graph_mask=use_graph_mask,
                     batch_block=batch_block,
                     compute_dtype=compute_dtype)

    return pl.pallas_call(
        kernel,
        out_shape=jax.ShapeDtypeStruct((B, N, C), out_dtype),
        grid_spec=pltpu.PrefetchScalarGridSpec(
            num_scalar_prefetch=0,
            grid=(B // batch_block,),
            in_specs=in_specs,
            out_specs=pl.BlockSpec((batch_block, N, C), lambda b: (b, 0, 0)),
        ),
        compiler_params=pltpu.CompilerParams(
            dimension_semantics=("parallel",),
            vmem_limit_bytes=32 * 1024 * 1024,
        ),
        cost_estimate=pl.CostEstimate(
            flops=int(flops),
            transcendentals=int(transcendentals),
            bytes_accessed=int(bytes_accessed),
        ),
    )(*args)


# -----------------------------------------------------------------------------
if __name__ == "__main__":
    # Small shapes consistent with the module: size=8 grid -> N=64 tokens,
    # dim=128, 8 heads (head_dim=16), batch=2, mixing_symmetry='symm_nn'.
    B = 2
    size = 8                       # patch_nr_side_length
    N = size * size
    dim = 128
    num_heads = 8
    head_dim = dim // num_heads
    scale = head_dim ** -0.5
    mixing_symmetry = "symm_nn"

    key = jax.random.PRNGKey(0)
    kx, kqkv, kp, kbp, kf = jax.random.split(key, 5)
    x = jax.random.normal(kx, (B, N, dim), dtype=jnp.float32)
    wqkv_t = jax.random.normal(kqkv, (dim, 3 * dim), dtype=jnp.float32) * (dim ** -0.5)
    wp_t = jax.random.normal(kp, (dim, dim), dtype=jnp.float32) * (dim ** -0.5)
    bp = jax.random.normal(kbp, (dim,), dtype=jnp.float32) * 0.02
    factors = jax.random.normal(kf, (3,), dtype=jnp.float32)    # GraphMaskAttention.factors

    gm = graph_mask_attention_matrix(factors, size, mixing_symmetry)

    # batch_block=1 -> grid of 2 "parallel" steps (both v7x TCs get work);
    # raise batch_block on single-TC v5e/v6e to amortize per-step overhead.
    out = attention_forward(x, wqkv_t, None, wp_t, bp, gm,
                            num_heads=num_heads, scale=scale,
                            batch_block=1, compute_dtype=jnp.bfloat16)
    out = jax.block_until_ready(out)

    # Silent correctness check against a plain-JAX transcription of the torch forward.
    def reference(x, wqkv_t, wp_t, bp, gm):
        B_, N_, C_ = x.shape
        qkv = x @ wqkv_t
        qkv = qkv.reshape(B_, N_, 3, num_heads, C_ // num_heads).transpose(2, 0, 3, 1, 4)
        q, k, v = qkv[0], qkv[1], qkv[2]
        attn = jnp.einsum("bhnd,bhmd->bhnm", q, k) * scale
        attn = jnp.einsum("nm,bhnm->bhnm", gm, attn)            # GraphMaskAttention
        attn = jnp.where(attn == 0.0, -jnp.inf, attn)           # zeros -> -inf
        attn = jax.nn.softmax(attn, axis=-1)
        o = jnp.einsum("bhnm,bhmd->bhnd", attn, v)
        o = o.transpose(0, 2, 1, 3).reshape(B_, N_, C_)
        return o @ wp_t + bp

    ref = reference(x, wqkv_t, wp_t, bp, gm)
    assert out.shape == (B, N, dim)
    # bf16 MXU inputs (f32 accumulation) + approx reciprocal -> looser tolerance.
    np.testing.assert_allclose(np.asarray(out), np.asarray(ref), rtol=5e-2, atol=5e-2)

    print("KERNEL_OK")
</pallas_src>

<mosaic_0001>
module attributes {stable_mosaic.version = 11 : i64} {
  func.func @_attention_kernel(%arg0: i32, %arg1: memref<1x64x128xbf16, #tpu.memory_space<vmem>>, %arg2: memref<128x384xbf16, #tpu.memory_space<vmem>>, %arg3: memref<1x384xf32, #tpu.memory_space<vmem>>, %arg4: memref<128x128xbf16, #tpu.memory_space<vmem>>, %arg5: memref<1x128xf32, #tpu.memory_space<vmem>>, %arg6: memref<64x64xf32, #tpu.memory_space<vmem>>, %arg7: memref<1x64x128xf32, #tpu.memory_space<vmem>>) attributes {dimension_semantics = [#tpu.dimension_semantics<parallel>], iteration_bounds = array<i64: 2>, scalar_prefetch = 0 : i64, scratch_operands = 0 : i64, tpu.core_type = #tpu.core_type<tc>, window_params = [{transform_indices = @transform_0, window_bounds = array<i64: 1, 64, 128>}, {pipeline_mode = #tpu.pipeline_mode<synchronous>, transform_indices = @transform_1, window_bounds = array<i64: 128, 384>}, {pipeline_mode = #tpu.pipeline_mode<synchronous>, transform_indices = @transform_2, window_bounds = array<i64: 1, 384>}, {pipeline_mode = #tpu.pipeline_mode<synchronous>, transform_indices = @transform_3, window_bounds = array<i64: 128, 128>}, {pipeline_mode = #tpu.pipeline_mode<synchronous>, transform_indices = @transform_4, window_bounds = array<i64: 1, 128>}, {pipeline_mode = #tpu.pipeline_mode<synchronous>, transform_indices = @transform_5, window_bounds = array<i64: 64, 64>}, {transform_indices = @transform_6, window_bounds = array<i64: 1, 64, 128>}]} {
    %c0 = arith.constant 0 : index
    %c0_0 = arith.constant 0 : index
    %0 = vector.load %arg2[%c0, %c0_0] : memref<128x384xbf16, #tpu.memory_space<vmem>>, vector<128x384xbf16>
    %c0_1 = arith.constant 0 : index
    %c0_2 = arith.constant 0 : index
    %1 = vector.load %arg3[%c0_1, %c0_2] : memref<1x384xf32, #tpu.memory_space<vmem>>, vector<1x384xf32>
    %c0_3 = arith.constant 0 : index
    %c0_4 = arith.constant 0 : index
    %2 = vector.load %arg4[%c0_3, %c0_4] : memref<128x128xbf16, #tpu.memory_space<vmem>>, vector<128x128xbf16>
    %c0_5 = arith.constant 0 : index
    %c0_6 = arith.constant 0 : index
    %3 = vector.load %arg5[%c0_5, %c0_6] : memref<1x128xf32, #tpu.memory_space<vmem>>, vector<1x128xf32>
    %c0_7 = arith.constant 0 : index
    %c0_8 = arith.constant 0 : index
    %4 = vector.load %arg6[%c0_7, %c0_8] : memref<64x64xf32, #tpu.memory_space<vmem>>, vector<64x64xf32>
    %cst = arith.constant 0.000000e+00 : f32
    %5 = vector.broadcast %cst : f32 to vector<64x64xf32>
    %6 = arith.cmpf oeq, %4, %5 : vector<64x64xf32>
    %cst_9 = arith.constant 0xFF800000 : f32
    %cst_10 = arith.constant 0.000000e+00 : f32
    %7 = vector.broadcast %cst_9 : f32 to vector<64x64xf32>
    %8 = vector.broadcast %cst_10 : f32 to vector<64x64xf32>
    %9 = arith.select %6, %7, %8 : vector<64x64xi1>, vector<64x64xf32>
    %c0_i32 = arith.constant 0 : i32
    %10 = arith.index_cast %c0_i32 : i32 to index
    %c0_11 = arith.constant 0 : index
    %c0_12 = arith.constant 0 : index
    %11 = vector.load %arg1[%10, %c0_11, %c0_12] : memref<1x64x128xbf16, #tpu.memory_space<vmem>>, vector<1x64x128xbf16>
    %12 = vector.shape_cast %11 : vector<1x64x128xbf16> to vector<64x128xbf16>
    %cst_13 = arith.constant dense<0.000000e+00> : vector<64x384xf32>
    %13 = tpu.matmul %12, %0, %cst_13 {dimension_numbers = #tpu.dot_dimension_numbers<[1], [0], [0], [1], [0, 0, 1, 1], [], []>} : vector<64x128xbf16>, vector<128x384xbf16>, vector<64x384xf32> -> vector<64x384xf32>
    %14 = vector.broadcast %1 : vector<1x384xf32> to vector<64x384xf32>
    %15 = arith.addf %13, %14 : vector<64x384xf32>
    %16 = vector.extract_strided_slice %15 {offsets = [0, 0], sizes = [64, 128], strides = [1, 1]} : vector<64x384xf32> to vector<64x128xf32>
    %cst_14 = arith.constant 2.500000e-01 : f32
    %17 = vector.broadcast %cst_14 : f32 to vector<64x128xf32>
    %18 = arith.mulf %16, %17 : vector<64x128xf32>
    %19 = vector.extract_strided_slice %15 {offsets = [0, 128], sizes = [64, 128], strides = [1, 1]} : vector<64x384xf32> to vector<64x128xf32>
    %20 = vector.extract_strided_slice %15 {offsets = [0, 256], sizes = [64, 128], strides = [1, 1]} : vector<64x384xf32> to vector<64x128xf32>
    %21 = vector.extract_strided_slice %18 {offsets = [0, 0], sizes = [64, 16], strides = [1, 1]} : vector<64x128xf32> to vector<64x16xf32>
    %22 = arith.truncf %21 : vector<64x16xf32> to vector<64x16xbf16>
    %23 = vector.extract_strided_slice %19 {offsets = [0, 0], sizes = [64, 16], strides = [1, 1]} : vector<64x128xf32> to vector<64x16xf32>
    %24 = arith.truncf %23 : vector<64x16xf32> to vector<64x16xbf16>
    %25 = vector.extract_strided_slice %20 {offsets = [0, 0], sizes = [64, 16], strides = [1, 1]} : vector<64x128xf32> to vector<64x16xf32>
    %26 = arith.truncf %25 : vector<64x16xf32> to vector<64x16xbf16>
    %cst_15 = arith.constant dense<0.000000e+00> : vector<64x64xf32>
    %27 = tpu.matmul %22, %24, %cst_15 {dimension_numbers = #tpu.dot_dimension_numbers<[1], [1], [0], [0], [0, 0, 1, 0], [], []>} : vector<64x16xbf16>, vector<64x16xbf16>, vector<64x64xf32> -> vector<64x64xf32>
    %28 = arith.mulf %27, %4 : vector<64x64xf32>
    %29 = arith.addf %28, %9 : vector<64x64xf32>
    %cst_16 = arith.constant dense<0xFF800000> : vector<64xf32>
    %30 = vector.multi_reduction <maximumf>, %29, %cst_16 [1] : vector<64x64xf32> to vector<64xf32>
    %31 = vector.shape_cast %30 : vector<64xf32> to vector<64x1xf32>
    %32 = vector.broadcast %31 : vector<64x1xf32> to vector<64x64xf32>
    %33 = arith.subf %29, %32 : vector<64x64xf32>
    %34 = math.exp %33 : vector<64x64xf32>
    %cst_17 = arith.constant dense<0.000000e+00> : vector<64xf32>
    %35 = vector.multi_reduction <add>, %34, %cst_17 [1] : vector<64x64xf32> to vector<64xf32>
    %36 = vector.shape_cast %35 : vector<64xf32> to vector<64x1xf32>
    %37 = tpu.reciprocal %36 {approx = true} : vector<64x1xf32> -> vector<64x1xf32>
    %38 = vector.broadcast %37 : vector<64x1xf32> to vector<64x64xf32>
    %39 = arith.mulf %34, %38 : vector<64x64xf32>
    %40 = arith.truncf %39 : vector<64x64xf32> to vector<64x64xbf16>
    %cst_18 = arith.constant dense<0.000000e+00> : vector<64x16xf32>
    %41 = tpu.matmul %40, %26, %cst_18 {dimension_numbers = #tpu.dot_dimension_numbers<[1], [0], [0], [1], [0, 0, 1, 1], [], []>} : vector<64x64xbf16>, vector<64x16xbf16>, vector<64x16xf32> -> vector<64x16xf32>
    %42 = vector.extract_strided_slice %18 {offsets = [0, 16], sizes = [64, 16], strides = [1, 1]} : vector<64x128xf32> to vector<64x16xf32>
    %43 = arith.truncf %42 : vector<64x16xf32> to vector<64x16xbf16>
    %44 = vector.extract_strided_slice %19 {offsets = [0, 16], sizes = [64, 16], strides = [1, 1]} : vector<64x128xf32> to vector<64x16xf32>
    %45 = arith.truncf %44 : vector<64x16xf32> to vector<64x16xbf16>
    %46 = vector.extract_strided_slice %20 {offsets = [0, 16], sizes = [64, 16], strides = [1, 1]} : vector<64x128xf32> to vector<64x16xf32>
    %47 = arith.truncf %46 : vector<64x16xf32> to vector<64x16xbf16>
    %cst_19 = arith.constant dense<0.000000e+00> : vector<64x64xf32>
    %48 = tpu.matmul %43, %45, %cst_19 {dimension_numbers = #tpu.dot_dimension_numbers<[1], [1], [0], [0], [0, 0, 1, 0], [], []>} : vector<64x16xbf16>, vector<64x16xbf16>, vector<64x64xf32> -> vector<64x64xf32>
    %49 = arith.mulf %48, %4 : vector<64x64xf32>
    %50 = arith.addf %49, %9 : vector<64x64xf32>
    %cst_20 = arith.constant dense<0xFF800000> : vector<64xf32>
    %51 = vector.multi_reduction <maximumf>, %50, %cst_20 [1] : vector<64x64xf32> to vector<64xf32>
    %52 = vector.shape_cast %51 : vector<64xf32> to vector<64x1xf32>
    %53 = vector.broadcast %52 : vector<64x1xf32> to vector<64x64xf32>
    %54 = arith.subf %50, %53 : vector<64x64xf32>
    %55 = math.exp %54 : vector<64x64xf32>
    %cst_21 = arith.constant dense<0.000000e+00> : vector<64xf32>
    %56 = vector.multi_reduction <add>, %55, %cst_21 [1] : vector<64x64xf32> to vector<64xf32>
    %57 = vector.shape_cast %56 : vector<64xf32> to vector<64x1xf32>
    %58 = tpu.reciprocal %57 {approx = true} : vector<64x1xf32> -> vector<64x1xf32>
    %59 = vector.broadcast %58 : vector<64x1xf32> to vector<64x64xf32>
    %60 = arith.mulf %55, %59 : vector<64x64xf32>
    %61 = arith.truncf %60 : vector<64x64xf32> to vector<64x64xbf16>
    %cst_22 = arith.constant dense<0.000000e+00> : vector<64x16xf32>
    %62 = tpu.matmul %61, %47, %cst_22 {dimension_numbers = #tpu.dot_dimension_numbers<[1], [0], [0], [1], [0, 0, 1, 1], [], []>} : vector<64x64xbf16>, vector<64x16xbf16>, vector<64x16xf32> -> vector<64x16xf32>
    %63 = vector.extract_strided_slice %18 {offsets = [0, 32], sizes = [64, 16], strides = [1, 1]} : vector<64x128xf32> to vector<64x16xf32>
    %64 = arith.truncf %63 : vector<64x16xf32> to vector<64x16xbf16>
    %65 = vector.extract_strided_slice %19 {offsets = [0, 32], sizes = [64, 16], strides = [1, 1]} : vector<64x128xf32> to vector<64x16xf32>
    %66 = arith.truncf %65 : vector<64x16xf32> to vector<64x16xbf16>
    %67 = vector.extract_strided_slice %20 {offsets = [0, 32], sizes = [64, 16], strides = [1, 1]} : vector<64x128xf32> to vector<64x16xf32>
    %68 = arith.truncf %67 : vector<64x16xf32> to vector<64x16xbf16>
    %cst_23 = arith.constant dense<0.000000e+00> : vector<64x64xf32>
    %69 = tpu.matmul %64, %66, %cst_23 {dimension_numbers = #tpu.dot_dimension_numbers<[1], [1], [0], [0], [0, 0, 1, 0], [], []>} : vector<64x16xbf16>, vector<64x16xbf16>, vector<64x64xf32> -> vector<64x64xf32>
    %70 = arith.mulf %69, %4 : vector<64x64xf32>
    %71 = arith.addf %70, %9 : vector<64x64xf32>
    %cst_24 = arith.constant dense<0xFF800000> : vector<64xf32>
    %72 = vector.multi_reduction <maximumf>, %71, %cst_24 [1] : vector<64x64xf32> to vector<64xf32>
    %73 = vector.shape_cast %72 : vector<64xf32> to vector<64x1xf32>
    %74 = vector.broadcast %73 : vector<64x1xf32> to vector<64x64xf32>
    %75 = arith.subf %71, %74 : vector<64x64xf32>
    %76 = math.exp %75 : vector<64x64xf32>
    %cst_25 = arith.constant dense<0.000000e+00> : vector<64xf32>
    %77 = vector.multi_reduction <add>, %76, %cst_25 [1] : vector<64x64xf32> to vector<64xf32>
    %78 = vector.shape_cast %77 : vector<64xf32> to vector<64x1xf32>
    %79 = tpu.reciprocal %78 {approx = true} : vector<64x1xf32> -> vector<64x1xf32>
    %80 = vector.broadcast %79 : vector<64x1xf32> to vector<64x64xf32>
    %81 = arith.mulf %76, %80 : vector<64x64xf32>
    %82 = arith.truncf %81 : vector<64x64xf32> to vector<64x64xbf16>
    %cst_26 = arith.constant dense<0.000000e+00> : vector<64x16xf32>
    %83 = tpu.matmul %82, %68, %cst_26 {dimension_numbers = #tpu.dot_dimension_numbers<[1], [0], [0], [1], [0, 0, 1, 1], [], []>} : vector<64x64xbf16>, vector<64x16xbf16>, vector<64x16xf32> -> vector<64x16xf32>
    %84 = vector.extract_strided_slice %18 {offsets = [0, 48], sizes = [64, 16], strides = [1, 1]} : vector<64x128xf32> to vector<64x16xf32>
    %85 = arith.truncf %84 : vector<64x16xf32> to vector<64x16xbf16>
    %86 = vector.extract_strided_slice %19 {offsets = [0, 48], sizes = [64, 16], strides = [1, 1]} : vector<64x128xf32> to vector<64x16xf32>
    %87 = arith.truncf %86 : vector<64x16xf32> to vector<64x16xbf16>
    %88 = vector.extract_strided_slice %20 {offsets = [0, 48], sizes = [64, 16], strides = [1, 1]} : vector<64x128xf32> to vector<64x16xf32>
    %89 = arith.truncf %88 : vector<64x16xf32> to vector<64x16xbf16>
    %cst_27 = arith.constant dense<0.000000e+00> : vector<64x64xf32>
    %90 = tpu.matmul %85, %87, %cst_27 {dimension_numbers = #tpu.dot_dimension_numbers<[1], [1], [0], [0], [0, 0, 1, 0], [], []>} : vector<64x16xbf16>, vector<64x16xbf16>, vector<64x64xf32> -> vector<64x64xf32>
    %91 = arith.mulf %90, %4 : vector<64x64xf32>
    %92 = arith.addf %91, %9 : vector<64x64xf32>
    %cst_28 = arith.constant dense<0xFF800000> : vector<64xf32>
    %93 = vector.multi_reduction <maximumf>, %92, %cst_28 [1] : vector<64x64xf32> to vector<64xf32>
    %94 = vector.shape_cast %93 : vector<64xf32> to vector<64x1xf32>
    %95 = vector.broadcast %94 : vector<64x1xf32> to vector<64x64xf32>
    %96 = arith.subf %92, %95 : vector<64x64xf32>
    %97 = math.exp %96 : vector<64x64xf32>
    %cst_29 = arith.constant dense<0.000000e+00> : vector<64xf32>
    %98 = vector.multi_reduction <add>, %97, %cst_29 [1] : vector<64x64xf32> to vector<64xf32>
    %99 = vector.shape_cast %98 : vector<64xf32> to vector<64x1xf32>
    %100 = tpu.reciprocal %99 {approx = true} : vector<64x1xf32> -> vector<64x1xf32>
    %101 = vector.broadcast %100 : vector<64x1xf32> to vector<64x64xf32>
    %102 = arith.mulf %97, %101 : vector<64x64xf32>
    %103 = arith.truncf %102 : vector<64x64xf32> to vector<64x64xbf16>
    %cst_30 = arith.constant dense<0.000000e+00> : vector<64x16xf32>
    %104 = tpu.matmul %103, %89, %cst_30 {dimension_numbers = #tpu.dot_dimension_numbers<[1], [0], [0], [1], [0, 0, 1, 1], [], []>} : vector<64x64xbf16>, vector<64x16xbf16>, vector<64x16xf32> -> vector<64x16xf32>
    %105 = vector.extract_strided_slice %18 {offsets = [0, 64], sizes = [64, 16], strides = [1, 1]} : vector<64x128xf32> to vector<64x16xf32>
    %106 = arith.truncf %105 : vector<64x16xf32> to vector<64x16xbf16>
    %107 = vector.extract_strided_slice %19 {offsets = [0, 64], sizes = [64, 16], strides = [1, 1]} : vector<64x128xf32> to vector<64x16xf32>
    %108 = arith.truncf %107 : vector<64x16xf32> to vector<64x16xbf16>
    %109 = vector.extract_strided_slice %20 {offsets = [0, 64], sizes = [64, 16], strides = [1, 1]} : vector<64x128xf32> to vector<64x16xf32>
    %110 = arith.truncf %109 : vector<64x16xf32> to vector<64x16xbf16>
    %cst_31 = arith.constant dense<0.000000e+00> : vector<64x64xf32>
    %111 = tpu.matmul %106, %108, %cst_31 {dimension_numbers = #tpu.dot_dimension_numbers<[1], [1], [0], [0], [0, 0, 1, 0], [], []>} : vector<64x16xbf16>, vector<64x16xbf16>, vector<64x64xf32> -> vector<64x64xf32>
    %112 = arith.mulf %111, %4 : vector<64x64xf32>
    %113 = arith.addf %112, %9 : vector<64x64xf32>
    %cst_32 = arith.constant dense<0xFF800000> : vector<64xf32>
    %114 = vector.multi_reduction <maximumf>, %113, %cst_32 [1] : vector<64x64xf32> to vector<64xf32>
    %115 = vector.shape_cast %114 : vector<64xf32> to vector<64x1xf32>
    %116 = vector.broadcast %115 : vector<64x1xf32> to vector<64x64xf32>
    %117 = arith.subf %113, %116 : vector<64x64xf32>
    %118 = math.exp %117 : vector<64x64xf32>
    %cst_33 = arith.constant dense<0.000000e+00> : vector<64xf32>
    %119 = vector.multi_reduction <add>, %118, %cst_33 [1] : vector<64x64xf32> to vector<64xf32>
    %120 = vector.shape_cast %119 : vector<64xf32> to vector<64x1xf32>
    %121 = tpu.reciprocal %120 {approx = true} : vector<64x1xf32> -> vector<64x1xf32>
    %122 = vector.broadcast %121 : vector<64x1xf32> to vector<64x64xf32>
    %123 = arith.mulf %118, %122 : vector<64x64xf32>
    %124 = arith.truncf %123 : vector<64x64xf32> to vector<64x64xbf16>
    %cst_34 = arith.constant dense<0.000000e+00> : vector<64x16xf32>
    %125 = tpu.matmul %124, %110, %cst_34 {dimension_numbers = #tpu.dot_dimension_numbers<[1], [0], [0], [1], [0, 0, 1, 1], [], []>} : vector<64x64xbf16>, vector<64x16xbf16>, vector<64x16xf32> -> vector<64x16xf32>
    %126 = vector.extract_strided_slice %18 {offsets = [0, 80], sizes = [64, 16], strides = [1, 1]} : vector<64x128xf32> to vector<64x16xf32>
    %127 = arith.truncf %126 : vector<64x16xf32> to vector<64x16xbf16>
    %128 = vector.extract_strided_slice %19 {offsets = [0, 80], sizes = [64, 16], strides = [1, 1]} : vector<64x128xf32> to vector<64x16xf32>
    %129 = arith.truncf %128 : vector<64x16xf32> to vector<64x16xbf16>
    %130 = vector.extract_strided_slice %20 {offsets = [0, 80], sizes = [64, 16], strides = [1, 1]} : vector<64x128xf32> to vector<64x16xf32>
    %131 = arith.truncf %130 : vector<64x16xf32> to vector<64x16xbf16>
    %cst_35 = arith.constant dense<0.000000e+00> : vector<64x64xf32>
    %132 = tpu.matmul %127, %129, %cst_35 {dimension_numbers = #tpu.dot_dimension_numbers<[1], [1], [0], [0], [0, 0, 1, 0], [], []>} : vector<64x16xbf16>, vector<64x16xbf16>, vector<64x64xf32> -> vector<64x64xf32>
    %133 = arith.mulf %132, %4 : vector<64x64xf32>
    %134 = arith.addf %133, %9 : vector<64x64xf32>
    %cst_36 = arith.constant dense<0xFF800000> : vector<64xf32>
    %135 = vector.multi_reduction <maximumf>, %134, %cst_36 [1] : vector<64x64xf32> to vector<64xf32>
    %136 = vector.shape_cast %135 : vector<64xf32> to vector<64x1xf32>
    %137 = vector.broadcast %136 : vector<64x1xf32> to vector<64x64xf32>
    %138 = arith.subf %134, %137 : vector<64x64xf32>
    %139 = math.exp %138 : vector<64x64xf32>
    %cst_37 = arith.constant dense<0.000000e+00> : vector<64xf32>
    %140 = vector.multi_reduction <add>, %139, %cst_37 [1] : vector<64x64xf32> to vector<64xf32>
    %141 = vector.shape_cast %140 : vector<64xf32> to vector<64x1xf32>
    %142 = tpu.reciprocal %141 {approx = true} : vector<64x1xf32> -> vector<64x1xf32>
    %143 = vector.broadcast %142 : vector<64x1xf32> to vector<64x64xf32>
    %144 = arith.mulf %139, %143 : vector<64x64xf32>
    %145 = arith.truncf %144 : vector<64x64xf32> to vector<64x64xbf16>
    %cst_38 = arith.constant dense<0.000000e+00> : vector<64x16xf32>
    %146 = tpu.matmul %145, %131, %cst_38 {dimension_numbers = #tpu.dot_dimension_numbers<[1], [0], [0], [1], [0, 0, 1, 1], [], []>} : vector<64x64xbf16>, vector<64x16xbf16>, vector<64x16xf32> -> vector<64x16xf32>
    %147 = vector.extract_strided_slice %18 {offsets = [0, 96], sizes = [64, 16], strides = [1, 1]} : vector<64x128xf32> to vector<64x16xf32>
    %148 = arith.truncf %147 : vector<64x16xf32> to vector<64x16xbf16>
    %149 = vector.extract_strided_slice %19 {offsets = [0, 96], sizes = [64, 16], strides = [1, 1]} : vector<64x128xf32> to vector<64x16xf32>
    %150 = arith.truncf %149 : vector<64x16xf32> to vector<64x16xbf16>
    %151 = vector.extract_strided_slice %20 {offsets = [0, 96], sizes = [64, 16], strides = [1, 1]} : vector<64x128xf32> to vector<64x16xf32>
    %152 = arith.truncf %151 : vector<64x16xf32> to vector<64x16xbf16>
    %cst_39 = arith.constant dense<0.000000e+00> : vector<64x64xf32>
    %153 = tpu.matmul %148, %150, %cst_39 {dimension_numbers = #tpu.dot_dimension_numbers<[1], [1], [0], [0], [0, 0, 1, 0], [], []>} : vector<64x16xbf16>, vector<64x16xbf16>, vector<64x64xf32> -> vector<64x64xf32>
    %154 = arith.mulf %153, %4 : vector<64x64xf32>
    %155 = arith.addf %154, %9 : vector<64x64xf32>
    %cst_40 = arith.constant dense<0xFF800000> : vector<64xf32>
    %156 = vector.multi_reduction <maximumf>, %155, %cst_40 [1] : vector<64x64xf32> to vector<64xf32>
    %157 = vector.shape_cast %156 : vector<64xf32> to vector<64x1xf32>
    %158 = vector.broadcast %157 : vector<64x1xf32> to vector<64x64xf32>
    %159 = arith.subf %155, %158 : vector<64x64xf32>
    %160 = math.exp %159 : vector<64x64xf32>
    %cst_41 = arith.constant dense<0.000000e+00> : vector<64xf32>
    %161 = vector.multi_reduction <add>, %160, %cst_41 [1] : vector<64x64xf32> to vector<64xf32>
    %162 = vector.shape_cast %161 : vector<64xf32> to vector<64x1xf32>
    %163 = tpu.reciprocal %162 {approx = true} : vector<64x1xf32> -> vector<64x1xf32>
    %164 = vector.broadcast %163 : vector<64x1xf32> to vector<64x64xf32>
    %165 = arith.mulf %160, %164 : vector<64x64xf32>
    %166 = arith.truncf %165 : vector<64x64xf32> to vector<64x64xbf16>
    %cst_42 = arith.constant dense<0.000000e+00> : vector<64x16xf32>
    %167 = tpu.matmul %166, %152, %cst_42 {dimension_numbers = #tpu.dot_dimension_numbers<[1], [0], [0], [1], [0, 0, 1, 1], [], []>} : vector<64x64xbf16>, vector<64x16xbf16>, vector<64x16xf32> -> vector<64x16xf32>
    %168 = vector.extract_strided_slice %18 {offsets = [0, 112], sizes = [64, 16], strides = [1, 1]} : vector<64x128xf32> to vector<64x16xf32>
    %169 = arith.truncf %168 : vector<64x16xf32> to vector<64x16xbf16>
    %170 = vector.extract_strided_slice %19 {offsets = [0, 112], sizes = [64, 16], strides = [1, 1]} : vector<64x128xf32> to vector<64x16xf32>
    %171 = arith.truncf %170 : vector<64x16xf32> to vector<64x16xbf16>
    %172 = vector.extract_strided_slice %20 {offsets = [0, 112], sizes = [64, 16], strides = [1, 1]} : vector<64x128xf32> to vector<64x16xf32>
    %173 = arith.truncf %172 : vector<64x16xf32> to vector<64x16xbf16>
    %cst_43 = arith.constant dense<0.000000e+00> : vector<64x64xf32>
    %174 = tpu.matmul %169, %171, %cst_43 {dimension_numbers = #tpu.dot_dimension_numbers<[1], [1], [0], [0], [0, 0, 1, 0], [], []>} : vector<64x16xbf16>, vector<64x16xbf16>, vector<64x64xf32> -> vector<64x64xf32>
    %175 = arith.mulf %174, %4 : vector<64x64xf32>
    %176 = arith.addf %175, %9 : vector<64x64xf32>
    %cst_44 = arith.constant dense<0xFF800000> : vector<64xf32>
    %177 = vector.multi_reduction <maximumf>, %176, %cst_44 [1] : vector<64x64xf32> to vector<64xf32>
    %178 = vector.shape_cast %177 : vector<64xf32> to vector<64x1xf32>
    %179 = vector.broadcast %178 : vector<64x1xf32> to vector<64x64xf32>
    %180 = arith.subf %176, %179 : vector<64x64xf32>
    %181 = math.exp %180 : vector<64x64xf32>
    %cst_45 = arith.constant dense<0.000000e+00> : vector<64xf32>
    %182 = vector.multi_reduction <add>, %181, %cst_45 [1] : vector<64x64xf32> to vector<64xf32>
    %183 = vector.shape_cast %182 : vector<64xf32> to vector<64x1xf32>
    %184 = tpu.reciprocal %183 {approx = true} : vector<64x1xf32> -> vector<64x1xf32>
    %185 = vector.broadcast %184 : vector<64x1xf32> to vector<64x64xf32>
    %186 = arith.mulf %181, %185 : vector<64x64xf32>
    %187 = arith.truncf %186 : vector<64x64xf32> to vector<64x64xbf16>
    %cst_46 = arith.constant dense<0.000000e+00> : vector<64x16xf32>
    %188 = tpu.matmul %187, %173, %cst_46 {dimension_numbers = #tpu.dot_dimension_numbers<[1], [0], [0], [1], [0, 0, 1, 1], [], []>} : vector<64x64xbf16>, vector<64x16xbf16>, vector<64x16xf32> -> vector<64x16xf32>
    %189 = tpu.concatenate %41, %62, %83, %104, %125, %146, %167, %188 in 1 : vector<64x16xf32>, vector<64x16xf32>, vector<64x16xf32>, vector<64x16xf32>, vector<64x16xf32>, vector<64x16xf32>, vector<64x16xf32>, vector<64x16xf32> -> vector<64x128xf32>
    %190 = arith.truncf %189 : vector<64x128xf32> to vector<64x128xbf16>
    %cst_47 = arith.constant dense<0.000000e+00> : vector<64x128xf32>
    %191 = tpu.matmul %190, %2, %cst_47 {dimension_numbers = #tpu.dot_dimension_numbers<[1], [0], [0], [1], [0, 0, 1, 1], [], []>} : vector<64x128xbf16>, vector<128x128xbf16>, vector<64x128xf32> -> vector<64x128xf32>
    %192 = vector.broadcast %3 : vector<1x128xf32> to vector<64x128xf32>
    %193 = arith.addf %191, %192 : vector<64x128xf32>
    %194 = arith.index_cast %c0_i32 : i32 to index
    %c0_48 = arith.constant 0 : index
    %c0_49 = arith.constant 0 : index
    %195 = vector.load %arg7[%194, %c0_48, %c0_49] : memref<1x64x128xf32, #tpu.memory_space<vmem>>, vector<1x64x128xf32>
    %196 = vector.shape_cast %195 : vector<1x64x128xf32> to vector<64x128xf32>
    %197 = vector.shape_cast %193 : vector<64x128xf32> to vector<1x64x128xf32>
    tpu.vector_store %arg7[%194, %c0_48, %c0_49], %197 {strides = array<i32>} : memref<1x64x128xf32, #tpu.memory_space<vmem>>, vector<1x64x128xf32>,
    %c1_i32 = arith.constant 1 : i32
    return
  }
  func.func @transform_0(%arg0: i32) -> (i32, i32, i32) {
    %c0_i32 = arith.constant 0 : i32
    %c0_i32_0 = arith.constant 0 : i32
    %c0_i32_1 = arith.constant 0 : i32
    return %arg0, %c0_i32, %c0_i32_0 : i32, i32, i32
  }
  func.func @transform_1(%arg0: i32) -> (i32, i32) {
    %c0_i32 = arith.constant 0 : i32
    %c0_i32_0 = arith.constant 0 : i32
    %c0_i32_1 = arith.constant 0 : i32
    return %c0_i32, %c0_i32_0 : i32, i32
  }
  func.func @transform_2(%arg0: i32) -> (i32, i32) {
    %c0_i32 = arith.constant 0 : i32
    %c0_i32_0 = arith.constant 0 : i32
    %c0_i32_1 = arith.constant 0 : i32
    return %c0_i32, %c0_i32_0 : i32, i32
  }
  func.func @transform_3(%arg0: i32) -> (i32, i32) {
    %c0_i32 = arith.constant 0 : i32
    %c0_i32_0 = arith.constant 0 : i32
    %c0_i32_1 = arith.constant 0 : i32
    return %c0_i32, %c0_i32_0 : i32, i32
  }
  func.func @transform_4(%arg0: i32) -> (i32, i32) {
    %c0_i32 = arith.constant 0 : i32
    %c0_i32_0 = arith.constant 0 : i32
    %c0_i32_1 = arith.constant 0 : i32
    return %c0_i32, %c0_i32_0 : i32, i32
  }
  func.func @transform_5(%arg0: i32) -> (i32, i32) {
    %c0_i32 = arith.constant 0 : i32
    %c0_i32_0 = arith.constant 0 : i32
    %c0_i32_1 = arith.constant 0 : i32
    return %c0_i32, %c0_i32_0 : i32, i32
  }
  func.func @transform_6(%arg0: i32) -> (i32, i32, i32) {
    %c0_i32 = arith.constant 0 : i32
    %c0_i32_0 = arith.constant 0 : i32
    %c0_i32_1 = arith.constant 0 : i32
    return %arg0, %c0_i32, %c0_i32_0 : i32, i32, i32
  }
}

</mosaic_0001>

<bundles_post_ra>
// kernel: tpu_custom_call.1
= control target key start
LH: loop header
LB: loop body
LE: loop exit
PB: predicated region body
PF: predicated region fallthrough
CT: control target
= control target key end

     0   :  { %11 = vsyncpa [#allocation3], 0  ;;  %s6738_s0 = inlined_call_operand.hbm [shape: bf16[2,64,128], index: 0, kind: input, shape index: {}]   ;;  %s6739_s1 = inlined_call_operand.hbm [shape: bf16[128,384], index: 1, kind: input, shape index: {}]   ;;  %s6740_s2 = inlined_call_operand.vmem [shape: f32[1,384], index: 2, kind: input, shape index: {}]   ;;  %s6741_s3 = inlined_call_operand.hbm [shape: bf16[128,128], index: 3, kind: input, shape index: {}]   ;;  %s6742_s4 = inlined_call_operand.vmem [shape: f32[1,128], index: 4, kind: input, shape index: {}]   ;;  %s6743_s5 = inlined_call_operand.hbm [shape: f32[64,64], index: 5, kind: input, shape index: {}]   ;;  %s6744_s6 = inlined_call_operand.hbm [shape: f32[2,64,128], index: 6, kind: output, shape index: {}]  }
   0x1   :  { %13 = vsyncpa [#allocation3 + $0x1], 0 }
   0x2   :  { %14 = vsyncpa [#allocation6], 0 }
   0x3   :  { %15 = vsyncpa [#allocation9], 0 }
   0x4   :  { %16 = vsyncpa [#allocation4], 0 }
   0x5   :  { %18 = vsyncpa [#allocation4 + $0x1], 0  ;;  %s5065_s21 = smov 0   ;;  %s5067_s22 = smov 0  }
   0x6   :  { %s5069_s23 = smov 0   ;;  %s5071_s24 = smov 0  }
   0x7 LB: > { %s5086_s25 = sadd.s32 4294967295, %s5006_s24   ;;  %s3657_s26 = sadd.s32 4294967294, %s5006_s24   ;;  %s5006_s24 = sphi %s5071_s24, %s6887_s24   ;;  %s5002_s23 = sphi %s5069_s23, %s6886_s23   ;;  %s4998_s22 = sphi %s5067_s22, %s6885_s22   ;;  %s4994_s21 = sphi %s5065_s21, %s6884_s21  }
   0x8   : > { %p44_p0 = scmp.ne.s32.totalorder %s4998_s22, %s4994_s21  ;;  %p6745_p1 = scmp.eq.s32.totalorder %s5086_s25, 0 }
   0x9   : > { %p179_p3 = scmp.eq.s32.totalorder %s3657_s26, 1  ;;  %p3658_p5 = scmp.ge.s32.totalorder %s5006_s24, 1 }
   0xa   : > { %p5095_p4 = por %p6745_p1, %p44_p0  ;;  %p186_p7 = scmp.lt.s32.totalorder %s5006_s24, 3 }
   0xb   : > { %p5100_p6 = por %p179_p3, %p44_p0  ;;  %s5008_s30 = smov [#allocation5]  }
   0xc   : > { %s6776_s27 = scalar_select %p5095_p4, 1, 0 }
   0xd   : > { %s6777_s28 = scalar_select %p5100_p6, 1, 0 }
   0xe   : > { %p5105_p8 = pnand %p3658_p5, %p186_p7  ;;  %s198_s7 = sshll.u32 %s5008_s30, 4  ;;  %s5109_s7 = int_to_ptr.vmem [resolvable:$true] %s198_s7 }
   0xf   : > { %s5009_s9 = smov [#allocation7]   ;;  %s4818_s13 = scalar_lea.hbm %s6739_s1, 3072 }
  0x10   : > { %s6778_s29 = scalar_select %p5105_p8, 1, 0 }
  0x11   : > { %p4284_p9 = pneg %p5105_p8  ;;  %s214_s10 = sshll.u32 %s5009_s9, 4  ;;  %s5120_s10 = int_to_ptr.vmem [resolvable:$true] %s214_s10 }
  0x12   : > { %p4819_p12 = scmp.ne.s32.totalorder %s6739_s1, %s4818_s13  ;;  %p4825_p5 = scmp.lt.u32.totalorder %s4818_s13, %s6739_s1 }
  0x13   : > { %p5116_p11 = pnand %p4284_p9, %p6745_p1 }
  0x15   : > { %p5130_p13 = pneg %p5116_p11 }
  0x17   : > { %p4821_p0 = pnand %p5130_p13, %p4819_p12 }
  0x19   : > { %p4822_p3 = pneg %p4821_p0 }
  0x1b   : > { %p4827_p7 = pnand %p4825_p5, %p4822_p3 }
  0x1d   : > { %4830 = shalt.err (!%p4827_p7)
}
  0x1e   : > { %s4831_s19 = scalar_lea.vmem %s5109_s7, 3072  ;;  %p4839_p2 = scmp.lt.s32.totalorder %s5109_s7, %s5109_s7 }
  0x1f   : > { %p4832_p9 = scmp.ne.s32.totalorder %s5109_s7, %s4831_s19  ;;  %p4840_p6 = scmp.lt.s32.totalorder %s4831_s19, %s4831_s19 }
  0x21   : > { %p4834_p10 = pnand %p4832_p9, %p5130_p13  ;;  %p4841_p12 = por %p4840_p6, %p4839_p2 }
  0x23   : > { %p4835_p1 = pneg %p4834_p10 }
  0x25   : > { %p4842_p0 = pnand %p4841_p12, %p4835_p1 }
  0x27   : > { %4845 = shalt.err (!%p4842_p0)
}
  0x28   : > { %s5010_s20 = smov 192   ;;  %s5011_s26 = smov 12  }
  0x29   : > { %4287 = dma.hbm_to_vmem [thread:$0]  (!%p5116_p11), %s6739_s1, 3072, %s5109_s7, [#allocation6], %s5010_s20, %s5010_s20, %s5011_s26  }
  0x2a   : > { %s4846_s13 = scalar_lea.hbm %s6741_s3, 1024 }
  0x2b   : > { %p4847_p2 = scmp.ne.s32.totalorder %s6741_s3, %s4846_s13  ;;  %p4853_p10 = scmp.lt.u32.totalorder %s4846_s13, %s6741_s3 }
  0x2d   : > { %p4849_p1 = pnand %p4847_p2, %p5130_p13 }
  0x2f   : > { %p4850_p6 = pneg %p4849_p1 }
  0x31   : > { %p4855_p3 = pnand %p4853_p10, %p4850_p6 }
  0x33   : > { %4858 = shalt.err (!%p4855_p3)
}
  0x34   : > { %s4859_s7 = scalar_lea.vmem %s5120_s10, 1024  ;;  %p4867_p12 = scmp.lt.s32.totalorder %s5120_s10, %s5120_s10 }
  0x35   : > { %p4860_p5 = scmp.ne.s32.totalorder %s5120_s10, %s4859_s7  ;;  %p4868_p0 = scmp.lt.s32.totalorder %s4859_s7, %s4859_s7 }
  0x37   : > { %p4862_p7 = pnand %p4860_p5, %p5130_p13  ;;  %p4869_p2 = por %p4868_p0, %p4867_p12 }
  0x39   : > { %p4863_p9 = pneg %p4862_p7 }
  0x3b   : > { %p4870_p1 = pnand %p4869_p2, %p4863_p9 }
  0x3d   : > { %4873 = shalt.err (!%p4870_p1)
}
  0x3e   : > { %s5012_s19 = smov 64   ;;  %s5013_s20 = smov 4  }
  0x3f   : > { %4290 = dma.hbm_to_vmem [thread:$0]  (!%p5116_p11), %s6741_s3, 1024, %s5120_s10, [#allocation6], %s5012_s19, %s5012_s19, %s5013_s20  }
  0x40   : > { %s5014_s9 = smov [#allocation8]   ;;  %s4874_s14 = scalar_lea.hbm %s6743_s5, 1024 }
  0x41   : > { %s230_s11 = sshll.u32 %s5014_s9, 4  ;;  %p4875_p6 = scmp.ne.s32.totalorder %s6743_s5, %s4874_s14  ;;  %s231_s11 = int_to_ptr.vmem [resolvable:$true] %s230_s11 }
  0x42   : > { %p4881_p5 = scmp.lt.u32.totalorder %s4874_s14, %s6743_s5 }
  0x43   : > { %p4877_p10 = pnand %p4875_p6, %p5130_p13 }
  0x45   : > { %p4878_p3 = pneg %p4877_p10 }
  0x47   : > { %p4883_p7 = pnand %p4881_p5, %p4878_p3 }
  0x49   : > { %4886 = shalt.err (!%p4883_p7)
}
  0x4a   : > { %s4887_s10 = scalar_lea.vmem %s231_s11, 1024  ;;  %p4895_p2 = scmp.lt.s32.totalorder %s231_s11, %s231_s11 }
  0x4b   : > { %p4888_p9 = scmp.ne.s32.totalorder %s231_s11, %s4887_s10  ;;  %p4896_p1 = scmp.lt.s32.totalorder %s4887_s10, %s4887_s10 }
  0x4d   : > { %p4890_p12 = pnand %p4888_p9, %p5130_p13  ;;  %p4897_p4 = por %p4896_p1, %p4895_p2 }
  0x4f   : > { %p4891_p0 = pneg %p4890_p12 }
  0x51   : > { %p4898_p8 = pnand %p4897_p4, %p4891_p0 }
  0x53   : > { %4901 = shalt.err (!%p4898_p8)
}
  0x54   : > { %s5015_s26 = smov 128   ;;  %s5016_s16 = smov 8  }
  0x55   : > { %4293 = dma.hbm_to_vmem [thread:$0]  (!%p5116_p11), %s6743_s5, 1024, %s231_s11, [#allocation9], %s5015_s26, %s5015_s26, %s5016_s16  }
  0x56   : > { %s5196_s12 = sadd.s32 1, %s5006_s24   ;;  %s31_s14 = sadd.s32 1, %s5002_s23 }
  0x57   : > { %s28_s13 = ssub.s32 %s5006_s24, %s5196_s12  ;;  %p38_p8 = scmp.ne.s32.totalorder %s5002_s23, %s4998_s22 }
  0x58   : > { %p29_p4 = scmp.eq.s32.totalorder %s28_s13, 0  ;;  %p39_p13 = scmp.eq.s32.totalorder %s5006_s24, 0 }
  0x59   : > { %p4305_p6 = scmp.lt.s32.totalorder %s5006_s24, 2  ;;  %p6781_p3 = scmp.eq.s32.totalorder %s5086_s25, 1 }
  0x5a   : > { %s5206_s15 = scalar_select %p29_p4, %s5002_s23, %s31_s14  }
  0x5b   : > { %p40_p10 = por %p39_p13, %p38_p8  ;;  %p5210_p5 = por %p6781_p3, %p38_p8 }
  0x5c   : > { %s244_s8 = sand.u32 1, %s5002_s23   ;;  %s3778_s18 = sshll.u32 %s5006_s24, 9 }
  0x5d   : > { %s3663_s11 = sshll.u32 %s244_s8, 5  ;;  %s5219_s26 = scalar_lea.hbm %s6738_s0, %s3778_s18 }
  0x5e   : > { %s248_s16 = scalar_lea.vmem [#allocation2], %s3663_s11  ;;  %p5221_p11 = pnand %p4305_p6, %p40_p10 }
  0x5f   : > { %s255_s30 = sshll.u32 %s248_s16, 4  ;;  %s5227_s13 = scalar_lea.sflag [#allocation3], %s244_s8  ;;  %s5225_s30 = int_to_ptr.vmem [resolvable:$true] %s255_s30 }
  0x60   : > { %s4902_s14 = scalar_lea.hbm %s5219_s26, 512  ;;  %p4904_p9 = pneg %p5221_p11 }
  0x61   : > { %p4903_p7 = scmp.ne.s32.totalorder %s5219_s26, %s4902_s14  ;;  %s4907_s7 = scalar_lea.hbm %s6738_s0, 1024 }
  0x62   : > { %p4908_p2 = scmp.lt.u32.totalorder %s5219_s26, %s6738_s0  ;;  %p4909_p1 = scmp.lt.u32.totalorder %s4907_s7, %s4902_s14 }
  0x63   : > { %p4905_p12 = pnand %p4904_p9, %p4903_p7  ;;  %p4911_p8 = scmp.lt.u32.totalorder %s4902_s14, %s5219_s26 }
  0x64   : > { %p4910_p4 = por %p4909_p1, %p4908_p2 }
  0x65   : > { %p4906_p0 = pneg %p4905_p12 }
  0x66   : > { %p4912_p13 = por %p4911_p8, %p4910_p4 }
  0x68   : > { %p4913_p6 = pnand %p4912_p13, %p4906_p0 }
  0x6a   : > { %4916 = shalt.err (!%p4913_p6)
}
  0x6b   : > { %s4917_s8 = scalar_lea.vmem %s5225_s30, 512  ;;  %s5017_s18 = smov [#allocation2]  }
  0x6c   : > { %p4918_p10 = scmp.ne.s32.totalorder %s5225_s30, %s4917_s8  ;;  %s4922_s11 = sshll.u32 %s5017_s18, 4  ;;  %s4923_s11 = int_to_ptr.vmem [resolvable:$false] %s4922_s11 }
  0x6d   : > { %s4924_s10 = scalar_lea.vmem %s4923_s11, 1024  ;;  %p4925_p12 = scmp.lt.s32.totalorder %s5225_s30, %s4923_s11 }
  0x6e   : > { %p4920_p3 = pnand %p4918_p10, %p4904_p9  ;;  %p4926_p2 = scmp.lt.s32.totalorder %s4924_s10, %s4917_s8 }
  0x70   : > { %p4921_p7 = pneg %p4920_p3  ;;  %p4927_p1 = por %p4926_p2, %p4925_p12 }
  0x72   : > { %p4928_p4 = pnand %p4927_p1, %p4921_p7 }
  0x74   : > { %4931 = shalt.err (!%p4928_p4)
}
  0x75   : > { %4297 = dma.hbm_to_vmem [thread:$0]  (!%p5221_p11), %s5219_s26, 512, %s5225_s30, %s5227_s13, %s5012_s19, %s5012_s19, %s5013_s20  }
  0x76   : > { %p6784_p9 = scmp.ne.s32.totalorder %s6778_s29, 0 }
  0x78   : > { %267 = sbr.rel (%p6784_p9) target bundleno = 5475 (0x1563), region = 44 }
  0x7f   : > { %s5261_s14 = sand.u32 1, %s4998_s22   ;;  %p6785_p0 = scmp.ne.s32.totalorder %s6776_s27, 0 }
  0x80   : > { %s3667_s7 = sshll.u32 %s5261_s14, 5  ;;  %s270_s16 = scalar_lea.sflag [#allocation3], %s5261_s14 }
  0x81   : > { %s5265_s8 = scalar_lea.vmem [#allocation2], %s3667_s7 }
  0x82   : > { %4977 = dma.done.wait (%p6785_p0), %s270_s16, 512  }
  0x83   : > { %4979 = vsyncadd (%p6785_p0), %s270_s16, 4294966784  ;;  %p6786_p11 = scmp.eq.s32.totalorder %s5086_s25, 0 }
  0x85   : > { %4981 = dma.done.wait (%p6786_p11), [#allocation6], 4096   ;;  %p6787_p8 = pmov %p6786_p11 }
  0x87   : > { %4983 = vsyncadd (%p6787_p8), [#allocation6], 4294963200  ;;  %p6788_p13 = pmov %p6787_p8 }
  0x88   : > { %p6789_p6 = pmov %p6787_p8 }
  0x89   : > { %4985 = dma.done.wait (%p6788_p13), [#allocation9], 1024  }
  0x8a   : > { %4987 = vsyncadd (%p6789_p6), [#allocation9], 4294966272  ;;  %v5018_v0 = vmov 0   ;;  %v4502_v1 = vld [vmem:[#allocation5 + $0x4] ss:$12 sps:$4 sm:$0xff]   ;;  %v5281_v18 = vld [vmem:[%s5265_s8 + $0x8] sm:$0xff]   ;;  %v398_v21 = vlaneseq }
  0x8b   : > { %597 = vmatprep.mubr.bf16.mxu0 %v5018_v0  ;;  %v4504_v2 = vld [vmem:[#allocation5] ss:$12 sps:$4 sm:$0xff]   ;;  %565 = vmatprep.subr.bf16.mxu0 %v4502_v1  ;;  %v4505_v3 = vld [vmem:[#allocation5 + $0x1c] ss:$12 sps:$4 sm:$0xff]   ;;  %v4507_v4 = vld [vmem:[#allocation5 + $0x18] ss:$12 sps:$4 sm:$0xff]  }
  0x8c   : > { %566 = vmatpush1.bf16.msra.mxu0 %v4504_v2  ;;  %v4508_v5 = vld [vmem:[#allocation5 + $0x34] ss:$12 sps:$4 sm:$0xff]   ;;  %v4510_v6 = vld [vmem:[#allocation5 + $0x30] ss:$12 sps:$4 sm:$0xff]   ;;  %v4511_v7 = vld [vmem:[#allocation5 + $0x4c] ss:$12 sps:$4 sm:$0xff]  }
  0x8d   : > { %567 = vmatprep.subr.bf16.mxu0 %v4505_v3  ;;  %v4513_v8 = vld [vmem:[#allocation5 + $0x48] ss:$12 sps:$4 sm:$0xff]   ;;  %v4526_v9 = vld [vmem:[%s5265_s8] sm:$0xff]   ;;  %v4522_v15 = vld [vmem:[#allocation5 + $0x90] ss:$12 sps:$4 sm:$0xff]   ;;  %v5292_v22 = vshrl.u32 %v398_v21, 7 }
  0x8e   : > { %v4514_v10 = vld [vmem:[#allocation5 + $0x64] ss:$12 sps:$4 sm:$0xff]   ;;  %3948 = vmatprep.mubr.bf16.mxu1 %v4526_v9  ;;  %v4516_v11 = vld [vmem:[#allocation5 + $0x60] ss:$12 sps:$4 sm:$0xff]   ;;  %v4517_v12 = vld [vmem:[#allocation5 + $0x7c] ss:$12 sps:$4 sm:$0xff]  }
  0x8f   : > { %v4519_v13 = vld [vmem:[#allocation5 + $0x78] ss:$12 sps:$4 sm:$0xff]   ;;  %v4520_v14 = vld [vmem:[#allocation5 + $0x94] ss:$12 sps:$4 sm:$0xff]   ;;  %v400_v23 = vsub.s32 0, %v5292_v22  ;;  %v404_v25 = vsub.s32 1, %v5292_v22 }
  0x90   : > { %568 = vmatpush1.bf16.msra.mxu0 %v4507_v4  ;;  %v4523_v16 = vld [vmem:[#allocation5 + $0xac] ss:$12 sps:$4 sm:$0xff]   ;;  %v4525_v17 = vld [vmem:[#allocation5 + $0xa8] ss:$12 sps:$4 sm:$0xff]   ;;  %v5298_v24 = vld [vmem:[%s6740_s2] sm:$0x7] }
  0x91   : > { %569 = vmatprep.subr.bf16.mxu0 %v4508_v5  ;;  %v5285_v19 = vld [vmem:[%s5265_s8 + $0x10] sm:$0xff]   ;;  %v5289_v20 = vld [vmem:[%s5265_s8 + $0x18] sm:$0xff]   ;;  %v401_v26 = vrot.slane %v5298_v24, %v400_v23  ;;  %v405_v28 = vrot.slane %v5298_v24, %v404_v25  ;;  %vm723_vm0 = vcmask 130048   ;;  %vm829_vm5 = vcmask 523264   ;;  %s5020_s19 = smov 112   ;;  %s5021_s20 = smov 96  }
  0x92   : > { %v4532_v21 = vld [vmem:[#allocation5 + $0x38] ss:$12 sps:$4 sm:$0xff]   ;;  %v4533_v23 = vld [vmem:[#allocation5 + $0x50] ss:$12 sps:$4 sm:$0xff]   ;;  %v4534_v25 = vld [vmem:[#allocation5 + $0x68] ss:$12 sps:$4 sm:$0xff]  }
  0x93   : > { %s5022_s26 = smov 80   ;;  %s5023_s30 = smov 64   ;;  %vm3357_vm10 = vcmask 261120   ;;  %vm3366_vm11 = vcmask 392192   ;;  %vm3383_vm12 = vcmask 654336   ;;  %vm3392_vm13 = vcmask 785408  }
  0x94   : > { %570 = vmatpush1.bf16.msra.mxu0 %v4510_v6  ;;  %s5024_s9 = smov 48   ;;  %s5025_s13 = smov 32   ;;  %vm3401_vm14 = vcmask 916480  }
  0x95   : > { %571 = vmatprep.subr.bf16.mxu0 %v4511_v7  ;;  %s5026_s18 = smov 16   ;;  %s3671_s11 = sshll.u32 %s5261_s14, 6 }
  0x96   : > { %s313_s16 = scalar_lea.vmem [#allocation10], %s3671_s11  ;;  %s3779_s27 = sshll.u32 %s5086_s25, 10 }
  0x97   : > { %s3555_s8 = sshll.u32 %s313_s16, 4  ;;  %s3542_s25 = scalar_lea.sflag [#allocation4], %s5261_s14  ;;  %s6689_s8 = int_to_ptr.vmem [resolvable:$true] %s3555_s8 }
  0x98   : > { %572 = vmatpush1.bf16.msra.mxu0 %v4513_v8 }
  0x99   : > { %573 = vmatprep.subr.bf16.mxu0 %v4514_v10 }
  0x9c   : > { %574 = vmatpush1.bf16.msra.mxu0 %v4516_v11 }
  0x9d   : > { %575 = vmatprep.subr.bf16.mxu0 %v4517_v12 }
  0xa0   : > { %576 = vmatpush1.bf16.msra.mxu0 %v4519_v13 }
  0xa1   : > { %577 = vmatprep.subr.bf16.mxu0 %v4520_v14 }
  0xa4   : > { %578 = vmatpush1.bf16.msra.mxu0 %v4522_v15 }
  0xa5   : > { %579 = vmatprep.subr.bf16.mxu0 %v4523_v16  ;;  %v4530_v16 = vld [vmem:[#allocation5 + $0x8] ss:$12 sps:$4 sm:$0xff]  }
  0xa6   : > { %3932 = vmatprep.subr.bf16.mxu1 %v4530_v16 }
  0xa7   : > { %3933 = vmatpush3.bf16.msra.mxu1 %v4530_v16 }
  0xa8   : > { %580 = vmatpush1.bf16.msra.mxu0 %v4525_v17  ;;  %v4531_v17 = vld [vmem:[#allocation5 + $0x20] ss:$12 sps:$4 sm:$0xff]  }
  0xa9   : > { %3934 = vmatprep.subr.bf16.mxu1 %v4531_v17 }
  0xab   : > { %598 = vmatmul.mubr.bf16.vlgmr.msra.gmra.mrb[0].mxu0 %v4526_v9  ;;  %3935 = vmatpush3.bf16.msra.mxu1 %v4531_v17 }
  0xac   : > { %607 = vmatprep.mubr.bf16.mxu0 %v5018_v0  ;;  %3936 = vmatprep.subr.bf16.mxu1 %v4532_v21 }
  0xaf   : > { %3937 = vmatpush3.bf16.msra.mxu1 %v4532_v21 }
  0xb0   : > { %3938 = vmatprep.subr.bf16.mxu1 %v4533_v23 }
  0xb3   : > { %608 = vmatmul.mubr.bf16.gmra.mrb[4].mxu0 %v5281_v18  ;;  %3939 = vmatpush3.bf16.msra.mxu1 %v4533_v23 }
  0xb4   : > { %617 = vmatprep.mubr.bf16.mxu0 %v5018_v0  ;;  %3940 = vmatprep.subr.bf16.mxu1 %v4534_v25 }
  0xb7   : > { %3941 = vmatpush3.bf16.msra.mxu1 %v4534_v25 }
  0xbb   : > { %618 = vmatmul.mubr.bf16.gmra.mrb[8].mxu0 %v5285_v19 }
  0xbc   : > { %627 = vmatprep.mubr.bf16.mxu0 %v5018_v0 }
  0xc3   : > { %628 = vmatmul.mubr.bf16.gmra.mrb[12].mxu0 %v5289_v20 }
 0x17e   : > { %v599_v27 = vpop.f32.mrb[0].mxu0 }
 0x17f   : > { %v600_v29 = vadd.f32 %v599_v27, %v401_v26  ;;  %v601_v30 = vpop.f32.mrb[1].mxu0  ;;  %v4536_v27 = vld [vmem:[#allocation5 + $0x98] ss:$12 sps:$4 sm:$0xff]  }
 0x180   : > { %v603_v31 = vpop.f32.mrb[2].mxu0  ;;  %v602_v34 = vadd.f32 %v601_v30, %v405_v28  ;;  %v5348_v30 = vld [vmem:[#allocation8] sm:$0xff] }
 0x181   : > { %v604_v32 = vadd.f32 %v603_v31, %v401_v26  ;;  %v605_v33 = vpop.f32.mrb[3].mxu0  ;;  %v703_v36 = vmul.f32 0.25, %v600_v29  ;;  %v5346_v29 = vld [vmem:[#allocation8 + $0x10] sm:$0xff]  ;;  %v5350_v31 = vld [vmem:[#allocation8 + $0x18] sm:$0xff]  ;;  %vm373_vm2 = vcmp.eq.f32.partialorder %v5348_v30, 0.0 }
 0x182   : > { %v606_v35 = vadd.f32 %v605_v33, %v405_v28  ;;  %vm375_vm1 = vcmp.eq.f32.partialorder %v5346_v29, 0.0  ;;  %vm376_vm3 = vcmp.eq.f32.partialorder %v5350_v31, 0.0 }
 0x183   : > { %v704_v37 = vmul.f32 0.25, %v604_v32  ;;  %v5352_v32 = vld [vmem:[#allocation8 + $0x8] sm:$0xff] }
 0x184   : > { %v5303_v38 = vpack.c.bf16 %v606_v35, %v602_v34  ;;  %vm374_vm4 = vcmp.eq.f32.partialorder %v5352_v32, 0.0 }
 0x185   : > { %v5305_v39 = vpack.c.bf16 %v704_v37, %v703_v36 }
 0x186   : > { %v609_v40 = vpop.f32.mrb[4].mxu0  ;;  %4236 = vmatprep.subr.msk.bf16.mxu0 %vm723_vm0, %v5303_v38  ;;  %v737_v41 = vsel %vm723_vm0, %v5303_v38, 0 }
 0x187   : > { %v610_v42 = vadd.f32 %v609_v40, %v401_v26  ;;  %v611_v43 = vpop.f32.mrb[5].mxu0  ;;  %3957 = vmatpush3.bf16.xpose.msra.mxu0 %v737_v41  ;;  %3964 = vmatprep.mubr.msk.bf16.mxu0 %vm723_vm0, %v5305_v39 }
 0x188   : > { %v613_v44 = vpop.f32.mrb[6].mxu0  ;;  %v612_v47 = vadd.f32 %v611_v43, %v405_v28 }
 0x189   : > { %v614_v45 = vadd.f32 %v613_v44, %v401_v26  ;;  %v615_v46 = vpop.f32.mrb[7].mxu0  ;;  %v705_v49 = vmul.f32 0.25, %v610_v42  ;;  %v5368_v44 = vld [vmem:[#allocation8 + $0x20] sm:$0xff] }
 0x18a   : > { %v616_v48 = vadd.f32 %v615_v46, %v405_v28  ;;  %vm377_vm6 = vcmp.eq.f32.partialorder %v5368_v44, 0.0 }
 0x18b   : > { %v706_v50 = vmul.f32 0.25, %v614_v45 }
 0x18c   : > { %v5313_v51 = vpack.c.bf16 %v616_v48, %v612_v47  ;;  %v5374_v48 = vld [vmem:[#allocation8 + $0x38] sm:$0xff] }
 0x18d   : > { %v5315_v52 = vpack.c.bf16 %v706_v50, %v705_v49  ;;  %v5377_v50 = vld [vmem:[#allocation8 + $0x30] sm:$0xff]  ;;  %vm380_vm7 = vcmp.eq.f32.partialorder %v5374_v48, 0.0 }
 0x18e   : > { %v619_v53 = vpop.f32.mrb[8].mxu0  ;;  %4237 = vmatprep.subr.msk.bf16.mxu0 %vm723_vm0, %v5313_v51  ;;  %v740_v54 = vsel %vm723_vm0, %v5313_v51, 0  ;;  %vm379_vm8 = vcmp.eq.f32.partialorder %v5377_v50, 0.0 }
 0x18f   : > { %v620_v55 = vadd.f32 %v619_v53, %v401_v26  ;;  %v621_v56 = vpop.f32.mrb[9].mxu0  ;;  %3959 = vmatpush3.bf16.xpose.msra.mxu0 %v740_v54 }
 0x190   : > { %v623_v57 = vpop.f32.mrb[10].mxu0  ;;  %v622_v60 = vadd.f32 %v621_v56, %v405_v28  ;;  %v5382_v56 = vld [vmem:[#allocation8 + $0x28] sm:$0xff] }
 0x191   : > { %v624_v58 = vadd.f32 %v623_v57, %v401_v26  ;;  %v625_v59 = vpop.f32.mrb[11].mxu0  ;;  %v707_v62 = vmul.f32 0.25, %v620_v55  ;;  %vm378_vm9 = vcmp.eq.f32.partialorder %v5382_v56, 0.0 }
 0x192   : > { %v626_v61 = vadd.f32 %v625_v59, %v405_v28 }
 0x193   : > { %v708_v63 = vmul.f32 0.25, %v624_v58 }
 0x194   : > { %v5321_v0 = vpack.c.bf16 %v626_v61, %v622_v60 }
 0x195   : > { %v5323_v1 = vpack.c.bf16 %v708_v63, %v707_v62 }
 0x196   : > { %v629_v2 = vpop.f32.mrb[12].mxu0  ;;  %4238 = vmatprep.subr.msk.bf16.mxu0 %vm723_vm0, %v5321_v0  ;;  %v743_v3 = vsel %vm723_vm0, %v5321_v0, 0 }
 0x197   : > { %v630_v4 = vadd.f32 %v629_v2, %v401_v26  ;;  %v631_v5 = vpop.f32.mrb[13].mxu0  ;;  %3961 = vmatpush3.bf16.xpose.msra.mxu0 %v743_v3 }
 0x198   : > { %v633_v6 = vpop.f32.mrb[14].mxu0  ;;  %v632_v9 = vadd.f32 %v631_v5, %v405_v28 }
 0x199   : > { %v634_v7 = vadd.f32 %v633_v6, %v401_v26  ;;  %v635_v8 = vpop.f32.mrb[15].mxu0  ;;  %v709_v11 = vmul.f32 0.25, %v630_v4  ;;  %v4535_v26 = vld [vmem:[#allocation5 + $0x80] ss:$12 sps:$4 sm:$0xff]  }
 0x19a   : > { %v636_v10 = vadd.f32 %v635_v8, %v405_v28  ;;  %3942 = vmatprep.subr.bf16.mxu1 %v4535_v26  ;;  %v4537_v28 = vld [vmem:[#allocation5 + $0xb0] ss:$12 sps:$4 sm:$0xff]  }
 0x19b   : > { %v710_v12 = vmul.f32 0.25, %v634_v7  ;;  %3943 = vmatpush3.bf16.msra.mxu1 %v4535_v26 }
 0x19c   : > { %v5329_v13 = vpack.c.bf16 %v636_v10, %v632_v9  ;;  %3944 = vmatprep.subr.bf16.mxu1 %v4536_v27 }
 0x19d   : > { %v5331_v14 = vpack.c.bf16 %v710_v12, %v709_v11 }
 0x19e   : > { %4239 = vmatprep.subr.msk.bf16.mxu0 %vm723_vm0, %v5329_v13  ;;  %v746_v15 = vsel %vm723_vm0, %v5329_v13, 0 }
 0x19f   : > { %3963 = vmatpush3.bf16.xpose.msra.mxu0 %v746_v15  ;;  %3945 = vmatpush3.bf16.msra.mxu1 %v4536_v27 }
 0x1a0   : > { %3946 = vmatprep.subr.bf16.mxu1 %v4537_v28 }
 0x1a3   : > { %3947 = vmatpush3.bf16.msra.mxu1 %v4537_v28 }
 0x1a6   : > { %3965 = vmatmul.mubr.msk.bf16.vlgmr.msra.gmra.mrb[16].mxu0 %vm723_vm0, %v5315_v52  ;;  %3949 = vmatmul.mubr.bf16.vlgmr.msra.gmra.mrb[0].mxu1 %v5281_v18  ;;  %v5019_v18 = vmov 0.0  }
 0x1a7   : > { %3968 = vmatprep.mubr.msk.bf16.mxu0 %vm723_vm0, %v5323_v1  ;;  %3952 = vmatprep.mubr.bf16.mxu1 %v5285_v19  ;;  %v5357_v34 = vsel %vm375_vm1, -inf, %v5019_v18  ;;  %v5361_v35 = vsel %vm373_vm2, -inf, %v5019_v18  ;;  %v5364_v40 = vsel %vm376_vm3, -inf, %v5019_v18  ;;  %v5370_v45 = vsel %vm374_vm4, -inf, %v5019_v18 }
 0x1a8   : > { %v5388_v60 = vsel %vm377_vm6, -inf, %v5019_v18  ;;  %v5394_v3 = vsel %vm380_vm7, -inf, %v5019_v18  ;;  %v5397_v6 = vsel %vm379_vm8, -inf, %v5019_v18  ;;  %v5403_v9 = vsel %vm378_vm9, -inf, %v5019_v18 }
 0x1ae   : > { %3969 = vmatmul.mubr.msk.bf16.gmra.mrb[20].mxu0 %vm723_vm0, %v5331_v14  ;;  %3953 = vmatmul.mubr.bf16.gmra.mrb[4].mxu1 %v5289_v20 }
 0x279   : > { %v3966_v33 = vpop.f32.mrb[16].mxu0 }
 0x27a   : > { %v815_v19 = vmul.f32 %v3966_v33, %v5346_v29  ;;  %v782_v20 = vpop.f32.mrb[17].mxu0 }
 0x27b   : > { %v813_v36 = vmul.f32 %v782_v20, %v5348_v30  ;;  %v3967_v37 = vpop.f32.mrb[18].mxu0 }
 0x27c   : > { %v816_v41 = vmul.f32 %v3967_v37, %v5350_v31  ;;  %v785_v42 = vpop.f32.mrb[19].mxu0  ;;  %v823_v43 = vadd.f32 %v815_v19, %v5357_v34 }
 0x27d   : > { %v814_v46 = vmul.f32 %v785_v42, %v5352_v32  ;;  %v821_v47 = vadd.f32 %v813_v36, %v5361_v35  ;;  %v408_v36 = vsub.s32 2, %v5292_v22 }
 0x27e   : > { %v836_v49 = vsel %vm829_vm5, %v823_v43, -inf  ;;  %v824_v53 = vadd.f32 %v816_v41, %v5364_v40 }
 0x27f   : > { %837 = vmax.xlane.f32.xlu1 %v836_v49  ;;  %v830_v54 = vsel %vm829_vm5, %v821_v47, -inf  ;;  %v822_v55 = vadd.f32 %v814_v46, %v5370_v45  ;;  %v409_v46 = vrot.slane %v5298_v24, %v408_v36  ;;  %v3950_v49 = vpop.f32.mrb[0].mxu1 }
 0x280   : > { %831 = vmax.xlane.f32.xlu0 %v830_v54  ;;  %v839_v59 = vsel %vm829_vm5, %v824_v53, -inf  ;;  %v672_v54 = vpop.f32.mrb[1].mxu1 }
 0x281   : > { %v3970_v57 = vpop.f32.mrb[20].mxu0  ;;  %v833_v2 = vsel %vm829_vm5, %v822_v55, -inf }
 0x282   : > { %v798_v58 = vpop.f32.mrb[21].mxu0  ;;  %v819_v61 = vmul.f32 %v3970_v57, %v5377_v50  ;;  %v3951_v57 = vpop.f32.mrb[2].mxu1 }
 0x283   : > { %v817_v62 = vmul.f32 %v798_v58, %v5368_v44  ;;  %840 = vmax.xlane.f32.xlu1 %v839_v59  ;;  %v3971_v63 = vpop.f32.mrb[22].mxu0  ;;  %v684_v58 = vadd.f32 %v3951_v57, %v409_v46  ;;  %v675_v59 = vpop.f32.mrb[3].mxu1 }
 0x284   : > { %v820_v4 = vmul.f32 %v3971_v63, %v5374_v48  ;;  %834 = vmax.xlane.f32.xlu0 %v833_v2  ;;  %v801_v5 = vpop.f32.mrb[23].mxu0  ;;  %v5411_v12 = vadd.f32 %v819_v61, %v5397_v6  ;;  %v3954_v2 = vpop.f32.mrb[4].mxu1 }
 0x285   : > { %v818_v7 = vmul.f32 %v801_v5, %v5382_v56  ;;  %v5401_v8 = vadd.f32 %v817_v62, %v5388_v60 }
 0x286   : > { %v5406_v10 = vadd.f32 %v820_v4, %v5394_v3  ;;  %v848_v17 = vsel %vm829_vm5, %v5411_v12, -inf }
 0x287   : > { %v842_v11 = vsel %vm829_vm5, %v5401_v8, -inf  ;;  %v5416_v16 = vadd.f32 %v818_v7, %v5403_v9  ;;  %v697_v7 = vadd.f32 %v3954_v2, %v409_v46 }
 0x288   : > { %843 = vmax.xlane.f32.xlu0 %v842_v11  ;;  %v851_v15 = vsel %vm829_vm5, %v5406_v10, -inf  ;;  %v688_v11 = vpop.f32.mrb[5].mxu1 }
 0x289   : > { %852 = vmax.xlane.f32.xlu1 %v851_v15  ;;  %v845_v21 = vsel %vm829_vm5, %v5416_v16, -inf }
 0x28c   : > { %849 = vmax.xlane.f32.xlu0 %v848_v17  ;;  %v689_v17 = vadd.f32 %v688_v11, %v409_v46 }
 0x28d   : > { %846 = vmax.xlane.f32.xlu1 %v845_v21  ;;  %v3955_v21 = vpop.f32.mrb[6].mxu1 }
 0x29e   : > { %1017 = vrot.lane.b32.xlu1 %v5313_v51, %s5020_s19 }
 0x2a2   : > { %1019 = vrot.lane.b32.xlu1 %v5321_v0, %s5020_s19 }
 0x30c   : > { %v838_v23 = vpop.xlane.xlu1 %837 }
 0x30d   : > { %v856_v25 = vsub.f32 %v823_v43, %v838_v23  ;;  %v832_v26 = vpop.xlane.xlu0 %831  ;;  %v681_v43 = vadd.f32 %v3950_v49, %v409_v46  ;;  %v700_v23 = vadd.f32 %v3955_v21, %v409_v46 }
 0x30e   : > { %v854_v27 = vsub.f32 %v821_v47, %v832_v26  ;;  %v673_v47 = vadd.f32 %v672_v54, %v409_v46 }
 0x30f   : > { %v866_v28 = vmul.f32 1.442695, %v856_v25  ;;  %v691_v25 = vpop.f32.mrb[7].mxu1 }
 0x310   : > { %v862_v33 = vmul.f32 1.442695, %v854_v27  ;;  %v841_v18 = vpop.xlane.xlu1 %840  ;;  %v692_v26 = vadd.f32 %v691_v25, %v409_v46 }
 0x311   : > { %4546 = vpow2.f32 %v866_v28  ;;  %v857_v19 = vsub.f32 %v824_v53, %v841_v18  ;;  %v835_v20 = vpop.xlane.xlu0 %834  ;;  %v676_v53 = vadd.f32 %v675_v59, %v409_v46  ;;  %v5451_v28 = vpack.c.bf16 %v700_v23, %v697_v7 }
 0x312   : > { %v855_v37 = vsub.f32 %v822_v55, %v835_v20  ;;  %4548 = vpow2.f32 %v862_v33  ;;  %v5432_v55 = vpack.c.bf16 %v684_v58, %v681_v43  ;;  %v5454_v33 = vpack.c.bf16 %v692_v26, %v689_v17 }
 0x313   : > { %v868_v41 = vmul.f32 1.442695, %v857_v19  ;;  %v5436_v24 = vpack.c.bf16 %v676_v53, %v673_v47  ;;  %6790 = vst [vmem:[#allocation15_spill] sm:$0xff] %v5451_v28 }
 0x314   : > { %v864_v42 = vmul.f32 1.442695, %v855_v37 }
 0x315   : > { %4550 = vpow2.f32 %v868_v41  ;;  %3972 = vmatprep.subr.bf16.mxu1 %v5436_v24  ;;  %v844_v18 = vpop.xlane.xlu0 %843 }
 0x316   : > { %4552 = vpow2.f32 %v864_v42  ;;  %3973 = vmatpush3.bf16.msra.mxu1 %v5436_v24  ;;  %v853_v20 = vpop.xlane.xlu1 %852  ;;  %v858_v37 = vsub.f32 %v5401_v8, %v844_v18 }
 0x317   : > { %3974 = vmatprep.subr.bf16.mxu1 %v5432_v55  ;;  %v861_v41 = vsub.f32 %v5406_v10, %v853_v20 }
 0x318   : > { %v870_v49 = vmul.f32 1.442695, %v858_v37 }
 0x319   : > { %v850_v19 = vpop.xlane.xlu0 %849  ;;  %v876_v43 = vmul.f32 1.442695, %v861_v41 }
 0x31a   : > { %3975 = vmatpush3.bf16.msra.mxu1 %v5432_v55  ;;  %v860_v36 = vsub.f32 %v5411_v12, %v850_v19  ;;  %v847_v46 = vpop.xlane.xlu1 %846 }
 0x31b   : > { %v5428_v61 = vpop.eup %4546  ;;  %3976 = vmatprep.subr.bf16.mxu1 %v5454_v33  ;;  %v859_v54 = vsub.f32 %v5416_v16, %v847_v46 }
 0x31c   : > { %v884_v22 = vsel %vm829_vm5, %v5428_v61, 0.0  ;;  %v5434_v62 = vpop.eup %4548  ;;  %v874_v42 = vmul.f32 1.442695, %v860_v36 }
 0x31d   : > { %885 = vadd.xlane.f32.xlu0 %v884_v22  ;;  %v878_v4 = vsel %vm829_vm5, %v5434_v62, 0.0  ;;  %v872_v47 = vmul.f32 1.442695, %v859_v54 }
 0x31e   : > { %3977 = vmatpush3.bf16.msra.mxu1 %v5454_v33  ;;  %4554 = vpow2.f32 %v874_v42  ;;  %v1018_v22 = vpop.permute.xlu1 %1017 }
 0x31f   : > { %v5438_v63 = vpop.eup %4550  ;;  %3978 = vmatprep.subr.bf16.mxu1 %v5451_v28  ;;  %4556 = vpow2.f32 %v870_v49  ;;  %v1039_v49 = vsel %vm723_vm0, %v1018_v22, 0 }
 0x320   : > { %v887_v5 = vsel %vm829_vm5, %v5438_v63, 0.0  ;;  %v5446_v15 = vpop.eup %4552  ;;  %4558 = vpow2.f32 %v876_v43 }
 0x321   : > { %879 = vadd.xlane.f32.xlu0 %v878_v4  ;;  %888 = vadd.xlane.f32.xlu1 %v887_v5  ;;  %v881_v27 = vsel %vm829_vm5, %v5446_v15, 0.0  ;;  %4560 = vpow2.f32 %v872_v47 }
 0x322   : > { %3979 = vmatpush3.bf16.msra.mxu1 %v5451_v28  ;;  %v1020_v2 = vpop.permute.xlu1 %1019 }
 0x325   : > { %882 = vadd.xlane.f32.xlu1 %v881_v27 }
 0x328   : > { %v5468_v57 = vpop.eup %4554 }
 0x329   : > { %v5470_v58 = vpop.eup %4556  ;;  %v896_v8 = vsel %vm829_vm5, %v5468_v57, 0.0 }
 0x32a   : > { %v5474_v12 = vpop.eup %4558  ;;  %v890_v10 = vsel %vm829_vm5, %v5470_v58, 0.0 }
 0x32b   : > { %v899_v16 = vsel %vm829_vm5, %v5474_v12, 0.0  ;;  %v5480_v59 = vpop.eup %4560 }
 0x32c   : > { %v893_v53 = vsel %vm829_vm5, %v5480_v59, 0.0 }
 0x336   : > { %1321 = vrot.lane.b32.xlu1 %v5303_v38, %s5021_s20 }
 0x337   : > { %1015 = vrot.lane.b32.xlu0 %v5303_v38, %s5020_s19 }
 0x356   : > { %897 = vadd.xlane.f32.xlu0 %v896_v8 }
 0x35a   : > { %891 = vadd.xlane.f32.xlu0 %v890_v10  ;;  %900 = vadd.xlane.f32.xlu1 %v899_v16 }
 0x35e   : > { %894 = vadd.xlane.f32.xlu1 %v893_v53 }
 0x36f   : > { %1323 = vrot.lane.b32.xlu1 %v5313_v51, %s5021_s20 }
 0x370   : > { %1021 = vrot.lane.b32.xlu0 %v5329_v13, %s5020_s19 }
 0x373   : > { %1005 = vrot.lane.b32.xlu1 %v5315_v52, %s5020_s19 }
 0x374   : > { %1003 = vrot.lane.b32.xlu0 %v5305_v39, %s5020_s19 }
 0x377   : > { %1007 = vrot.lane.b32.xlu1 %v5323_v1, %s5020_s19 }
 0x378   : > { %1325 = vrot.lane.b32.xlu0 %v5321_v0, %s5021_s20 }
 0x37b   : > { %1327 = vrot.lane.b32.xlu1 %v5329_v13, %s5021_s20 }
 0x37c   : > { %1009 = vrot.lane.b32.xlu0 %v5331_v14, %s5020_s19 }
 0x37f   : > { %1315 = vrot.lane.b32.xlu1 %v5315_v52, %s5021_s20 }
 0x380   : > { %1313 = vrot.lane.b32.xlu0 %v5305_v39, %s5021_s20 }
 0x383   : > { %1319 = vrot.lane.b32.xlu1 %v5331_v14, %s5021_s20 }
 0x384   : > { %1317 = vrot.lane.b32.xlu0 %v5323_v1, %s5021_s20 }
 0x3aa   : > { %v886_v4 = vpop.xlane.xlu0 %885 }
 0x3ae   : > { %v880_v5 = vpop.xlane.xlu0 %879  ;;  %v889_v7 = vpop.xlane.xlu1 %888 }
 0x3af   : > { %4562 = vrcp.f32 %v889_v7 }
 0x3b0   : > { %4564 = vrcp.f32 %v880_v5 }
 0x3b1   : > { %4566 = vrcp.f32 %v886_v4 }
 0x3b2   : > { %v1016_v11 = vpop.permute.xlu0 %1015  ;;  %v883_v17 = vpop.xlane.xlu1 %882 }
 0x3b3   : > { %4568 = vrcp.f32 %v883_v17  ;;  %4240 = vmatprep.subr.msk.bf16.mxu1 %vm723_vm0, %v1016_v11  ;;  %v1036_v46 = vsel %vm723_vm0, %v1016_v11, 0 }
 0x3b6   : > { %v1322_v21 = vpop.permute.xlu1 %1321 }
 0x3b7   : > { %4244 = vmatprep.subr.msk.bf16.mxu0 %vm723_vm0, %v1322_v21  ;;  %v1342_v23 = vsel %vm723_vm0, %v1322_v21, 0 }
 0x3b8   : > { %4021 = vmatpush3.bf16.xpose.msra.mxu0 %v1342_v23 }
 0x3b9   : > { %v4563_v25 = vpop.eup %4562 }
 0x3ba   : > { %v4565_v26 = vpop.eup %4564  ;;  %v913_v19 = vmul.f32 %v4563_v25, %v5438_v63 }
 0x3bb   : > { %v4567_v27 = vpop.eup %4566  ;;  %v910_v20 = vmul.f32 %v4565_v26, %v5434_v62  ;;  %v1042_v62 = vsel %vm723_vm0, %v1020_v2, 0 }
 0x3bc   : > { %v912_v37 = vmul.f32 %v4567_v27, %v5428_v61 }
 0x3bd   : > { %v4569_v18 = vpop.eup %4568 }
 0x3be   : > { %v911_v36 = vmul.f32 %v4569_v18, %v5446_v15  ;;  %v919_v42 = vpack.c.bf16 %v913_v19, %v912_v37 }
 0x3c0   : > { %v918_v41 = vpack.c.bf16 %v911_v36, %v910_v20 }
 0x3c2   : > { %3980 = vmatprep.mubr.msk.bf16.mxu1 %vm829_vm5, %v918_v41 }
 0x3c3   : > { %3981 = vmatmul.mubr.msk.bf16.vlgmr.msra.gmra.mrb[8].mxu1 %vm829_vm5, %v919_v42 }
 0x3c4   : > { %3989 = vmatpush3.bf16.xpose.msra.mxu1 %v1036_v46 }
 0x3c5   : > { %4241 = vmatprep.subr.msk.bf16.mxu1 %vm723_vm0, %v1018_v22 }
 0x3cc   : > { %3991 = vmatpush3.bf16.xpose.msra.mxu1 %v1039_v49 }
 0x3cd   : > { %4242 = vmatprep.subr.msk.bf16.mxu1 %vm723_vm0, %v1020_v2 }
 0x3d4   : > { %3993 = vmatpush3.bf16.xpose.msra.mxu1 %v1042_v62 }
 0x3e3   : > { %v898_v61 = vpop.xlane.xlu0 %897 }
 0x3e7   : > { %v892_v63 = vpop.xlane.xlu0 %891  ;;  %v901_v15 = vpop.xlane.xlu1 %900 }
 0x3e8   : > { %4570 = vrcp.f32 %v901_v15 }
 0x3e9   : > { %4572 = vrcp.f32 %v892_v63 }
 0x3ea   : > { %4574 = vrcp.f32 %v898_v61 }
 0x3eb   : > { %v1022_v43 = vpop.permute.xlu0 %1021  ;;  %v895_v54 = vpop.xlane.xlu1 %894 }
 0x3ec   : > { %4576 = vrcp.f32 %v895_v54  ;;  %4243 = vmatprep.subr.msk.bf16.mxu1 %vm723_vm0, %v1022_v43  ;;  %v1045_v47 = vsel %vm723_vm0, %v1022_v43, 0 }
 0x3ed   : > { %3995 = vmatpush3.bf16.xpose.msra.mxu1 %v1045_v47 }
 0x3ef   : > { %v1004_v8 = vpop.permute.xlu0 %1003  ;;  %v1324_v10 = vpop.permute.xlu1 %1323 }
 0x3f0   : > { %4245 = vmatprep.subr.msk.bf16.mxu0 %vm723_vm0, %v1324_v10  ;;  %v1345_v16 = vsel %vm723_vm0, %v1324_v10, 0 }
 0x3f1   : > { %4023 = vmatpush3.bf16.xpose.msra.mxu0 %v1345_v16 }
 0x3f2   : > { %v4571_v53 = vpop.eup %4570 }
 0x3f3   : > { %v1326_v22 = vpop.permute.xlu0 %1325  ;;  %v1006_v2 = vpop.permute.xlu1 %1005  ;;  %v917_v11 = vmul.f32 %v4571_v53, %v5474_v12 }
 0x3f4   : > { %v4573_v4 = vpop.eup %4572  ;;  %4246 = vmatprep.subr.msk.bf16.mxu0 %vm723_vm0, %v1326_v22  ;;  %v1348_v26 = vsel %vm723_vm0, %v1326_v22, 0 }
 0x3f5   : > { %v4575_v5 = vpop.eup %4574  ;;  %v914_v23 = vmul.f32 %v4573_v4, %v5470_v58 }
 0x3f6   : > { %v4577_v7 = vpop.eup %4576  ;;  %v916_v27 = vmul.f32 %v4575_v5, %v5468_v57 }
 0x3f7   : > { %v1010_v17 = vpop.permute.xlu0 %1009  ;;  %v1008_v21 = vpop.permute.xlu1 %1007  ;;  %v915_v25 = vmul.f32 %v4577_v7, %v5480_v59 }
 0x3f8   : > { %v921_v19 = vpack.c.bf16 %v917_v11, %v916_v27 }
 0x3f9   : > { %4025 = vmatpush3.bf16.xpose.msra.mxu0 %v1348_v26  ;;  %v920_v18 = vpack.c.bf16 %v915_v25, %v914_v23 }
 0x3fb   : > { %v1314_v20 = vpop.permute.xlu0 %1313  ;;  %3984 = vmatprep.mubr.msk.bf16.mxu1 %vm829_vm5, %v920_v18  ;;  %v1328_v36 = vpop.permute.xlu1 %1327 }
 0x3fc   : > { %3985 = vmatmul.mubr.msk.bf16.gmra.mrb[12].mxu1 %vm829_vm5, %v921_v19  ;;  %4247 = vmatprep.subr.msk.bf16.mxu0 %vm723_vm0, %v1328_v36  ;;  %v1351_v58 = vsel %vm723_vm0, %v1328_v36, 0 }
 0x3fd   : > { %4028 = vmatprep.mubr.msk.bf16.mxu0 %vm723_vm0, %v1314_v20  ;;  %3996 = vmatprep.mubr.msk.bf16.mxu1 %vm723_vm0, %v1004_v8 }
 0x3ff   : > { %v1316_v57 = vpop.permute.xlu1 %1315  ;;  %v1318_v12 = vpop.permute.xlu0 %1317 }
 0x401   : > { %4027 = vmatpush3.bf16.xpose.msra.mxu0 %v1351_v58 }
 0x403   : > { %v1320_v59 = vpop.permute.xlu1 %1319 }
 0x404   : > { %3997 = vmatmul.mubr.msk.bf16.vlgmr.msra.gmra.mrb[16].mxu1 %vm723_vm0, %v1006_v2 }
 0x405   : > { %4000 = vmatprep.mubr.msk.bf16.mxu1 %vm723_vm0, %v1008_v21 }
 0x408   : > { %4029 = vmatmul.mubr.msk.bf16.vlgmr.msra.gmra.mrb[24].mxu0 %vm723_vm0, %v1316_v57 }
 0x409   : > { %4032 = vmatprep.mubr.msk.bf16.mxu0 %vm723_vm0, %v1318_v12 }
 0x40c   : > { %4001 = vmatmul.mubr.msk.bf16.gmra.mrb[20].mxu1 %vm723_vm0, %v1010_v17 }
 0x410   : > { %4033 = vmatmul.mubr.msk.bf16.gmra.mrb[28].mxu0 %vm723_vm0, %v1320_v59 }
 0x496   : > { %v5544_v37 = vpop.f32.mrb[8].mxu1 }
 0x497   : > { %6791 = vst [vmem:[#allocation16_spill] sm:$0xff] %v5544_v37  ;;  %v5546_v41 = vpop.f32.mrb[9].mxu1 }
 0x498   : > { %6792 = vst [vmem:[#allocation17_spill] sm:$0xff] %v5546_v41  ;;  %v5548_v42 = vpop.f32.mrb[10].mxu1 }
 0x499   : > { %6793 = vst [vmem:[#allocation18_spill] sm:$0xff] %v5548_v42  ;;  %v5550_v46 = vpop.f32.mrb[11].mxu1 }
 0x49a   : > { %6794 = vst [vmem:[#allocation19_spill] sm:$0xff] %v5550_v46 }
 0x4cf   : > { %v5552_v49 = vpop.f32.mrb[12].mxu1 }
 0x4d0   : > { %6795 = vst [vmem:[#allocation20_spill] sm:$0xff] %v5552_v49  ;;  %v5554_v62 = vpop.f32.mrb[13].mxu1 }
 0x4d1   : > { %6796 = vst [vmem:[#allocation21_spill] sm:$0xff] %v5554_v62  ;;  %v5556_v61 = vpop.f32.mrb[14].mxu1 }
 0x4d2   : > { %6797 = vst [vmem:[#allocation22_spill] sm:$0xff] %v5556_v61  ;;  %v5558_v63 = vpop.f32.mrb[15].mxu1 }
 0x4d3   : > { %6798 = vst [vmem:[#allocation23_spill] sm:$0xff] %v5558_v63 }
 0x4d7   : > { %v3998_v15 = vpop.f32.mrb[16].mxu1 }
 0x4d8   : > { %v1081_v43 = vpop.f32.mrb[17].mxu1 }
 0x4d9   : > { %v3999_v54 = vpop.f32.mrb[18].mxu1 }
 0x4da   : > { %v1084_v47 = vpop.f32.mrb[19].mxu1 }
 0x4db   : > { %v4030_v8 = vpop.f32.mrb[24].mxu0 }
 0x4dc   : > { %v1387_v10 = vpop.f32.mrb[25].mxu0  ;;  %v1420_v16 = vmul.f32 %v4030_v8, %v5346_v29 }
 0x4dd   : > { %v1418_v53 = vmul.f32 %v1387_v10, %v5348_v30  ;;  %v4031_v22 = vpop.f32.mrb[26].mxu0 }
 0x4de   : > { %v1390_v2 = vpop.f32.mrb[27].mxu0  ;;  %v1421_v4 = vmul.f32 %v4031_v22, %v5350_v31  ;;  %v5575_v26 = vadd.f32 %v1420_v16, %v5357_v34 }
 0x4df   : > { %v1419_v5 = vmul.f32 %v1390_v2, %v5352_v32  ;;  %v4002_v7 = vpop.f32.mrb[20].mxu1  ;;  %v5565_v11 = vadd.f32 %v1418_v53, %v5361_v35 }
 0x4e0   : > { %v1097_v17 = vpop.f32.mrb[21].mxu1  ;;  %v5582_v20 = vadd.f32 %v1421_v4, %v5364_v40  ;;  %v1440_v59 = vsel %vm829_vm5, %v5575_v26, -inf }
 0x4e1   : > { %v5567_v21 = vpop.f32.mrb[22].mxu1  ;;  %v1434_v23 = vsel %vm829_vm5, %v5565_v11, -inf  ;;  %v5572_v25 = vadd.f32 %v1419_v5, %v5370_v45 }
 0x4e2   : > { %v5577_v27 = vpop.f32.mrb[23].mxu1  ;;  %1435 = vmax.xlane.f32.xlu0 %v1434_v23  ;;  %v1443_v53 = vsel %vm829_vm5, %v5582_v20, -inf }
 0x4e3   : > { %v4034_v18 = vpop.f32.mrb[28].mxu0  ;;  %v1437_v19 = vsel %vm829_vm5, %v5572_v25, -inf }
 0x4e4   : > { %1438 = vmax.xlane.f32.xlu1 %v1437_v19  ;;  %v1403_v36 = vpop.f32.mrb[29].mxu0  ;;  %v1424_v58 = vmul.f32 %v4034_v18, %v5377_v50 }
 0x4e5   : > { %v1422_v57 = vmul.f32 %v1403_v36, %v5368_v44  ;;  %v4035_v12 = vpop.f32.mrb[30].mxu0 }
 0x4e6   : > { %1441 = vmax.xlane.f32.xlu0 %v1440_v59  ;;  %v1406_v8 = vpop.f32.mrb[31].mxu0  ;;  %v1425_v10 = vmul.f32 %v4035_v12, %v5374_v48  ;;  %v5601_v5 = vadd.f32 %v1424_v58, %v5397_v6  ;;  %v1114_v58 = vmul.f32 %v3998_v15, %v5346_v29  ;;  %v1112_v12 = vmul.f32 %v1081_v43, %v5348_v30 }
 0x4e7   : > { %v1423_v16 = vmul.f32 %v1406_v8, %v5382_v56  ;;  %v5593_v22 = vadd.f32 %v1422_v57, %v5388_v60  ;;  %v1113_v57 = vmul.f32 %v1084_v47, %v5352_v32  ;;  %v1118_v30 = vmul.f32 %v4002_v7, %v5377_v50 }
 0x4e8   : > { %1444 = vmax.xlane.f32.xlu1 %v1443_v53  ;;  %v5606_v18 = vadd.f32 %v1425_v10, %v5394_v3  ;;  %v1452_v19 = vsel %vm829_vm5, %v5601_v5, -inf  ;;  %v5620_v59 = vadd.f32 %v1114_v58, %v5357_v34  ;;  %v1115_v10 = vmul.f32 %v3999_v54, %v5350_v31 }
 0x4e9   : > { %v1446_v2 = vsel %vm829_vm5, %v5593_v22, -inf  ;;  %v5598_v4 = vadd.f32 %v1423_v16, %v5403_v9  ;;  %v5623_v8 = vadd.f32 %v1113_v57, %v5370_v45  ;;  %v5629_v53 = vadd.f32 %v1112_v12, %v5361_v35 }
 0x4ea   : > { %1447 = vmax.xlane.f32.xlu0 %v1446_v2  ;;  %v1455_v36 = vsel %vm829_vm5, %v5606_v18, -inf  ;;  %v1134_v16 = vsel %vm829_vm5, %v5620_v59, -inf  ;;  %v5637_v15 = vadd.f32 %v1115_v10, %v5364_v40  ;;  %v1116_v31 = vmul.f32 %v1097_v17, %v5368_v44 }
 0x4eb   : > { %v1449_v23 = vsel %vm829_vm5, %v5598_v4, -inf  ;;  %v1131_v29 = vsel %vm829_vm5, %v5623_v8, -inf  ;;  %v1128_v32 = vsel %vm829_vm5, %v5629_v53, -inf  ;;  %v5643_v54 = vadd.f32 %v1118_v30, %v5397_v6 }
 0x4ec   : > { %1450 = vmax.xlane.f32.xlu1 %v1449_v23  ;;  %v1137_v43 = vsel %vm829_vm5, %v5637_v15, -inf  ;;  %v5648_v50 = vadd.f32 %v1116_v31, %v5388_v60 }
 0x4ed   : > { %v1146_v47 = vsel %vm829_vm5, %v5643_v54, -inf }
 0x4ee   : > { %1453 = vmax.xlane.f32.xlu0 %v1452_v19  ;;  %v1140_v7 = vsel %vm829_vm5, %v5648_v50, -inf }
 0x4f0   : > { %1456 = vmax.xlane.f32.xlu1 %v1455_v36 }
 0x501   : > { %1226 = vrot.lane.b32.xlu1 %v5432_v55, %s5020_s19 }
 0x504   : > { %1224 = vrot.lane.b32.xlu0 %v5436_v24, %s5020_s19 }
 0x523   : > { %1135 = vmax.xlane.f32.xlu0 %v1134_v16 }
 0x525   : > { %1132 = vmax.xlane.f32.xlu1 %v1131_v29 }
 0x527   : > { %1129 = vmax.xlane.f32.xlu0 %v1128_v32 }
 0x52b   : > { %1138 = vmax.xlane.f32.xlu0 %v1137_v43 }
 0x52f   : > { %1147 = vmax.xlane.f32.xlu0 %v1146_v47 }
 0x533   : > { %1141 = vmax.xlane.f32.xlu0 %v1140_v7 }
 0x549   : > { %1228 = vrot.lane.b32.xlu0 %v5454_v33, %s5020_s19 }
 0x56f   : > { %v1436_v44 = vpop.xlane.xlu0 %1435 }
 0x570   : > { %v1458_v17 = vsub.f32 %v5565_v11, %v1436_v44 }
 0x571   : > { %v1439_v2 = vpop.xlane.xlu1 %1438 }
 0x572   : > { %v1466_v23 = vmul.f32 1.442695, %v1458_v17  ;;  %v1459_v19 = vsub.f32 %v5572_v25, %v1439_v2 }
 0x573   : > { %v1442_v36 = vpop.xlane.xlu0 %1441 }
 0x574   : > { %4578 = vpow2.f32 %v1466_v23  ;;  %v1468_v58 = vmul.f32 1.442695, %v1459_v19  ;;  %v1460_v57 = vsub.f32 %v5575_v26, %v1442_v36  ;;  %v1119_v19 = vmul.f32 %v5567_v21, %v5374_v48 }
 0x575   : > { %v1445_v12 = vpop.xlane.xlu1 %1444  ;;  %v1117_v36 = vmul.f32 %v5577_v27, %v5382_v56 }
 0x576   : > { %4580 = vpow2.f32 %v1468_v58  ;;  %v1470_v10 = vmul.f32 1.442695, %v1460_v57  ;;  %v1461_v16 = vsub.f32 %v5582_v20, %v1445_v12  ;;  %v5689_v57 = vadd.f32 %v1119_v19, %v5394_v3 }
 0x577   : > { %v5658_v29 = vpop.xlane.xlu0 %1447 }
 0x578   : > { %4582 = vpow2.f32 %v1470_v10  ;;  %v1472_v30 = vmul.f32 1.442695, %v1461_v16 }
 0x579   : > { %v5660_v32 = vpop.xlane.xlu1 %1450 }
 0x57a   : > { %4584 = vpow2.f32 %v1472_v30  ;;  %v1149_v30 = vsel %vm829_vm5, %v5689_v57, -inf }
 0x57b   : > { %v5662_v11 = vpop.xlane.xlu0 %1453 }
 0x57d   : > { %v5664_v25 = vpop.xlane.xlu1 %1456 }
 0x57e   : > { %v5666_v31 = vpop.eup %4578 }
 0x57f   : > { %v1225_v43 = vpop.permute.xlu0 %1224  ;;  %v1482_v26 = vsel %vm829_vm5, %v5666_v31, 0.0 }
 0x580   : > { %v5670_v47 = vpop.eup %4580  ;;  %4004 = vmatprep.subr.bf16.mxu1 %v1225_v43  ;;  %1483 = vadd.xlane.f32.xlu1 %v1482_v26 }
 0x581   : > { %4005 = vmatpush3.bf16.msra.mxu1 %v1225_v43  ;;  %v1227_v20 = vpop.permute.xlu1 %1226  ;;  %v1485_v7 = vsel %vm829_vm5, %v5670_v47, 0.0  ;;  %v5695_v43 = vadd.f32 %v1117_v36, %v5403_v9 }
 0x582   : > { %v5674_v44 = vpop.eup %4582  ;;  %1486 = vadd.xlane.f32.xlu0 %v1485_v7  ;;  %4006 = vmatprep.subr.bf16.mxu1 %v1227_v20 }
 0x583   : > { %v1488_v17 = vsel %vm829_vm5, %v5674_v44, 0.0  ;;  %v1143_v27 = vsel %vm829_vm5, %v5695_v43, -inf }
 0x584   : > { %v5678_v2 = vpop.eup %4584 }
 0x585   : > { %4007 = vmatpush3.bf16.msra.mxu1 %v1227_v20  ;;  %v1491_v23 = vsel %vm829_vm5, %v5678_v2, 0.0 }
 0x586   : > { %1489 = vadd.xlane.f32.xlu0 %v1488_v17 }
 0x58a   : > { %1492 = vadd.xlane.f32.xlu0 %v1491_v23 }
 0x591   : > { %1230 = vrot.lane.b32.xlu1 %v5451_v28, %s5020_s19 }
 0x5b0   : > { %v1136_v58 = vpop.xlane.xlu0 %1135 }
 0x5b1   : > { %v1154_v12 = vsub.f32 %v5620_v59, %v1136_v58 }
 0x5b2   : > { %v1133_v36 = vpop.xlane.xlu1 %1132 }
 0x5b3   : > { %v1164_v10 = vmul.f32 1.442695, %v1154_v12  ;;  %v1153_v58 = vsub.f32 %v5623_v8, %v1133_v36 }
 0x5b4   : > { %v1130_v16 = vpop.xlane.xlu0 %1129 }
 0x5b5   : > { %4586 = vpow2.f32 %v1164_v10  ;;  %v1152_v48 = vsub.f32 %v5629_v53, %v1130_v16  ;;  %1150 = vmax.xlane.f32.xlu1 %v1149_v30  ;;  %v1162_v16 = vmul.f32 1.442695, %v1153_v58 }
 0x5b7   : > { %v1160_v21 = vmul.f32 1.442695, %v1152_v48 }
 0x5b8   : > { %v1139_v56 = vpop.xlane.xlu0 %1138 }
 0x5b9   : > { %4588 = vpow2.f32 %v1160_v21  ;;  %1144 = vmax.xlane.f32.xlu1 %v1143_v27  ;;  %v1155_v19 = vsub.f32 %v5637_v15, %v1139_v56  ;;  %v1462_v21 = vsub.f32 %v5593_v22, %v5658_v29  ;;  %v1464_v15 = vsub.f32 %v5601_v5, %v5662_v11 }
 0x5ba   : > { %v1465_v56 = vsub.f32 %v5606_v18, %v5664_v25 }
 0x5bb   : > { %v1166_v12 = vmul.f32 1.442695, %v1155_v19 }
 0x5bc   : > { %v1148_v59 = vpop.xlane.xlu0 %1147  ;;  %v1480_v22 = vmul.f32 1.442695, %v1465_v56 }
 0x5bd   : > { %v1158_v10 = vsub.f32 %v5643_v54, %v1148_v59  ;;  %4590 = vpow2.f32 %v1166_v12  ;;  %v1478_v54 = vmul.f32 1.442695, %v1464_v15 }
 0x5be   : > { %4592 = vpow2.f32 %v1162_v16 }
 0x5bf   : > { %v5700_v26 = vpop.eup %4586  ;;  %v1172_v48 = vmul.f32 1.442695, %v1158_v10 }
 0x5c0   : > { %v1142_v20 = vpop.xlane.xlu0 %1141  ;;  %v1182_v7 = vsel %vm829_vm5, %v5700_v26, 0.0 }
 0x5c1   : > { %1183 = vadd.xlane.f32.xlu0 %v1182_v7  ;;  %v1156_v30 = vsub.f32 %v5648_v50, %v1142_v20  ;;  %4594 = vpow2.f32 %v1172_v48  ;;  %v1474_v7 = vmul.f32 1.442695, %v1462_v21 }
 0x5c3   : > { %v5704_v17 = vpop.eup %4588  ;;  %v1168_v27 = vmul.f32 1.442695, %v1156_v30 }
 0x5c4   : > { %v1229_v23 = vpop.permute.xlu0 %1228  ;;  %v1176_v53 = vsel %vm829_vm5, %v5704_v17, 0.0 }
 0x5c5   : > { %1177 = vadd.xlane.f32.xlu0 %v1176_v53  ;;  %4008 = vmatprep.subr.bf16.mxu1 %v1229_v23  ;;  %4596 = vpow2.f32 %v1168_v27 }
 0x5c6   : > { %4009 = vmatpush3.bf16.msra.mxu1 %v1229_v23  ;;  %4598 = vpow2.f32 %v1474_v7 }
 0x5c7   : > { %v5722_v8 = vpop.eup %4590  ;;  %4600 = vpow2.f32 %v1478_v54 }
 0x5c8   : > { %v1185_v50 = vsel %vm829_vm5, %v5722_v8, 0.0  ;;  %v5728_v59 = vpop.eup %4592  ;;  %4602 = vpow2.f32 %v1480_v22 }
 0x5c9   : > { %v1179_v5 = vsel %vm829_vm5, %v5728_v59, 0.0 }
 0x5ca   : > { %1528 = vrot.lane.b32.xlu1 %v5432_v55, %s5021_s20 }
 0x5cb   : > { %v5730_v29 = vpop.eup %4594 }
 0x5cc   : > { %v1194_v25 = vsel %vm829_vm5, %v5730_v29, 0.0 }
 0x5ce   : > { %1530 = vrot.lane.b32.xlu1 %v5454_v33, %s5021_s20 }
 0x5cf   : > { %v5734_v11 = vpop.eup %4596 }
 0x5d0   : > { %v1188_v18 = vsel %vm829_vm5, %v5734_v11, 0.0  ;;  %v5740_v20 = vpop.eup %4598 }
 0x5d1   : > { %v1494_v23 = vsel %vm829_vm5, %v5740_v20, 0.0  ;;  %v5744_v53 = vpop.eup %4600 }
 0x5d2   : > { %v1500_v19 = vsel %vm829_vm5, %v5744_v53, 0.0  ;;  %v5748_v36 = vpop.eup %4602 }
 0x5d3   : > { %v1503_v58 = vsel %vm829_vm5, %v5748_v36, 0.0 }
 0x5db   : > { %1526 = vrot.lane.b32.xlu0 %v5436_v24, %s5021_s20 }
 0x5f2   : > { %1186 = vadd.xlane.f32.xlu1 %v1185_v50 }
 0x5f6   : > { %1180 = vadd.xlane.f32.xlu1 %v1179_v5 }
 0x5fa   : > { %1189 = vadd.xlane.f32.xlu0 %v1188_v18  ;;  %1195 = vadd.xlane.f32.xlu1 %v1194_v25 }
 0x5fe   : > { %1495 = vadd.xlane.f32.xlu0 %v1494_v23 }
 0x602   : > { %1501 = vadd.xlane.f32.xlu0 %v1500_v19  ;;  %v1463_v19 = vsub.f32 %v5598_v4, %v5660_v32 }
 0x606   : > { %1504 = vadd.xlane.f32.xlu0 %v1503_v58  ;;  %v1476_v58 = vmul.f32 1.442695, %v1463_v19 }
 0x60d   : > { %v5752_v12 = vpop.xlane.xlu1 %1483 }
 0x60f   : > { %v5760_v16 = vpop.xlane.xlu0 %1486 }
 0x611   : > { %v1231_v10 = vpop.permute.xlu1 %1230 }
 0x612   : > { %4010 = vmatprep.subr.bf16.mxu1 %v1231_v10 }
 0x613   : > { %4011 = vmatpush3.bf16.msra.mxu1 %v1231_v10  ;;  %v5763_v21 = vpop.xlane.xlu0 %1489 }
 0x617   : > { %v5766_v56 = vpop.xlane.xlu0 %1492 }
 0x61c   : > { %1623 = vrot.lane.b32.xlu0 %v5303_v38, %s5022_s26 }
 0x620   : > { %1615 = vrot.lane.b32.xlu0 %v5305_v39, %s5022_s26 }
 0x624   : > { %1619 = vrot.lane.b32.xlu0 %v5323_v1, %s5022_s26 }
 0x642   : > { %v1151_v30 = vpop.xlane.xlu1 %1150 }
 0x643   : > { %v1159_v48 = vsub.f32 %v5689_v57, %v1151_v30 }
 0x645   : > { %v1174_v27 = vmul.f32 1.442695, %v1159_v48 }
 0x646   : > { %v1145_v7 = vpop.xlane.xlu1 %1144 }
 0x647   : > { %4604 = vpow2.f32 %v1174_v27  ;;  %v1157_v15 = vsub.f32 %v5695_v43, %v1145_v7 }
 0x649   : > { %v1170_v54 = vmul.f32 1.442695, %v1157_v15 }
 0x64a   : > { %v1529_v43 = vpop.permute.xlu1 %1528 }
 0x64b   : > { %4606 = vpow2.f32 %v1170_v54 }
 0x64c   : > { %4608 = vpow2.f32 %v1476_v58 }
 0x64e   : > { %v1184_v50 = vpop.xlane.xlu0 %1183  ;;  %v1531_v10 = vpop.permute.xlu1 %1530 }
 0x651   : > { %v5768_v22 = vpop.eup %4604 }
 0x652   : > { %v1178_v5 = vpop.xlane.xlu0 %1177  ;;  %v1197_v18 = vsel %vm829_vm5, %v5768_v22, 0.0 }
 0x653   : > { %1198 = vadd.xlane.f32.xlu1 %v1197_v18 }
 0x655   : > { %v5772_v57 = vpop.eup %4606 }
 0x656   : > { %v1527_v25 = vpop.permute.xlu0 %1526  ;;  %v1191_v23 = vsel %vm829_vm5, %v5772_v57, 0.0  ;;  %v5780_v27 = vpop.eup %4608 }
 0x657   : > { %4036 = vmatprep.subr.bf16.mxu1 %v1527_v25  ;;  %1192 = vadd.xlane.f32.xlu1 %v1191_v23  ;;  %v1497_v15 = vsel %vm829_vm5, %v5780_v27, 0.0 }
 0x668   : > { %1532 = vrot.lane.b32.xlu1 %v5451_v28, %s5021_s20 }
 0x67f   : > { %v1187_v30 = vpop.xlane.xlu1 %1186 }
 0x680   : > { %4610 = vrcp.f32 %v1187_v30 }
 0x681   : > { %4612 = vrcp.f32 %v1178_v5 }
 0x682   : > { %4614 = vrcp.f32 %v1184_v50 }
 0x683   : > { %v1181_v48 = vpop.xlane.xlu1 %1180 }
 0x684   : > { %4616 = vrcp.f32 %v1181_v48 }
 0x685   : > { %4618 = vrcp.f32 %v5752_v12 }
 0x686   : > { %4620 = vrcp.f32 %v5760_v16 }
 0x68a   : > { %v4611_v7 = vpop.eup %4610 }
 0x68b   : > { %v4613_v54 = vpop.eup %4612  ;;  %v1211_v4 = vmul.f32 %v4611_v7, %v5722_v8  ;;  %v1196_v8 = vpop.xlane.xlu1 %1195 }
 0x68c   : > { %1498 = vadd.xlane.f32.xlu1 %v1497_v15  ;;  %v4615_v18 = vpop.eup %4614  ;;  %v1208_v32 = vmul.f32 %v4613_v54, %v5704_v17 }
 0x68d   : > { %v1210_v50 = vmul.f32 %v4615_v18, %v5700_v26  ;;  %v1190_v26 = vpop.xlane.xlu0 %1189 }
 0x68e   : > { %v4617_v23 = vpop.eup %4616 }
 0x68f   : > { %v1209_v19 = vmul.f32 %v4617_v23, %v5728_v59  ;;  %v1217_v58 = vpack.c.bf16 %v1211_v4, %v1210_v50  ;;  %v4619_v48 = vpop.eup %4618 }
 0x690   : > { %v4621_v15 = vpop.eup %4620 }
 0x691   : > { %v1216_v5 = vpack.c.bf16 %v1209_v19, %v1208_v32  ;;  %v1496_v17 = vpop.xlane.xlu0 %1495  ;;  %v1515_v19 = vmul.f32 %v4621_v15, %v5670_v47 }
 0x693   : > { %4012 = vmatprep.mubr.msk.bf16.mxu1 %vm829_vm5, %v1216_v5  ;;  %v1514_v5 = vmul.f32 %v4619_v48, %v5666_v31 }
 0x694   : > { %4013 = vmatmul.mubr.msk.bf16.vlgmr.msra.gmra.mrb[24].mxu1 %vm829_vm5, %v1217_v58 }
 0x695   : > { %4037 = vmatpush3.bf16.msra.mxu1 %v1527_v25  ;;  %v1502_v59 = vpop.xlane.xlu0 %1501 }
 0x696   : > { %4038 = vmatprep.subr.bf16.mxu1 %v1529_v43 }
 0x699   : > { %4039 = vmatpush3.bf16.msra.mxu1 %v1529_v43  ;;  %v1505_v43 = vpop.xlane.xlu0 %1504 }
 0x69a   : > { %4040 = vmatprep.subr.bf16.mxu1 %v1531_v10 }
 0x69d   : > { %4041 = vmatpush3.bf16.msra.mxu1 %v1531_v10  ;;  %1625 = vrot.lane.b32.xlu1 %v5313_v51, %s5022_s26  ;;  %v1624_v7 = vpop.permute.xlu0 %1623 }
 0x6a1   : > { %1627 = vrot.lane.b32.xlu1 %v5321_v0, %s5022_s26 }
 0x6a5   : > { %1629 = vrot.lane.b32.xlu1 %v5329_v13, %s5022_s26 }
 0x6a9   : > { %1617 = vrot.lane.b32.xlu1 %v5315_v52, %s5022_s26 }
 0x6ad   : > { %1621 = vrot.lane.b32.xlu1 %v5331_v14, %s5022_s26 }
 0x6e0   : > { %v1199_v25 = vpop.xlane.xlu1 %1198 }
 0x6e1   : > { %4622 = vrcp.f32 %v1199_v25 }
 0x6e2   : > { %4624 = vrcp.f32 %v1190_v26 }
 0x6e3   : > { %4626 = vrcp.f32 %v1196_v8 }
 0x6e4   : > { %v1193_v10 = vpop.xlane.xlu1 %1192 }
 0x6e5   : > { %4628 = vrcp.f32 %v1193_v10 }
 0x6e6   : > { %4630 = vrcp.f32 %v5766_v56 }
 0x6e7   : > { %4632 = vrcp.f32 %v5763_v21  ;;  %v1522_v21 = vpack.c.bf16 %v1515_v19, %v1514_v5 }
 0x6e8   : > { %v1533_v30 = vpop.permute.xlu1 %1532  ;;  %4634 = vrcp.f32 %v1505_v43 }
 0x6e9   : > { %4042 = vmatprep.subr.bf16.mxu1 %v1533_v30  ;;  %4636 = vrcp.f32 %v1496_v17 }
 0x6ea   : > { %4043 = vmatpush3.bf16.msra.mxu1 %v1533_v30  ;;  %4638 = vrcp.f32 %v1502_v59 }
 0x6eb   : > { %4248 = vmatprep.subr.msk.bf16.mxu1 %vm723_vm0, %v1624_v7  ;;  %v4623_v12 = vpop.eup %4622 }
 0x6ec   : > { %v4625_v16 = vpop.eup %4624  ;;  %v1215_v23 = vmul.f32 %v4623_v12, %v5768_v22 }
 0x6ed   : > { %v4627_v54 = vpop.eup %4626  ;;  %v1212_v4 = vmul.f32 %v4625_v16, %v5734_v11 }
 0x6ee   : > { %v1214_v56 = vmul.f32 %v4627_v54, %v5730_v29  ;;  %v1644_v29 = vsel %vm723_vm0, %v1624_v7, 0 }
 0x6ef   : > { %v4629_v18 = vpop.eup %4628 }
 0x6f0   : > { %v1213_v32 = vmul.f32 %v4629_v18, %v5772_v57  ;;  %v1219_v58 = vpack.c.bf16 %v1215_v23, %v1214_v56  ;;  %v4631_v26 = vpop.eup %4630  ;;  %v1616_v18 = vpop.permute.xlu0 %1615 }
 0x6f1   : > { %v4633_v8 = vpop.eup %4632  ;;  %v1517_v11 = vmul.f32 %v4631_v26, %v5678_v2 }
 0x6f2   : > { %v1218_v50 = vpack.c.bf16 %v1213_v32, %v1212_v4  ;;  %v1516_v22 = vmul.f32 %v4633_v8, %v5674_v44  ;;  %v4635_v2 = vpop.eup %4634 }
 0x6f3   : > { %v4637_v44 = vpop.eup %4636  ;;  %v1521_v7 = vmul.f32 %v4635_v2, %v5748_v36 }
 0x6f4   : > { %4016 = vmatprep.mubr.msk.bf16.mxu1 %vm829_vm5, %v1218_v50  ;;  %v1523_v47 = vpack.c.bf16 %v1517_v11, %v1516_v22  ;;  %v4639_v30 = vpop.eup %4638  ;;  %v1518_v17 = vmul.f32 %v4637_v44, %v5740_v20 }
 0x6f5   : > { %4017 = vmatmul.mubr.msk.bf16.gmra.mrb[28].mxu1 %vm829_vm5, %v1219_v58  ;;  %v1520_v15 = vmul.f32 %v4639_v30, %v5744_v53 }
 0x6f6   : > { %4044 = vmatprep.mubr.msk.bf16.mxu1 %vm829_vm5, %v1522_v21 }
 0x6f7   : > { %v1525_v54 = vpack.c.bf16 %v1521_v7, %v1520_v15  ;;  %v5899_v7 = vld [vmem:[#allocation8 + $0x30] sm:$0xff] }
 0x6fd   : > { %4045 = vmatmul.mubr.msk.bf16.vlgmr.msra.gmra.mrb[32].mxu1 %vm829_vm5, %v1523_v47 }
 0x6fe   : > { %4053 = vmatpush3.bf16.xpose.msra.mxu1 %v1644_v29 }
 0x719   : > { %v1499_v31 = vpop.xlane.xlu1 %1498 }
 0x71a   : > { %4640 = vrcp.f32 %v1499_v31 }
 0x71d   : > { %v1626_v57 = vpop.permute.xlu1 %1625 }
 0x71e   : > { %4249 = vmatprep.subr.msk.bf16.mxu1 %vm723_vm0, %v1626_v57  ;;  %v1647_v25 = vsel %vm723_vm0, %v1626_v57, 0 }
 0x71f   : > { %4055 = vmatpush3.bf16.xpose.msra.mxu1 %v1647_v25 }
 0x721   : > { %v1628_v10 = vpop.permute.xlu1 %1627 }
 0x722   : > { %4250 = vmatprep.subr.msk.bf16.mxu1 %vm723_vm0, %v1628_v10  ;;  %v1650_v43 = vsel %vm723_vm0, %v1628_v10, 0 }
 0x724   : > { %v4641_v48 = vpop.eup %4640 }
 0x725   : > { %v1519_v59 = vmul.f32 %v4641_v48, %v5780_v27  ;;  %v1630_v12 = vpop.permute.xlu1 %1629  ;;  %v1620_v27 = vpop.permute.xlu0 %1619 }
 0x726   : > { %v1653_v20 = vsel %vm723_vm0, %v1630_v12, 0 }
 0x727   : > { %4057 = vmatpush3.bf16.xpose.msra.mxu1 %v1650_v43  ;;  %v1524_v16 = vpack.c.bf16 %v1519_v59, %v1518_v17  ;;  %v5882_v59 = vld [vmem:[#allocation8 + $0x10] sm:$0xff] }
 0x728   : > { %4251 = vmatprep.subr.msk.bf16.mxu1 %vm723_vm0, %v1630_v12  ;;  %v5885_v12 = vld [vmem:[#allocation8] sm:$0xff] }
 0x729   : > { %4048 = vmatprep.mubr.msk.bf16.mxu1 %vm829_vm5, %v1524_v16  ;;  %v1618_v36 = vpop.permute.xlu1 %1617 }
 0x72a   : > { %4049 = vmatmul.mubr.msk.bf16.gmra.mrb[36].mxu1 %vm829_vm5, %v1525_v54 }
 0x72b   : > { %4060 = vmatprep.mubr.msk.bf16.mxu1 %vm723_vm0, %v1616_v18 }
 0x72d   : > { %v1622_v53 = vpop.permute.xlu1 %1621 }
 0x72f   : > { %4059 = vmatpush3.bf16.xpose.msra.mxu1 %v1653_v20 }
 0x736   : > { %4061 = vmatmul.mubr.msk.bf16.vlgmr.msra.gmra.mrb[40].mxu1 %vm723_vm0, %v1618_v36  ;;  %v5889_v36 = vld [vmem:[#allocation8 + $0x8] sm:$0xff] }
 0x737   : > { %4064 = vmatprep.mubr.msk.bf16.mxu1 %vm723_vm0, %v1620_v27 }
 0x73e   : > { %4065 = vmatmul.mubr.msk.bf16.gmra.mrb[44].mxu1 %vm723_vm0, %v1622_v53  ;;  %v5892_v53 = vld [vmem:[#allocation8 + $0x18] sm:$0xff] }
 0x767   : > { %v5834_v23 = vpop.f32.mrb[24].mxu1 }
 0x768   : > { %6799 = vst [vmem:[#allocation24_spill] sm:$0xff] %v5834_v23  ;;  %v5836_v4 = vpop.f32.mrb[25].mxu1 }
 0x769   : > { %v5838_v32 = vpop.f32.mrb[26].mxu1 }
 0x76a   : > { %6800 = vst [vmem:[#allocation25_spill] sm:$0xff] %v5838_v32  ;;  %v5842_v56 = vpop.f32.mrb[27].mxu1 }
 0x7c8   : > { %v5846_v5 = vpop.f32.mrb[28].mxu1 }
 0x7c9   : > { %6801 = vst [vmem:[#allocation26_spill] sm:$0xff] %v5846_v5  ;;  %v5848_v58 = vpop.f32.mrb[29].mxu1 }
 0x7ca   : > { %v5850_v26 = vpop.f32.mrb[30].mxu1 }
 0x7cb   : > { %6802 = vst [vmem:[#allocation27_spill] sm:$0xff] %v5850_v26  ;;  %v5854_v8 = vpop.f32.mrb[31].mxu1 }
 0x7d0   : > { %v5858_v22 = vpop.f32.mrb[32].mxu1 }
 0x7d1   : > { %6803 = vst [vmem:[#allocation28_spill] sm:$0xff] %v5858_v22  ;;  %v5860_v47 = vpop.f32.mrb[33].mxu1 }
 0x7d2   : > { %v5862_v29 = vpop.f32.mrb[34].mxu1 }
 0x7d3   : > { %6804 = vst [vmem:[#allocation29_spill] sm:$0xff] %v5862_v29  ;;  %v5866_v57 = vpop.f32.mrb[35].mxu1 }
 0x7fd   : > { %v5870_v2 = vpop.f32.mrb[36].mxu1 }
 0x7fe   : > { %6805 = vst [vmem:[#allocation30_spill] sm:$0xff] %v5870_v2  ;;  %v5872_v10 = vpop.f32.mrb[37].mxu1 }
 0x7ff   : > { %6806 = vst [vmem:[#allocation31_spill] sm:$0xff] %v5872_v10  ;;  %v5874_v44 = vpop.f32.mrb[38].mxu1 }
 0x800   : > { %6807 = vst [vmem:[#allocation32_spill] sm:$0xff] %v5874_v44  ;;  %v5878_v48 = vpop.f32.mrb[39].mxu1 }
 0x809   : > { %v4062_v17 = vpop.f32.mrb[40].mxu1 }
 0x80a   : > { %v1722_v43 = vmul.f32 %v5882_v59, %v4062_v17  ;;  %v1689_v15 = vpop.f32.mrb[41].mxu1 }
 0x80b   : > { %v1720_v16 = vmul.f32 %v5885_v12, %v1689_v15  ;;  %v4063_v54 = vpop.f32.mrb[42].mxu1 }
 0x80c   : > { %v1692_v18 = vpop.f32.mrb[43].mxu1  ;;  %v1730_v20 = vadd.f32 %v1722_v43, %v5357_v34  ;;  %v1723_v30 = vmul.f32 %v5892_v53, %v4063_v54 }
 0x80d   : > { %v1721_v27 = vmul.f32 %v5889_v36, %v1692_v18  ;;  %v1728_v17 = vadd.f32 %v1720_v16, %v5361_v35  ;;  %v5904_v16 = vld [vmem:[#allocation8 + $0x20] sm:$0xff] }
 0x80e   : > { %v1742_v21 = vsel %vm829_vm5, %v1730_v20, -inf  ;;  %v1731_v54 = vadd.f32 %v1723_v30, %v5364_v40 }
 0x80f   : > { %1743 = vmax.xlane.f32.xlu0 %v1742_v21  ;;  %v1729_v31 = vadd.f32 %v1721_v27, %v5370_v45  ;;  %v1736_v11 = vsel %vm829_vm5, %v1728_v17, -inf }
 0x810   : > { %v1745_v27 = vsel %vm829_vm5, %v1731_v54, -inf }
 0x811   : > { %v4066_v15 = vpop.f32.mrb[44].mxu1  ;;  %v1739_v19 = vsel %vm829_vm5, %v1729_v31, -inf }
 0x812   : > { %v1726_v43 = vmul.f32 %v5899_v7, %v4066_v15  ;;  %1740 = vmax.xlane.f32.xlu1 %v1739_v19  ;;  %v1705_v18 = vpop.f32.mrb[45].mxu1 }
 0x813   : > { %1737 = vmax.xlane.f32.xlu0 %v1736_v11  ;;  %v4067_v25 = vpop.f32.mrb[46].mxu1  ;;  %v1724_v21 = vmul.f32 %v5904_v16, %v1705_v18  ;;  %v5918_v11 = vld [vmem:[#allocation8 + $0x38] sm:$0xff] }
 0x814   : > { %v1708_v50 = vpop.f32.mrb[47].mxu1  ;;  %v1734_v49 = vadd.f32 %v1726_v43, %v5397_v6  ;;  %v1727_v30 = vmul.f32 %v5918_v11, %v4067_v25  ;;  %v5921_v43 = vld [vmem:[#allocation8 + $0x28] sm:$0xff] }
 0x815   : > { %v1732_v19 = vadd.f32 %v1724_v21, %v5388_v60  ;;  %v1725_v18 = vmul.f32 %v5921_v43, %v1708_v50 }
 0x816   : > { %v1754_v15 = vsel %vm829_vm5, %v1734_v49, -inf  ;;  %v5925_v21 = vadd.f32 %v1727_v30, %v5394_v3 }
 0x817   : > { %1746 = vmax.xlane.f32.xlu0 %v1745_v27  ;;  %v1748_v61 = vsel %vm829_vm5, %v1732_v19, -inf  ;;  %v5930_v27 = vadd.f32 %v1725_v18, %v5403_v9 }
 0x81b   : > { %1755 = vmax.xlane.f32.xlu0 %v1754_v15  ;;  %v1751_v15 = vsel %vm829_vm5, %v5930_v27, -inf }
 0x81f   : > { %1749 = vmax.xlane.f32.xlu0 %v1748_v61  ;;  %v1757_v61 = vsel %vm829_vm5, %v5925_v21, -inf }
 0x823   : > { %1830 = vrot.lane.b32.xlu1 %v5432_v55, %s5022_s26 }
 0x827   : > { %1832 = vrot.lane.b32.xlu1 %v5454_v33, %s5022_s26 }
 0x835   : > { %1828 = vrot.lane.b32.xlu0 %v5436_v24, %s5022_s26 }
 0x84b   : > { %1758 = vmax.xlane.f32.xlu1 %v1757_v61 }
 0x84f   : > { %1752 = vmax.xlane.f32.xlu1 %v1751_v15 }
 0x860   : > { %1834 = vrot.lane.b32.xlu1 %v5451_v28, %s5022_s26 }
 0x89c   : > { %v1744_v25 = vpop.xlane.xlu0 %1743 }
 0x89d   : > { %v1762_v37 = vsub.f32 %v1730_v20, %v1744_v25 }
 0x89f   : > { %v1772_v50 = vmul.f32 1.442695, %v1762_v37  ;;  %v1741_v42 = vpop.xlane.xlu1 %1740 }
 0x8a0   : > { %v1738_v30 = vpop.xlane.xlu0 %1737  ;;  %v1761_v63 = vsub.f32 %v1729_v31, %v1741_v42 }
 0x8a1   : > { %4642 = vpow2.f32 %v1772_v50  ;;  %v1760_v62 = vsub.f32 %v1728_v17, %v1738_v30 }
 0x8a2   : > { %v1770_v61 = vmul.f32 1.442695, %v1761_v63 }
 0x8a3   : > { %v1768_v41 = vmul.f32 1.442695, %v1760_v62 }
 0x8a4   : > { %v1747_v46 = vpop.xlane.xlu0 %1746 }
 0x8a5   : > { %4644 = vpow2.f32 %v1768_v41  ;;  %v1763_v18 = vsub.f32 %v1731_v54, %v1747_v46  ;;  %v1831_v46 = vpop.permute.xlu1 %1830 }
 0x8a7   : > { %v1774_v2 = vmul.f32 1.442695, %v1763_v18 }
 0x8a8   : > { %v1756_v44 = vpop.xlane.xlu0 %1755 }
 0x8a9   : > { %4646 = vpow2.f32 %v1774_v2  ;;  %v1766_v15 = vsub.f32 %v1734_v49, %v1756_v44 }
 0x8aa   : > { %4648 = vpow2.f32 %v1770_v61 }
 0x8ab   : > { %v5936_v5 = vpop.eup %4642  ;;  %v1780_v26 = vmul.f32 1.442695, %v1766_v15 }
 0x8ac   : > { %v1750_v20 = vpop.xlane.xlu0 %1749  ;;  %v1790_v37 = vsel %vm829_vm5, %v5936_v5, 0.0 }
 0x8ad   : > { %4650 = vpow2.f32 %v1780_v26  ;;  %v1764_v17 = vsub.f32 %v1732_v19, %v1750_v20  ;;  %1791 = vadd.xlane.f32.xlu0 %v1790_v37  ;;  %v1833_v26 = vpop.permute.xlu1 %1832 }
 0x8af   : > { %v5940_v42 = vpop.eup %4644  ;;  %v1776_v41 = vmul.f32 1.442695, %v1764_v17 }
 0x8b0   : > { %v1829_v62 = vpop.permute.xlu0 %1828  ;;  %v1784_v63 = vsel %vm829_vm5, %v5940_v42, 0.0 }
 0x8b1   : > { %4652 = vpow2.f32 %v1776_v41  ;;  %1785 = vadd.xlane.f32.xlu0 %v1784_v63  ;;  %4068 = vmatprep.subr.bf16.mxu0 %v1829_v62 }
 0x8b2   : > { %4069 = vmatpush3.bf16.msra.mxu0 %v1829_v62 }
 0x8b3   : > { %v4647_v49 = vpop.eup %4646  ;;  %4070 = vmatprep.subr.bf16.mxu0 %v1831_v46 }
 0x8b4   : > { %v1793_v31 = vsel %vm829_vm5, %v4647_v49, 0.0  ;;  %v4649_v2 = vpop.eup %4648 }
 0x8b5   : > { %1794 = vadd.xlane.f32.xlu1 %v1793_v31  ;;  %v1787_v19 = vsel %vm829_vm5, %v4649_v2, 0.0 }
 0x8b6   : > { %4071 = vmatpush3.bf16.msra.mxu0 %v1831_v46 }
 0x8b7   : > { %v5945_v44 = vpop.eup %4650  ;;  %4072 = vmatprep.subr.bf16.mxu0 %v1833_v26 }
 0x8b8   : > { %v1802_v54 = vsel %vm829_vm5, %v5945_v44, 0.0 }
 0x8b9   : > { %1803 = vadd.xlane.f32.xlu0 %v1802_v54  ;;  %1788 = vadd.xlane.f32.xlu1 %v1787_v19 }
 0x8ba   : > { %4073 = vmatpush3.bf16.msra.mxu0 %v1833_v26 }
 0x8bb   : > { %v5950_v25 = vpop.eup %4652 }
 0x8bc   : > { %v1796_v50 = vsel %vm829_vm5, %v5950_v25, 0.0 }
 0x8bd   : > { %1797 = vadd.xlane.f32.xlu0 %v1796_v50 }
 0x8ca   : > { %1927 = vrot.lane.b32.xlu1 %v5313_v51, %s5023_s30 }
 0x8ce   : > { %1929 = vrot.lane.b32.xlu1 %v5321_v0, %s5023_s30 }
 0x8d8   : > { %v1759_v30 = vpop.xlane.xlu1 %1758 }
 0x8d9   : > { %v1767_v18 = vsub.f32 %v5925_v21, %v1759_v30 }
 0x8db   : > { %v1782_v61 = vmul.f32 1.442695, %v1767_v18 }
 0x8dc   : > { %v1753_v15 = vpop.xlane.xlu1 %1752 }
 0x8dd   : > { %4654 = vpow2.f32 %v1782_v61  ;;  %v1765_v20 = vsub.f32 %v5930_v27, %v1753_v15 }
 0x8df   : > { %v1778_v37 = vmul.f32 1.442695, %v1765_v20 }
 0x8e0   : > { %v1835_v17 = vpop.permute.xlu1 %1834 }
 0x8e1   : > { %4074 = vmatprep.subr.bf16.mxu0 %v1835_v17  ;;  %4656 = vpow2.f32 %v1778_v37 }
 0x8e2   : > { %4075 = vmatpush3.bf16.msra.mxu0 %v1835_v17 }
 0x8e7   : > { %v4655_v41 = vpop.eup %4654 }
 0x8e8   : > { %v1805_v46 = vsel %vm829_vm5, %v4655_v41, 0.0 }
 0x8e9   : > { %1806 = vadd.xlane.f32.xlu0 %v1805_v46 }
 0x8eb   : > { %v4657_v62 = vpop.eup %4656 }
 0x8ec   : > { %v1799_v63 = vsel %vm829_vm5, %v4657_v62, 0.0 }
 0x8f2   : > { %1800 = vadd.xlane.f32.xlu1 %v1799_v63 }
 0x8ff   : > { %1925 = vrot.lane.b32.xlu0 %v5303_v38, %s5023_s30 }
 0x903   : > { %1917 = vrot.lane.b32.xlu0 %v5305_v39, %s5023_s30  ;;  %1931 = vrot.lane.b32.xlu1 %v5329_v13, %s5023_s30 }
 0x907   : > { %1921 = vrot.lane.b32.xlu0 %v5323_v1, %s5023_s30  ;;  %1919 = vrot.lane.b32.xlu1 %v5315_v52, %s5023_s30 }
 0x90b   : > { %1923 = vrot.lane.b32.xlu1 %v5331_v14, %s5023_s30 }
 0x93a   : > { %v1792_v21 = vpop.xlane.xlu0 %1791 }
 0x93e   : > { %v1786_v31 = vpop.xlane.xlu0 %1785 }
 0x942   : > { %v1795_v27 = vpop.xlane.xlu1 %1794 }
 0x943   : > { %4658 = vrcp.f32 %v1795_v27 }
 0x944   : > { %4660 = vrcp.f32 %v1786_v31 }
 0x945   : > { %4662 = vrcp.f32 %v1792_v21 }
 0x946   : > { %v1789_v26 = vpop.xlane.xlu1 %1788  ;;  %v1804_v46 = vpop.xlane.xlu0 %1803 }
 0x947   : > { %4664 = vrcp.f32 %v1789_v26 }
 0x94a   : > { %v1798_v63 = vpop.xlane.xlu0 %1797  ;;  %v1928_v21 = vpop.permute.xlu1 %1927 }
 0x94d   : > { %v4659_v54 = vpop.eup %4658 }
 0x94e   : > { %v4661_v19 = vpop.eup %4660  ;;  %v1819_v18 = vmul.f32 %v4659_v54, %v4647_v49  ;;  %v1930_v26 = vpop.permute.xlu1 %1929 }
 0x94f   : > { %v4663_v50 = vpop.eup %4662  ;;  %v1816_v61 = vmul.f32 %v4661_v19, %v5940_v42  ;;  %v1949_v42 = vsel %vm723_vm0, %v1928_v21, 0 }
 0x950   : > { %v1818_v20 = vmul.f32 %v4663_v50, %v5936_v5 }
 0x951   : > { %v4665_v30 = vpop.eup %4664 }
 0x952   : > { %v1817_v15 = vmul.f32 %v4665_v30, %v4649_v2  ;;  %v1825_v17 = vpack.c.bf16 %v1819_v18, %v1818_v20  ;;  %v1952_v18 = vsel %vm723_vm0, %v1930_v26, 0 }
 0x954   : > { %v1824_v37 = vpack.c.bf16 %v1817_v15, %v1816_v61 }
 0x956   : > { %4076 = vmatprep.mubr.msk.bf16.mxu0 %vm829_vm5, %v1824_v37 }
 0x957   : > { %4077 = vmatmul.mubr.msk.bf16.vlgmr.msra.gmra.mrb[32].mxu0 %vm829_vm5, %v1825_v17 }
 0x976   : > { %v1807_v27 = vpop.xlane.xlu0 %1806 }
 0x977   : > { %4666 = vrcp.f32 %v1807_v27 }
 0x978   : > { %4668 = vrcp.f32 %v1798_v63 }
 0x979   : > { %4670 = vrcp.f32 %v1804_v46 }
 0x97a   : > { %v1926_v31 = vpop.permute.xlu0 %1925 }
 0x97b   : > { %4252 = vmatprep.subr.msk.bf16.mxu0 %vm723_vm0, %v1926_v31  ;;  %v1946_v49 = vsel %vm723_vm0, %v1926_v31, 0 }
 0x97c   : > { %4085 = vmatpush3.bf16.xpose.msra.mxu0 %v1946_v49 }
 0x97d   : > { %4253 = vmatprep.subr.msk.bf16.mxu0 %vm723_vm0, %v1928_v21 }
 0x97e   : > { %v1918_v63 = vpop.permute.xlu0 %1917 }
 0x97f   : > { %v1801_v5 = vpop.xlane.xlu1 %1800 }
 0x980   : > { %4672 = vrcp.f32 %v1801_v5 }
 0x981   : > { %v4667_v2 = vpop.eup %4666 }
 0x982   : > { %v4669_v54 = vpop.eup %4668  ;;  %v1823_v30 = vmul.f32 %v4667_v2, %v4655_v41 }
 0x983   : > { %v4671_v19 = vpop.eup %4670  ;;  %v1820_v61 = vmul.f32 %v4669_v54, %v5950_v25  ;;  %v1932_v20 = vpop.permute.xlu1 %1931 }
 0x984   : > { %4087 = vmatpush3.bf16.xpose.msra.mxu0 %v1949_v42  ;;  %v1822_v37 = vmul.f32 %v4671_v19, %v5945_v44  ;;  %v1955_v41 = vsel %vm723_vm0, %v1932_v20, 0 }
 0x985   : > { %4254 = vmatprep.subr.msk.bf16.mxu0 %vm723_vm0, %v1930_v26 }
 0x986   : > { %v1827_v46 = vpack.c.bf16 %v1823_v30, %v1822_v37 }
 0x987   : > { %v1920_v25 = vpop.permute.xlu1 %1919 }
 0x98a   : > { %v4673_v50 = vpop.eup %4672 }
 0x98b   : > { %v1821_v15 = vmul.f32 %v4673_v50, %v4657_v62  ;;  %v1922_v62 = vpop.permute.xlu0 %1921  ;;  %v1924_v44 = vpop.permute.xlu1 %1923 }
 0x98c   : > { %4089 = vmatpush3.bf16.xpose.msra.mxu0 %v1952_v18 }
 0x98d   : > { %4255 = vmatprep.subr.msk.bf16.mxu0 %vm723_vm0, %v1932_v20  ;;  %v1826_v17 = vpack.c.bf16 %v1821_v15, %v1820_v61 }
 0x98f   : > { %4080 = vmatprep.mubr.msk.bf16.mxu0 %vm829_vm5, %v1826_v17 }
 0x990   : > { %4081 = vmatmul.mubr.msk.bf16.gmra.mrb[36].mxu0 %vm829_vm5, %v1827_v46 }
 0x991   : > { %4092 = vmatprep.mubr.msk.bf16.mxu0 %vm723_vm0, %v1918_v63 }
 0x994   : > { %4091 = vmatpush3.bf16.xpose.msra.mxu0 %v1955_v41 }
 0x99b   : > { %4093 = vmatmul.mubr.msk.bf16.vlgmr.msra.gmra.mrb[40].mxu0 %vm723_vm0, %v1920_v25 }
 0x99c   : > { %4096 = vmatprep.mubr.msk.bf16.mxu0 %vm723_vm0, %v1922_v62 }
 0x9a3   : > { %4097 = vmatmul.mubr.msk.bf16.gmra.mrb[44].mxu0 %vm723_vm0, %v1924_v44 }
 0xa2a   : > { %v5994_v21 = vpop.f32.mrb[32].mxu0 }
 0xa2b   : > { %6808 = vst [vmem:[#allocation33_spill] sm:$0xff] %v5994_v21  ;;  %v5996_v27 = vpop.f32.mrb[33].mxu0 }
 0xa2c   : > { %v5998_v31 = vpop.f32.mrb[34].mxu0 }
 0xa2d   : > { %6809 = vst [vmem:[#allocation34_spill] sm:$0xff] %v5998_v31  ;;  %v6002_v49 = vpop.f32.mrb[35].mxu0 }
 0xa63   : > { %v6006_v42 = vpop.f32.mrb[36].mxu0 }
 0xa64   : > { %6810 = vst [vmem:[#allocation35_spill] sm:$0xff] %v6006_v42  ;;  %v6008_v2 = vpop.f32.mrb[37].mxu0 }
 0xa65   : > { %6811 = vst [vmem:[#allocation36_spill] sm:$0xff] %v6008_v2  ;;  %v6010_v54 = vpop.f32.mrb[38].mxu0 }
 0xa66   : > { %6812 = vst [vmem:[#allocation37_spill] sm:$0xff] %v6010_v54  ;;  %v6014_v50 = vpop.f32.mrb[39].mxu0 }
 0xa67   : > { %6813 = vst [vmem:[#allocation38_spill] sm:$0xff] %v6014_v50 }
 0xa6e   : > { %v4094_v18 = vpop.f32.mrb[40].mxu0 }
 0xa6f   : > { %v2024_v61 = vmul.f32 %v5882_v59, %v4094_v18  ;;  %v1991_v15 = vpop.f32.mrb[41].mxu0 }
 0xa70   : > { %v2022_v20 = vmul.f32 %v5885_v12, %v1991_v15  ;;  %v4095_v37 = vpop.f32.mrb[42].mxu0 }
 0xa71   : > { %v2032_v17 = vadd.f32 %v2024_v61, %v5357_v34  ;;  %v1994_v46 = vpop.f32.mrb[43].mxu0  ;;  %v2025_v25 = vmul.f32 %v5892_v53, %v4095_v37 }
 0xa72   : > { %v2023_v63 = vmul.f32 %v5889_v36, %v1994_v46  ;;  %v2030_v41 = vadd.f32 %v2022_v20, %v5361_v35 }
 0xa73   : > { %v2044_v62 = vsel %vm829_vm5, %v2032_v17, -inf  ;;  %v2033_v15 = vadd.f32 %v2025_v25, %v5364_v40 }
 0xa74   : > { %v2031_v44 = vadd.f32 %v2023_v63, %v5370_v45  ;;  %2045 = vmax.xlane.f32.xlu0 %v2044_v62  ;;  %v2038_v46 = vsel %vm829_vm5, %v2030_v41, -inf }
 0xa75   : > { %v2047_v63 = vsel %vm829_vm5, %v2033_v15, -inf }
 0xa76   : > { %v4098_v19 = vpop.f32.mrb[44].mxu0  ;;  %v2041_v18 = vsel %vm829_vm5, %v2031_v44, -inf }
 0xa77   : > { %v2028_v26 = vmul.f32 %v5899_v7, %v4098_v19  ;;  %2042 = vmax.xlane.f32.xlu1 %v2041_v18  ;;  %v2007_v61 = vpop.f32.mrb[45].mxu0 }
 0xa78   : > { %2039 = vmax.xlane.f32.xlu0 %v2038_v46  ;;  %v4099_v20 = vpop.f32.mrb[46].mxu0  ;;  %v2026_v5 = vmul.f32 %v5904_v16, %v2007_v61 }
 0xa79   : > { %v2010_v30 = vpop.f32.mrb[47].mxu0  ;;  %v2036_v37 = vadd.f32 %v2028_v26, %v5397_v6  ;;  %v2029_v26 = vmul.f32 %v5918_v11, %v4099_v20 }
 0xa7a   : > { %v2034_v62 = vadd.f32 %v2026_v5, %v5388_v60  ;;  %v2027_v5 = vmul.f32 %v5921_v43, %v2010_v30 }
 0xa7b   : > { %v2056_v25 = vsel %vm829_vm5, %v2036_v37, -inf  ;;  %v6044_v18 = vadd.f32 %v2029_v26, %v5394_v3 }
 0xa7c   : > { %2048 = vmax.xlane.f32.xlu0 %v2047_v63  ;;  %v2050_v19 = vsel %vm829_vm5, %v2034_v62, -inf  ;;  %v6048_v61 = vadd.f32 %v2027_v5, %v5403_v9 }
 0xa7d   : > { %v2059_v46 = vsel %vm829_vm5, %v6044_v18, -inf }
 0xa7e   : > { %v2053_v63 = vsel %vm829_vm5, %v6048_v61, -inf }
 0xa80   : > { %2057 = vmax.xlane.f32.xlu0 %v2056_v25 }
 0xa84   : > { %2051 = vmax.xlane.f32.xlu0 %v2050_v19 }
 0xa88   : > { %2132 = vrot.lane.b32.xlu1 %v5432_v55, %s5023_s30 }
 0xa8c   : > { %2134 = vrot.lane.b32.xlu1 %v5454_v33, %s5023_s30 }
 0xa9a   : > { %2130 = vrot.lane.b32.xlu0 %v5436_v24, %s5023_s30 }
 0xab0   : > { %2060 = vmax.xlane.f32.xlu1 %v2059_v46 }
 0xab4   : > { %2054 = vmax.xlane.f32.xlu1 %v2053_v63 }
 0xac5   : > { %2136 = vrot.lane.b32.xlu1 %v5451_v28, %s5023_s30 }
 0xb01   : > { %v2046_v20 = vpop.xlane.xlu0 %2045 }
 0xb02   : > { %v2064_v25 = vsub.f32 %v2032_v17, %v2046_v20 }
 0xb04   : > { %v2074_v19 = vmul.f32 1.442695, %v2064_v25  ;;  %v2043_v26 = vpop.xlane.xlu1 %2042 }
 0xb05   : > { %v2040_v42 = vpop.xlane.xlu0 %2039  ;;  %v2063_v5 = vsub.f32 %v2031_v44, %v2043_v26 }
 0xb06   : > { %4674 = vpow2.f32 %v2074_v19  ;;  %v2062_v30 = vsub.f32 %v2030_v41, %v2040_v42 }
 0xb07   : > { %v2072_v46 = vmul.f32 1.442695, %v2063_v5 }
 0xb08   : > { %v2070_v54 = vmul.f32 1.442695, %v2062_v30 }
 0xb09   : > { %v2049_v21 = vpop.xlane.xlu0 %2048 }
 0xb0a   : > { %4676 = vpow2.f32 %v2070_v54  ;;  %v2065_v31 = vsub.f32 %v2033_v15, %v2049_v21  ;;  %v2133_v21 = vpop.permute.xlu1 %2132 }
 0xb0c   : > { %v2076_v22 = vmul.f32 1.442695, %v2065_v31 }
 0xb0d   : > { %v2058_v29 = vpop.xlane.xlu0 %2057 }
 0xb0e   : > { %4678 = vpow2.f32 %v2076_v22  ;;  %v2068_v63 = vsub.f32 %v2036_v37, %v2058_v29 }
 0xb0f   : > { %4680 = vpow2.f32 %v2072_v46 }
 0xb10   : > { %v6056_v23 = vpop.eup %4674  ;;  %v2082_v32 = vmul.f32 1.442695, %v2068_v63 }
 0xb11   : > { %v2052_v17 = vpop.xlane.xlu0 %2051  ;;  %v2092_v20 = vsel %vm829_vm5, %v6056_v23, 0.0 }
 0xb12   : > { %4682 = vpow2.f32 %v2082_v32  ;;  %v2066_v42 = vsub.f32 %v2034_v62, %v2052_v17  ;;  %2093 = vadd.xlane.f32.xlu0 %v2092_v20  ;;  %v2135_v32 = vpop.permute.xlu1 %2134 }
 0xb14   : > { %v6060_v41 = vpop.eup %4676  ;;  %v2078_v54 = vmul.f32 1.442695, %v2066_v42 }
 0xb15   : > { %v2131_v44 = vpop.permute.xlu0 %2130  ;;  %v2086_v22 = vsel %vm829_vm5, %v6060_v41, 0.0 }
 0xb16   : > { %4684 = vpow2.f32 %v2078_v54  ;;  %2087 = vadd.xlane.f32.xlu0 %v2086_v22  ;;  %4100 = vmatprep.subr.bf16.mxu1 %v2131_v44 }
 0xb17   : > { %4101 = vmatpush3.bf16.msra.mxu1 %v2131_v44 }
 0xb18   : > { %v4679_v29 = vpop.eup %4678  ;;  %4102 = vmatprep.subr.bf16.mxu1 %v2133_v21 }
 0xb19   : > { %v2095_v31 = vsel %vm829_vm5, %v4679_v29, 0.0  ;;  %v4681_v15 = vpop.eup %4680 }
 0xb1a   : > { %2096 = vadd.xlane.f32.xlu1 %v2095_v31  ;;  %v2089_v25 = vsel %vm829_vm5, %v4681_v15, 0.0 }
 0xb1b   : > { %4103 = vmatpush3.bf16.msra.mxu1 %v2133_v21 }
 0xb1c   : > { %v6065_v37 = vpop.eup %4682  ;;  %4104 = vmatprep.subr.bf16.mxu1 %v2135_v32 }
 0xb1d   : > { %v2104_v62 = vsel %vm829_vm5, %v6065_v37, 0.0 }
 0xb1e   : > { %2105 = vadd.xlane.f32.xlu0 %v2104_v62  ;;  %2090 = vadd.xlane.f32.xlu1 %v2089_v25 }
 0xb1f   : > { %4105 = vmatpush3.bf16.msra.mxu1 %v2135_v32 }
 0xb20   : > { %v6070_v19 = vpop.eup %4684 }
 0xb21   : > { %v2098_v26 = vsel %vm829_vm5, %v6070_v19, 0.0 }
 0xb22   : > { %2099 = vadd.xlane.f32.xlu0 %v2098_v26 }
 0xb2f   : > { %2229 = vrot.lane.b32.xlu1 %v5313_v51, %s5024_s9 }
 0xb33   : > { %2231 = vrot.lane.b32.xlu1 %v5321_v0, %s5024_s9 }
 0xb3d   : > { %v2061_v30 = vpop.xlane.xlu1 %2060 }
 0xb3e   : > { %v2069_v5 = vsub.f32 %v6044_v18, %v2061_v30 }
 0xb40   : > { %v2084_v46 = vmul.f32 1.442695, %v2069_v5 }
 0xb41   : > { %v2055_v63 = vpop.xlane.xlu1 %2054 }
 0xb42   : > { %4686 = vpow2.f32 %v2084_v46  ;;  %v2067_v17 = vsub.f32 %v6048_v61, %v2055_v63 }
 0xb44   : > { %v2080_v20 = vmul.f32 1.442695, %v2067_v17 }
 0xb45   : > { %v2137_v42 = vpop.permute.xlu1 %2136 }
 0xb46   : > { %4106 = vmatprep.subr.bf16.mxu1 %v2137_v42  ;;  %4688 = vpow2.f32 %v2080_v20 }
 0xb47   : > { %4107 = vmatpush3.bf16.msra.mxu1 %v2137_v42 }
 0xb4c   : > { %v4687_v54 = vpop.eup %4686 }
 0xb4d   : > { %v2107_v21 = vsel %vm829_vm5, %v4687_v54, 0.0 }
 0xb4e   : > { %2108 = vadd.xlane.f32.xlu0 %v2107_v21 }
 0xb50   : > { %v4689_v44 = vpop.eup %4688 }
 0xb51   : > { %v2101_v22 = vsel %vm829_vm5, %v4689_v44, 0.0 }
 0xb57   : > { %2102 = vadd.xlane.f32.xlu1 %v2101_v22 }
 0xb64   : > { %2227 = vrot.lane.b32.xlu0 %v5303_v38, %s5024_s9 }
 0xb68   : > { %2219 = vrot.lane.b32.xlu0 %v5305_v39, %s5024_s9  ;;  %2233 = vrot.lane.b32.xlu1 %v5329_v13, %s5024_s9 }
 0xb6c   : > { %2223 = vrot.lane.b32.xlu0 %v5323_v1, %s5024_s9  ;;  %2221 = vrot.lane.b32.xlu1 %v5315_v52, %s5024_s9 }
 0xb70   : > { %2225 = vrot.lane.b32.xlu1 %v5331_v14, %s5024_s9 }
 0xb9f   : > { %v2094_v18 = vpop.xlane.xlu0 %2093 }
 0xba3   : > { %v2088_v31 = vpop.xlane.xlu0 %2087 }
 0xba7   : > { %v2097_v61 = vpop.xlane.xlu1 %2096 }
 0xba8   : > { %4690 = vrcp.f32 %v2097_v61 }
 0xba9   : > { %4692 = vrcp.f32 %v2088_v31 }
 0xbaa   : > { %4694 = vrcp.f32 %v2094_v18 }
 0xbab   : > { %v2091_v32 = vpop.xlane.xlu1 %2090  ;;  %v2106_v21 = vpop.xlane.xlu0 %2105 }
 0xbac   : > { %4696 = vrcp.f32 %v2091_v32 }
 0xbaf   : > { %v2100_v22 = vpop.xlane.xlu0 %2099  ;;  %v2230_v18 = vpop.permute.xlu1 %2229 }
 0xbb2   : > { %v4691_v62 = vpop.eup %4690 }
 0xbb3   : > { %v4693_v25 = vpop.eup %4692  ;;  %v2121_v5 = vmul.f32 %v4691_v62, %v4679_v29  ;;  %v2232_v32 = vpop.permute.xlu1 %2231 }
 0xbb4   : > { %v4695_v26 = vpop.eup %4694  ;;  %v2118_v46 = vmul.f32 %v4693_v25, %v6060_v41  ;;  %v2251_v41 = vsel %vm723_vm0, %v2230_v18, 0 }
 0xbb5   : > { %v2120_v17 = vmul.f32 %v4695_v26, %v6056_v23 }
 0xbb6   : > { %v4697_v30 = vpop.eup %4696 }
 0xbb7   : > { %v2119_v63 = vmul.f32 %v4697_v30, %v4681_v15  ;;  %v2127_v42 = vpack.c.bf16 %v2121_v5, %v2120_v17  ;;  %v2254_v5 = vsel %vm723_vm0, %v2232_v32, 0 }
 0xbb9   : > { %v2126_v20 = vpack.c.bf16 %v2119_v63, %v2118_v46 }
 0xbbb   : > { %4108 = vmatprep.mubr.msk.bf16.mxu1 %vm829_vm5, %v2126_v20 }
 0xbbc   : > { %4109 = vmatmul.mubr.msk.bf16.vlgmr.msra.gmra.mrb[48].mxu1 %vm829_vm5, %v2127_v42 }
 0xbdb   : > { %v2109_v61 = vpop.xlane.xlu0 %2108 }
 0xbdc   : > { %4698 = vrcp.f32 %v2109_v61 }
 0xbdd   : > { %4700 = vrcp.f32 %v2100_v22 }
 0xbde   : > { %4702 = vrcp.f32 %v2106_v21 }
 0xbdf   : > { %v2228_v31 = vpop.permute.xlu0 %2227 }
 0xbe0   : > { %4256 = vmatprep.subr.msk.bf16.mxu1 %vm723_vm0, %v2228_v31  ;;  %v2248_v29 = vsel %vm723_vm0, %v2228_v31, 0 }
 0xbe1   : > { %4117 = vmatpush3.bf16.xpose.msra.mxu1 %v2248_v29 }
 0xbe2   : > { %4257 = vmatprep.subr.msk.bf16.mxu1 %vm723_vm0, %v2230_v18 }
 0xbe3   : > { %v2220_v22 = vpop.permute.xlu0 %2219 }
 0xbe4   : > { %v2103_v23 = vpop.xlane.xlu1 %2102 }
 0xbe5   : > { %4704 = vrcp.f32 %v2103_v23 }
 0xbe6   : > { %v4699_v15 = vpop.eup %4698 }
 0xbe7   : > { %v4701_v62 = vpop.eup %4700  ;;  %v2125_v30 = vmul.f32 %v4699_v15, %v4687_v54 }
 0xbe8   : > { %v4703_v25 = vpop.eup %4702  ;;  %v2122_v46 = vmul.f32 %v4701_v62, %v6070_v19  ;;  %v2234_v17 = vpop.permute.xlu1 %2233 }
 0xbe9   : > { %4119 = vmatpush3.bf16.xpose.msra.mxu1 %v2251_v41  ;;  %v2124_v20 = vmul.f32 %v4703_v25, %v6065_v37  ;;  %v2257_v54 = vsel %vm723_vm0, %v2234_v17, 0 }
 0xbea   : > { %4258 = vmatprep.subr.msk.bf16.mxu1 %vm723_vm0, %v2232_v32 }
 0xbeb   : > { %v2129_v21 = vpack.c.bf16 %v2125_v30, %v2124_v20 }
 0xbec   : > { %v2222_v19 = vpop.permute.xlu1 %2221 }
 0xbef   : > { %v4705_v26 = vpop.eup %4704 }
 0xbf0   : > { %v2123_v63 = vmul.f32 %v4705_v26, %v4689_v44  ;;  %v2224_v44 = vpop.permute.xlu0 %2223  ;;  %v2226_v37 = vpop.permute.xlu1 %2225 }
 0xbf1   : > { %4121 = vmatpush3.bf16.xpose.msra.mxu1 %v2254_v5 }
 0xbf2   : > { %4259 = vmatprep.subr.msk.bf16.mxu1 %vm723_vm0, %v2234_v17  ;;  %v2128_v42 = vpack.c.bf16 %v2123_v63, %v2122_v46 }
 0xbf4   : > { %4112 = vmatprep.mubr.msk.bf16.mxu1 %vm829_vm5, %v2128_v42 }
 0xbf5   : > { %4113 = vmatmul.mubr.msk.bf16.gmra.mrb[52].mxu1 %vm829_vm5, %v2129_v21 }
 0xbf6   : > { %4124 = vmatprep.mubr.msk.bf16.mxu1 %vm723_vm0, %v2220_v22 }
 0xbf9   : > { %4123 = vmatpush3.bf16.xpose.msra.mxu1 %v2257_v54 }
 0xc00   : > { %4125 = vmatmul.mubr.msk.bf16.vlgmr.msra.gmra.mrb[56].mxu1 %vm723_vm0, %v2222_v19 }
 0xc01   : > { %4128 = vmatprep.mubr.msk.bf16.mxu1 %vm723_vm0, %v2224_v44 }
 0xc08   : > { %4129 = vmatmul.mubr.msk.bf16.gmra.mrb[60].mxu1 %vm723_vm0, %v2226_v37 }
 0xc8f   : > { %v6114_v18 = vpop.f32.mrb[48].mxu1 }
 0xc90   : > { %6814 = vst [vmem:[#allocation39_spill] sm:$0xff] %v6114_v18  ;;  %v6116_v61 = vpop.f32.mrb[49].mxu1 }
 0xc91   : > { %v6118_v31 = vpop.f32.mrb[50].mxu1 }
 0xc92   : > { %6815 = vst [vmem:[#allocation40_spill] sm:$0xff] %v6118_v31  ;;  %v6122_v29 = vpop.f32.mrb[51].mxu1 }
 0xcc8   : > { %v6126_v41 = vpop.f32.mrb[52].mxu1 }
 0xcc9   : > { %6816 = vst [vmem:[#allocation41_spill] sm:$0xff] %v6126_v41  ;;  %v6128_v15 = vpop.f32.mrb[53].mxu1 }
 0xcca   : > { %6817 = vst [vmem:[#allocation42_spill] sm:$0xff] %v6128_v15  ;;  %v6130_v62 = vpop.f32.mrb[54].mxu1 }
 0xccb   : > { %6818 = vst [vmem:[#allocation43_spill] sm:$0xff] %v6130_v62  ;;  %v6134_v26 = vpop.f32.mrb[55].mxu1 }
 0xccc   : > { %6819 = vst [vmem:[#allocation44_spill] sm:$0xff] %v6134_v26 }
 0xcd3   : > { %v4126_v5 = vpop.f32.mrb[56].mxu1 }
 0xcd4   : > { %v2326_v46 = vmul.f32 %v5882_v59, %v4126_v5  ;;  %v2293_v63 = vpop.f32.mrb[57].mxu1 }
 0xcd5   : > { %v2324_v17 = vmul.f32 %v5885_v12, %v2293_v63  ;;  %v4127_v20 = vpop.f32.mrb[58].mxu1 }
 0xcd6   : > { %v2334_v42 = vadd.f32 %v2326_v46, %v5357_v34  ;;  %v2296_v21 = vpop.f32.mrb[59].mxu1  ;;  %v2327_v19 = vmul.f32 %v5892_v53, %v4127_v20 }
 0xcd7   : > { %v2325_v22 = vmul.f32 %v5889_v36, %v2296_v21  ;;  %v2332_v54 = vadd.f32 %v2324_v17, %v5361_v35 }
 0xcd8   : > { %v2346_v44 = vsel %vm829_vm5, %v2334_v42, -inf  ;;  %v2335_v12 = vadd.f32 %v2327_v19, %v5364_v40 }
 0xcd9   : > { %v2333_v37 = vadd.f32 %v2325_v22, %v5370_v45  ;;  %2347 = vmax.xlane.f32.xlu0 %v2346_v44  ;;  %v2340_v36 = vsel %vm829_vm5, %v2332_v54, -inf }
 0xcda   : > { %v2349_v21 = vsel %vm829_vm5, %v2335_v12, -inf }
 0xcdb   : > { %v4130_v25 = vpop.f32.mrb[60].mxu1  ;;  %v2343_v59 = vsel %vm829_vm5, %v2333_v37, -inf }
 0xcdc   : > { %v2330_v5 = vmul.f32 %v5899_v7, %v4130_v25  ;;  %2344 = vmax.xlane.f32.xlu1 %v2343_v59  ;;  %v2309_v46 = vpop.f32.mrb[61].mxu1 }
 0xcdd   : > { %2341 = vmax.xlane.f32.xlu0 %v2340_v36  ;;  %v4131_v63 = vpop.f32.mrb[62].mxu1  ;;  %v2328_v20 = vmul.f32 %v5904_v16, %v2309_v46 }
 0xcde   : > { %v2312_v17 = vpop.f32.mrb[63].mxu1  ;;  %v2338_v53 = vadd.f32 %v2330_v5, %v5397_v6  ;;  %v2331_v16 = vmul.f32 %v5918_v11, %v4131_v63 }
 0xcdf   : > { %v2336_v22 = vadd.f32 %v2328_v20, %v5388_v60  ;;  %v2329_v44 = vmul.f32 %v5921_v43, %v2312_v17 }
 0xce0   : > { %v2358_v19 = vsel %vm829_vm5, %v2338_v53, -inf  ;;  %v6164_v25 = vadd.f32 %v2331_v16, %v5394_v3 }
 0xce1   : > { %2350 = vmax.xlane.f32.xlu0 %v2349_v21  ;;  %v2352_v7 = vsel %vm829_vm5, %v2336_v22, -inf  ;;  %v6168_v59 = vadd.f32 %v2329_v44, %v5403_v9 }
 0xce2   : > { %v2361_v5 = vsel %vm829_vm5, %v6164_v25, -inf }
 0xce3   : > { %v2355_v46 = vsel %vm829_vm5, %v6168_v59, -inf }
 0xce5   : > { %2359 = vmax.xlane.f32.xlu0 %v2358_v19 }
 0xce9   : > { %2353 = vmax.xlane.f32.xlu0 %v2352_v7 }
 0xced   : > { %2434 = vrot.lane.b32.xlu1 %v5432_v55, %s5024_s9 }
 0xcf1   : > { %2436 = vrot.lane.b32.xlu1 %v5454_v33, %s5024_s9 }
 0xcff   : > { %2432 = vrot.lane.b32.xlu0 %v5436_v24, %s5024_s9 }
 0xd15   : > { %2362 = vmax.xlane.f32.xlu1 %v2361_v5 }
 0xd19   : > { %2356 = vmax.xlane.f32.xlu1 %v2355_v46 }
 0xd2a   : > { %2438 = vrot.lane.b32.xlu1 %v5451_v28, %s5024_s9 }
 0xd66   : > { %v2348_v11 = vpop.xlane.xlu0 %2347 }
 0xd67   : > { %v2366_v36 = vsub.f32 %v2334_v42, %v2348_v11 }
 0xd69   : > { %v2376_v63 = vmul.f32 1.442695, %v2366_v36  ;;  %v2345_v20 = vpop.xlane.xlu1 %2344 }
 0xd6a   : > { %v2342_v21 = vpop.xlane.xlu0 %2341  ;;  %v2365_v17 = vsub.f32 %v2333_v37, %v2345_v20 }
 0xd6b   : > { %4706 = vpow2.f32 %v2376_v63  ;;  %v2364_v43 = vsub.f32 %v2332_v54, %v2342_v21 }
 0xd6c   : > { %v2374_v44 = vmul.f32 1.442695, %v2365_v17 }
 0xd6d   : > { %v2372_v19 = vmul.f32 1.442695, %v2364_v43 }
 0xd6e   : > { %v2351_v7 = vpop.xlane.xlu0 %2350 }
 0xd6f   : > { %4708 = vpow2.f32 %v2372_v19  ;;  %v2367_v16 = vsub.f32 %v2335_v12, %v2351_v7  ;;  %v2435_v12 = vpop.permute.xlu1 %2434 }
 0xd71   : > { %v2378_v5 = vmul.f32 1.442695, %v2367_v16 }
 0xd72   : > { %v2360_v32 = vpop.xlane.xlu0 %2359 }
 0xd73   : > { %4710 = vpow2.f32 %v2378_v5  ;;  %v2370_v46 = vsub.f32 %v2338_v53, %v2360_v32 }
 0xd74   : > { %4712 = vpow2.f32 %v2374_v44 }
 0xd75   : > { %v6176_v30 = vpop.eup %4706  ;;  %v2384_v23 = vmul.f32 1.442695, %v2370_v46 }
 0xd76   : > { %v2354_v42 = vpop.xlane.xlu0 %2353  ;;  %v2394_v11 = vsel %vm829_vm5, %v6176_v30, 0.0 }
 0xd77   : > { %4714 = vpow2.f32 %v2384_v23  ;;  %v2368_v54 = vsub.f32 %v2336_v22, %v2354_v42  ;;  %2395 = vadd.xlane.f32.xlu0 %v2394_v11  ;;  %v2437_v23 = vpop.permute.xlu1 %2436 }
 0xd79   : > { %v6180_v37 = vpop.eup %4708  ;;  %v2380_v36 = vmul.f32 1.442695, %v2368_v54 }
 0xd7a   : > { %v2433_v63 = vpop.permute.xlu0 %2432  ;;  %v2388_v20 = vsel %vm829_vm5, %v6180_v37, 0.0 }
 0xd7b   : > { %4716 = vpow2.f32 %v2380_v36  ;;  %2389 = vadd.xlane.f32.xlu0 %v2388_v20  ;;  %4132 = vmatprep.subr.bf16.mxu0 %v2433_v63 }
 0xd7c   : > { %4133 = vmatpush3.bf16.msra.mxu0 %v2433_v63 }
 0xd7d   : > { %v4711_v32 = vpop.eup %4710  ;;  %4134 = vmatprep.subr.bf16.mxu0 %v2435_v12 }
 0xd7e   : > { %v2397_v53 = vsel %vm829_vm5, %v4711_v32, 0.0  ;;  %v4713_v21 = vpop.eup %4712 }
 0xd7f   : > { %2398 = vadd.xlane.f32.xlu1 %v2397_v53  ;;  %v2391_v17 = vsel %vm829_vm5, %v4713_v21, 0.0 }
 0xd80   : > { %4135 = vmatpush3.bf16.msra.mxu0 %v2435_v12 }
 0xd81   : > { %v6185_v22 = vpop.eup %4714  ;;  %4136 = vmatprep.subr.bf16.mxu0 %v2437_v23 }
 0xd82   : > { %v2406_v43 = vsel %vm829_vm5, %v6185_v22, 0.0 }
 0xd83   : > { %2407 = vadd.xlane.f32.xlu0 %v2406_v43  ;;  %2392 = vadd.xlane.f32.xlu1 %v2391_v17 }
 0xd84   : > { %4137 = vmatpush3.bf16.msra.mxu0 %v2437_v23 }
 0xd85   : > { %v6190_v19 = vpop.eup %4716 }
 0xd86   : > { %v2400_v7 = vsel %vm829_vm5, %v6190_v19, 0.0 }
 0xd87   : > { %2401 = vadd.xlane.f32.xlu0 %v2400_v7 }
 0xd94   : > { %2531 = vrot.lane.b32.xlu1 %v5313_v51, %s5025_s13 }
 0xd98   : > { %2533 = vrot.lane.b32.xlu1 %v5321_v0, %s5025_s13 }
 0xda2   : > { %v2363_v16 = vpop.xlane.xlu1 %2362 }
 0xda3   : > { %v2371_v44 = vsub.f32 %v6164_v25, %v2363_v16 }
 0xda5   : > { %v2386_v5 = vmul.f32 1.442695, %v2371_v44 }
 0xda6   : > { %v2357_v46 = vpop.xlane.xlu1 %2356 }
 0xda7   : > { %4718 = vpow2.f32 %v2386_v5  ;;  %v2369_v42 = vsub.f32 %v6168_v59, %v2357_v46 }
 0xda9   : > { %v2382_v11 = vmul.f32 1.442695, %v2369_v42 }
 0xdaa   : > { %v2439_v54 = vpop.permute.xlu1 %2438 }
 0xdab   : > { %4138 = vmatprep.subr.bf16.mxu0 %v2439_v54  ;;  %4720 = vpow2.f32 %v2382_v11 }
 0xdac   : > { %4139 = vmatpush3.bf16.msra.mxu0 %v2439_v54 }
 0xdb1   : > { %v4719_v36 = vpop.eup %4718 }
 0xdb2   : > { %v2409_v12 = vsel %vm829_vm5, %v4719_v36, 0.0 }
 0xdb3   : > { %2410 = vadd.xlane.f32.xlu0 %v2409_v12 }
 0xdb5   : > { %v4721_v63 = vpop.eup %4720 }
 0xdb6   : > { %v2403_v20 = vsel %vm829_vm5, %v4721_v63, 0.0 }
 0xdbc   : > { %2404 = vadd.xlane.f32.xlu1 %v2403_v20 }
 0xdc9   : > { %2529 = vrot.lane.b32.xlu0 %v5303_v38, %s5025_s13 }
 0xdcd   : > { %2521 = vrot.lane.b32.xlu0 %v5305_v39, %s5025_s13  ;;  %2535 = vrot.lane.b32.xlu1 %v5329_v13, %s5025_s13 }
 0xdd1   : > { %2525 = vrot.lane.b32.xlu0 %v5323_v1, %s5025_s13  ;;  %2523 = vrot.lane.b32.xlu1 %v5315_v52, %s5025_s13 }
 0xdd5   : > { %2527 = vrot.lane.b32.xlu1 %v5331_v14, %s5025_s13 }
 0xe04   : > { %v2396_v25 = vpop.xlane.xlu0 %2395 }
 0xe08   : > { %v2390_v53 = vpop.xlane.xlu0 %2389 }
 0xe0c   : > { %v2399_v59 = vpop.xlane.xlu1 %2398 }
 0xe0d   : > { %4722 = vrcp.f32 %v2399_v59 }
 0xe0e   : > { %4724 = vrcp.f32 %v2390_v53 }
 0xe0f   : > { %4726 = vrcp.f32 %v2396_v25 }
 0xe10   : > { %v2393_v23 = vpop.xlane.xlu1 %2392  ;;  %v2408_v12 = vpop.xlane.xlu0 %2407 }
 0xe11   : > { %4728 = vrcp.f32 %v2393_v23 }
 0xe14   : > { %v2402_v20 = vpop.xlane.xlu0 %2401  ;;  %v2532_v25 = vpop.permute.xlu1 %2531 }
 0xe17   : > { %v4723_v43 = vpop.eup %4722 }
 0xe18   : > { %v4725_v17 = vpop.eup %4724  ;;  %v2423_v44 = vmul.f32 %v4723_v43, %v4711_v32  ;;  %v2534_v23 = vpop.permute.xlu1 %2533 }
 0xe19   : > { %v4727_v7 = vpop.eup %4726  ;;  %v2420_v5 = vmul.f32 %v4725_v17, %v6180_v37  ;;  %v2553_v37 = vsel %vm723_vm0, %v2532_v25, 0 }
 0xe1a   : > { %v2422_v42 = vmul.f32 %v4727_v7, %v6176_v30 }
 0xe1b   : > { %v4729_v16 = vpop.eup %4728 }
 0xe1c   : > { %v2421_v46 = vmul.f32 %v4729_v16, %v4713_v21  ;;  %v2429_v54 = vpack.c.bf16 %v2423_v44, %v2422_v42  ;;  %v2556_v16 = vsel %vm723_vm0, %v2534_v23, 0 }
 0xe1e   : > { %v2428_v11 = vpack.c.bf16 %v2421_v46, %v2420_v5 }
 0xe20   : > { %4140 = vmatprep.mubr.msk.bf16.mxu0 %vm829_vm5, %v2428_v11 }
 0xe21   : > { %4141 = vmatmul.mubr.msk.bf16.vlgmr.msra.gmra.mrb[48].mxu0 %vm829_vm5, %v2429_v54 }
 0xe40   : > { %v2411_v59 = vpop.xlane.xlu0 %2410 }
 0xe41   : > { %4730 = vrcp.f32 %v2411_v59 }
 0xe42   : > { %4732 = vrcp.f32 %v2402_v20 }
 0xe43   : > { %4734 = vrcp.f32 %v2408_v12 }
 0xe44   : > { %v2530_v53 = vpop.permute.xlu0 %2529 }
 0xe45   : > { %v2550_v41 = vsel %vm723_vm0, %v2530_v53, 0  ;;  %4260 = vmatprep.subr.msk.bf16.mxu0 %vm723_vm0, %v2530_v53 }
 0xe46   : > { %4149 = vmatpush3.bf16.xpose.msra.mxu0 %v2550_v41 }
 0xe47   : > { %4261 = vmatprep.subr.msk.bf16.mxu0 %vm723_vm0, %v2532_v25 }
 0xe48   : > { %v2522_v54 = vpop.permute.xlu0 %2521 }
 0xe49   : > { %v2405_v30 = vpop.xlane.xlu1 %2404 }
 0xe4a   : > { %4736 = vrcp.f32 %v2405_v30 }
 0xe4b   : > { %v4731_v32 = vpop.eup %4730 }
 0xe4c   : > { %v4733_v21 = vpop.eup %4732  ;;  %v2427_v7 = vmul.f32 %v4731_v32, %v4719_v36 }
 0xe4d   : > { %v4735_v43 = vpop.eup %4734  ;;  %v2424_v41 = vmul.f32 %v4733_v21, %v6190_v19  ;;  %v2536_v5 = vpop.permute.xlu1 %2535 }
 0xe4e   : > { %4151 = vmatpush3.bf16.xpose.msra.mxu0 %v2553_v37  ;;  %v2426_v46 = vmul.f32 %v4735_v43, %v6185_v22  ;;  %v2559_v36 = vsel %vm723_vm0, %v2536_v5, 0 }
 0xe4f   : > { %4262 = vmatprep.subr.msk.bf16.mxu0 %vm723_vm0, %v2534_v23  ;;  %v6276_v23 = vld [vmem:[#allocation8 + $0x30] sm:$0xff] }
 0xe50   : > { %v2431_v11 = vpack.c.bf16 %v2427_v7, %v2426_v46 }
 0xe51   : > { %v2524_v19 = vpop.permute.xlu1 %2523 }
 0xe54   : > { %v4737_v17 = vpop.eup %4736 }
 0xe55   : > { %v2425_v44 = vmul.f32 %v4737_v17, %v4721_v63  ;;  %v2526_v63 = vpop.permute.xlu0 %2525  ;;  %v2528_v22 = vpop.permute.xlu1 %2527 }
 0xe56   : > { %4153 = vmatpush3.bf16.xpose.msra.mxu0 %v2556_v16  ;;  %v6258_v16 = vld [vmem:[#allocation8 + $0x10] sm:$0xff] }
 0xe57   : > { %4263 = vmatprep.subr.msk.bf16.mxu0 %vm723_vm0, %v2536_v5  ;;  %v2430_v42 = vpack.c.bf16 %v2425_v44, %v2424_v41  ;;  %v6261_v5 = vld [vmem:[#allocation8] sm:$0xff] }
 0xe59   : > { %4144 = vmatprep.mubr.msk.bf16.mxu0 %vm829_vm5, %v2430_v42 }
 0xe5a   : > { %4145 = vmatmul.mubr.msk.bf16.gmra.mrb[52].mxu0 %vm829_vm5, %v2431_v11 }
 0xe5b   : > { %4156 = vmatprep.mubr.msk.bf16.mxu0 %vm723_vm0, %v2522_v54 }
 0xe5e   : > { %4155 = vmatpush3.bf16.xpose.msra.mxu0 %v2559_v36  ;;  %v6265_v36 = vld [vmem:[#allocation8 + $0x8] sm:$0xff] }
 0xe65   : > { %4157 = vmatmul.mubr.msk.bf16.vlgmr.msra.gmra.mrb[56].mxu0 %vm723_vm0, %v2524_v19 }
 0xe66   : > { %4160 = vmatprep.mubr.msk.bf16.mxu0 %vm723_vm0, %v2526_v63 }
 0xe6d   : > { %4161 = vmatmul.mubr.msk.bf16.gmra.mrb[60].mxu0 %vm723_vm0, %v2528_v22  ;;  %v6269_v22 = vld [vmem:[#allocation8 + $0x18] sm:$0xff] }
 0xef4   : > { %v6234_v12 = vpop.f32.mrb[48].mxu0 }
 0xef5   : > { %6820 = vst [vmem:[#allocation45_spill] sm:$0xff] %v6234_v12  ;;  %v6236_v20 = vpop.f32.mrb[49].mxu0 }
 0xef6   : > { %v6238_v25 = vpop.f32.mrb[50].mxu0 }
 0xef7   : > { %6821 = vst [vmem:[#allocation46_spill] sm:$0xff] %v6238_v25  ;;  %v6242_v53 = vpop.f32.mrb[51].mxu0 }
 0xf2d   : > { %v6246_v30 = vpop.f32.mrb[52].mxu0 }
 0xf2e   : > { %6822 = vst [vmem:[#allocation47_spill] sm:$0xff] %v6246_v30  ;;  %v6248_v37 = vpop.f32.mrb[53].mxu0 }
 0xf2f   : > { %6823 = vst [vmem:[#allocation48_spill] sm:$0xff] %v6248_v37  ;;  %v6250_v32 = vpop.f32.mrb[54].mxu0 }
 0xf30   : > { %6824 = vst [vmem:[#allocation49_spill] sm:$0xff] %v6250_v32  ;;  %v6254_v43 = vpop.f32.mrb[55].mxu0 }
 0xf31   : > { %6825 = vst [vmem:[#allocation50_spill] sm:$0xff] %v6254_v43 }
 0xf38   : > { %v4158_v7 = vpop.f32.mrb[56].mxu0 }
 0xf39   : > { %v2628_v41 = vmul.f32 %v6258_v16, %v4158_v7  ;;  %v2595_v44 = vpop.f32.mrb[57].mxu0 }
 0xf3a   : > { %v2626_v46 = vmul.f32 %v6261_v5, %v2595_v44  ;;  %v4159_v42 = vpop.f32.mrb[58].mxu0 }
 0xf3b   : > { %v2636_v11 = vadd.f32 %v2628_v41, %v5357_v34  ;;  %v2598_v54 = vpop.f32.mrb[59].mxu0  ;;  %v2629_v21 = vmul.f32 %v6269_v22, %v4159_v42 }
 0xf3c   : > { %v2627_v19 = vmul.f32 %v6265_v36, %v2598_v54  ;;  %v2634_v63 = vadd.f32 %v2626_v46, %v5361_v35 }
 0xf3d   : > { %v2648_v7 = vsel %vm829_vm5, %v2636_v11, -inf  ;;  %v2637_v41 = vadd.f32 %v2629_v21, %v5364_v40 }
 0xf3e   : > { %v2635_v59 = vadd.f32 %v2627_v19, %v5370_v45  ;;  %2649 = vmax.xlane.f32.xlu0 %v2648_v7  ;;  %v2642_v30 = vsel %vm829_vm5, %v2634_v63, -inf  ;;  %v6281_v19 = vld [vmem:[#allocation8 + $0x20] sm:$0xff] }
 0xf3f   : > { %v2651_v12 = vsel %vm829_vm5, %v2637_v41, -inf }
 0xf40   : > { %v4162_v44 = vpop.f32.mrb[60].mxu0  ;;  %v2645_v17 = vsel %vm829_vm5, %v2635_v59, -inf }
 0xf41   : > { %v2632_v54 = vmul.f32 %v6276_v23, %v4162_v44  ;;  %2646 = vmax.xlane.f32.xlu1 %v2645_v17  ;;  %v2611_v46 = vpop.f32.mrb[61].mxu0 }
 0xf42   : > { %2643 = vmax.xlane.f32.xlu0 %v2642_v30  ;;  %v4163_v42 = vpop.f32.mrb[62].mxu0  ;;  %v2630_v7 = vmul.f32 %v6281_v19, %v2611_v46  ;;  %v6294_v30 = vld [vmem:[#allocation8 + $0x38] sm:$0xff]  ;;  %v6300_v46 = vld [vmem:[#allocation8 + $0x28] sm:$0xff] }
 0xf43   : > { %v2614_v32 = vpop.f32.mrb[63].mxu0  ;;  %v2640_v62 = vadd.f32 %v2632_v54, %v5397_v6 }
 0xf44   : > { %v2638_v21 = vadd.f32 %v2630_v7, %v5388_v60  ;;  %v2631_v7 = vmul.f32 %v6300_v46, %v2614_v32 }
 0xf45   : > { %v2660_v44 = vsel %vm829_vm5, %v2640_v62, -inf }
 0xf46   : > { %2652 = vmax.xlane.f32.xlu0 %v2651_v12  ;;  %v2654_v17 = vsel %vm829_vm5, %v2638_v21, -inf  ;;  %v2633_v12 = vmul.f32 %v6294_v30, %v4163_v42 }
 0xf48   : > { %v6298_v54 = vadd.f32 %v2633_v12, %v5394_v3 }
 0xf4a   : > { %2661 = vmax.xlane.f32.xlu0 %v2660_v44  ;;  %v6304_v44 = vadd.f32 %v2631_v7, %v5403_v9 }
 0xf4c   : > { %v2657_v25 = vsel %vm829_vm5, %v6304_v44, -inf }
 0xf4e   : > { %2655 = vmax.xlane.f32.xlu0 %v2654_v17  ;;  %v2663_v17 = vsel %vm829_vm5, %v6298_v54, -inf }
 0xf52   : > { %2736 = vrot.lane.b32.xlu1 %v5432_v55, %s5025_s13 }
 0xf56   : > { %2738 = vrot.lane.b32.xlu1 %v5454_v33, %s5025_s13 }
 0xf64   : > { %2734 = vrot.lane.b32.xlu0 %v5436_v24, %s5025_s13 }
 0xf7a   : > { %2664 = vmax.xlane.f32.xlu1 %v2663_v17 }
 0xf7e   : > { %2658 = vmax.xlane.f32.xlu1 %v2657_v25 }
 0xf8f   : > { %2740 = vrot.lane.b32.xlu1 %v5451_v28, %s5025_s13 }
 0xfcb   : > { %v2650_v42 = vpop.xlane.xlu0 %2649 }
 0xfcc   : > { %v2668_v12 = vsub.f32 %v2636_v11, %v2650_v42 }
 0xfce   : > { %v2678_v18 = vmul.f32 1.442695, %v2668_v12  ;;  %v2647_v31 = vpop.xlane.xlu1 %2646 }
 0xfcf   : > { %v2644_v37 = vpop.xlane.xlu0 %2643  ;;  %v2667_v7 = vsub.f32 %v2635_v59, %v2647_v31 }
 0xfd0   : > { %4738 = vpow2.f32 %v2678_v18  ;;  %v2666_v32 = vsub.f32 %v2634_v63, %v2644_v37 }
 0xfd1   : > { %v2676_v17 = vmul.f32 1.442695, %v2667_v7 }
 0xfd2   : > { %v2674_v43 = vmul.f32 1.442695, %v2666_v32 }
 0xfd3   : > { %v2653_v15 = vpop.xlane.xlu0 %2652 }
 0xfd4   : > { %4740 = vpow2.f32 %v2674_v43  ;;  %v2669_v26 = vsub.f32 %v2637_v41, %v2653_v15  ;;  %v2737_v15 = vpop.permute.xlu1 %2736 }
 0xfd6   : > { %v2680_v2 = vmul.f32 1.442695, %v2669_v26 }
 0xfd7   : > { %v2662_v50 = vpop.xlane.xlu0 %2661 }
 0xfd8   : > { %4742 = vpow2.f32 %v2680_v2  ;;  %v2672_v25 = vsub.f32 %v2640_v62, %v2662_v50 }
 0xfd9   : > { %4744 = vpow2.f32 %v2676_v17 }
 0xfda   : > { %v6312_v10 = vpop.eup %4738  ;;  %v2686_v28 = vmul.f32 1.442695, %v2672_v25 }
 0xfdb   : > { %v2656_v11 = vpop.xlane.xlu0 %2655  ;;  %v2696_v42 = vsel %vm829_vm5, %v6312_v10, 0.0 }
 0xfdc   : > { %4746 = vpow2.f32 %v2686_v28  ;;  %v2670_v18 = vsub.f32 %v2638_v21, %v2656_v11  ;;  %2697 = vadd.xlane.f32.xlu0 %v2696_v42  ;;  %v2739_v28 = vpop.permute.xlu1 %2738 }
 0xfde   : > { %v6316_v31 = vpop.eup %4740  ;;  %v2682_v59 = vmul.f32 1.442695, %v2670_v18 }
 0xfdf   : > { %v2735_v37 = vpop.permute.xlu0 %2734  ;;  %v2690_v2 = vsel %vm829_vm5, %v6316_v31, 0.0 }
 0xfe0   : > { %4748 = vpow2.f32 %v2682_v59  ;;  %2691 = vadd.xlane.f32.xlu0 %v2690_v2  ;;  %4164 = vmatprep.subr.bf16.mxu1 %v2735_v37 }
 0xfe1   : > { %4165 = vmatpush3.bf16.msra.mxu1 %v2735_v37 }
 0xfe2   : > { %v4743_v50 = vpop.eup %4742  ;;  %4166 = vmatprep.subr.bf16.mxu1 %v2737_v15 }
 0xfe3   : > { %v2699_v62 = vsel %vm829_vm5, %v4743_v50, 0.0  ;;  %v4745_v26 = vpop.eup %4744 }
 0xfe4   : > { %2700 = vadd.xlane.f32.xlu1 %v2699_v62  ;;  %v2693_v41 = vsel %vm829_vm5, %v4745_v26, 0.0 }
 0xfe5   : > { %4167 = vmatpush3.bf16.msra.mxu1 %v2737_v15 }
 0xfe6   : > { %v6321_v43 = vpop.eup %4746  ;;  %4168 = vmatprep.subr.bf16.mxu1 %v2739_v28 }
 0xfe7   : > { %v2708_v63 = vsel %vm829_vm5, %v6321_v43, 0.0 }
 0xfe8   : > { %2709 = vadd.xlane.f32.xlu0 %v2708_v63  ;;  %2694 = vadd.xlane.f32.xlu1 %v2693_v41 }
 0xfe9   : > { %4169 = vmatpush3.bf16.msra.mxu1 %v2739_v28 }
 0xfea   : > { %v6326_v21 = vpop.eup %4748 }
 0xfeb   : > { %v2702_v12 = vsel %vm829_vm5, %v6326_v21, 0.0 }
 0xfec   : > { %2703 = vadd.xlane.f32.xlu0 %v2702_v12 }
 0xff9   : > { %2833 = vrot.lane.b32.xlu1 %v5313_v51, %s5026_s18 }
 0xffd   : > { %2835 = vrot.lane.b32.xlu1 %v5321_v0, %s5026_s18 }
0x1007   : > { %v2665_v32 = vpop.xlane.xlu1 %2664 }
0x1008   : > { %v2673_v7 = vsub.f32 %v6298_v54, %v2665_v32 }
0x100a   : > { %v2688_v17 = vmul.f32 1.442695, %v2673_v7 }
0x100b   : > { %v2659_v25 = vpop.xlane.xlu1 %2658 }
0x100c   : > { %4750 = vpow2.f32 %v2688_v17  ;;  %v2671_v11 = vsub.f32 %v6304_v44, %v2659_v25 }
0x100e   : > { %v2684_v42 = vmul.f32 1.442695, %v2671_v11 }
0x100f   : > { %v2741_v18 = vpop.permute.xlu1 %2740 }
0x1010   : > { %4170 = vmatprep.subr.bf16.mxu1 %v2741_v18  ;;  %4752 = vpow2.f32 %v2684_v42 }
0x1011   : > { %4171 = vmatpush3.bf16.msra.mxu1 %v2741_v18 }
0x1016   : > { %v4751_v59 = vpop.eup %4750 }
0x1017   : > { %v2711_v15 = vsel %vm829_vm5, %v4751_v59, 0.0 }
0x1018   : > { %2712 = vadd.xlane.f32.xlu0 %v2711_v15 }
0x101a   : > { %v4753_v51 = vpop.eup %4752 }
0x101b   : > { %v2705_v0 = vsel %vm829_vm5, %v4753_v51, 0.0 }
0x1021   : > { %2706 = vadd.xlane.f32.xlu1 %v2705_v0 }
0x102e   : > { %2831 = vrot.lane.b32.xlu0 %v5303_v38, %s5026_s18 }
0x1032   : > { %2823 = vrot.lane.b32.xlu0 %v5305_v39, %s5026_s18  ;;  %2837 = vrot.lane.b32.xlu1 %v5329_v13, %s5026_s18 }
0x1036   : > { %2827 = vrot.lane.b32.xlu0 %v5323_v1, %s5026_s18  ;;  %2825 = vrot.lane.b32.xlu1 %v5315_v52, %s5026_s18 }
0x103a   : > { %2829 = vrot.lane.b32.xlu1 %v5331_v14, %s5026_s18 }
0x1069   : > { %v2698_v54 = vpop.xlane.xlu0 %2697 }
0x106d   : > { %v2692_v37 = vpop.xlane.xlu0 %2691 }
0x1071   : > { %v2701_v44 = vpop.xlane.xlu1 %2700 }
0x1072   : > { %4754 = vrcp.f32 %v2701_v44 }
0x1073   : > { %4756 = vrcp.f32 %v2692_v37 }
0x1074   : > { %4758 = vrcp.f32 %v2698_v54 }
0x1075   : > { %v2695_v38 = vpop.xlane.xlu1 %2694  ;;  %v2710_v12 = vpop.xlane.xlu0 %2709 }
0x1076   : > { %4760 = vrcp.f32 %v2695_v38 }
0x1079   : > { %v2704_v32 = vpop.xlane.xlu0 %2703  ;;  %v2834_v7 = vpop.permute.xlu1 %2833 }
0x107c   : > { %v4755_v39 = vpop.eup %4754 }
0x107d   : > { %v4757_v2 = vpop.eup %4756  ;;  %v2725_v28 = vmul.f32 %v4755_v39, %v4743_v50  ;;  %v2836_v11 = vpop.permute.xlu1 %2835 }
0x107e   : > { %v4759_v13 = vpop.eup %4758  ;;  %v2722_v1 = vmul.f32 %v4757_v2, %v6316_v31  ;;  %v2855_v31 = vsel %vm723_vm0, %v2834_v7, 0  ;;  %v2858_v54 = vsel %vm723_vm0, %v2836_v11, 0 }
0x107f   : > { %v2724_v52 = vmul.f32 %v4759_v13, %v6312_v10 }
0x1080   : > { %v4761_v62 = vpop.eup %4760 }
0x1081   : > { %v2723_v63 = vmul.f32 %v4761_v62, %v4745_v26  ;;  %v2731_v14 = vpack.c.bf16 %v2725_v28, %v2724_v52 }
0x1083   : > { %v2730_v41 = vpack.c.bf16 %v2723_v63, %v2722_v1 }
0x1085   : > { %4172 = vmatprep.mubr.msk.bf16.mxu1 %vm829_vm5, %v2730_v41 }
0x1086   : > { %4173 = vmatmul.mubr.msk.bf16.vlgmr.msra.gmra.mrb[64].mxu1 %vm829_vm5, %v2731_v14 }
0x10a5   : > { %v2713_v17 = vpop.xlane.xlu0 %2712 }
0x10a6   : > { %4762 = vrcp.f32 %v2713_v17 }
0x10a7   : > { %4764 = vrcp.f32 %v2704_v32 }
0x10a8   : > { %4766 = vrcp.f32 %v2710_v12 }
0x10a9   : > { %v2832_v25 = vpop.permute.xlu0 %2831 }
0x10aa   : > { %v2852_v42 = vsel %vm723_vm0, %v2832_v25, 0  ;;  %4264 = vmatprep.subr.msk.bf16.mxu1 %vm723_vm0, %v2832_v25 }
0x10ab   : > { %4181 = vmatpush3.bf16.xpose.msra.mxu1 %v2852_v42 }
0x10ac   : > { %4265 = vmatprep.subr.msk.bf16.mxu1 %vm723_vm0, %v2834_v7 }
0x10ad   : > { %v2824_v62 = vpop.permute.xlu0 %2823 }
0x10ae   : > { %v2707_v10 = vpop.xlane.xlu1 %2706 }
0x10af   : > { %4768 = vrcp.f32 %v2707_v10 }
0x10b0   : > { %v4763_v50 = vpop.eup %4762 }
0x10b1   : > { %v4765_v26 = vpop.eup %4764  ;;  %v2729_v0 = vmul.f32 %v4763_v50, %v4751_v59 }
0x10b2   : > { %v4767_v18 = vpop.eup %4766  ;;  %v2726_v44 = vmul.f32 %v4765_v26, %v6326_v21  ;;  %v2838_v38 = vpop.permute.xlu1 %2837 }
0x10b3   : > { %4183 = vmatpush3.bf16.xpose.msra.mxu1 %v2855_v31  ;;  %v2728_v39 = vmul.f32 %v4767_v18, %v6321_v43  ;;  %v2861_v59 = vsel %vm723_vm0, %v2838_v38, 0 }
0x10b4   : > { %4266 = vmatprep.subr.msk.bf16.mxu1 %vm723_vm0, %v2836_v11 }
0x10b5   : > { %v2733_v13 = vpack.c.bf16 %v2729_v0, %v2728_v39 }
0x10b6   : > { %v2826_v21 = vpop.permute.xlu1 %2825 }
0x10b9   : > { %v4769_v15 = vpop.eup %4768 }
0x10ba   : > { %v2727_v37 = vmul.f32 %v4769_v15, %v4753_v51  ;;  %v2828_v51 = vpop.permute.xlu0 %2827  ;;  %v2830_v43 = vpop.permute.xlu1 %2829 }
0x10bb   : > { %4185 = vmatpush3.bf16.xpose.msra.mxu1 %v2858_v54 }
0x10bc   : > { %4267 = vmatprep.subr.msk.bf16.mxu1 %vm723_vm0, %v2838_v38  ;;  %v2732_v2 = vpack.c.bf16 %v2727_v37, %v2726_v44 }
0x10be   : > { %4176 = vmatprep.mubr.msk.bf16.mxu1 %vm829_vm5, %v2732_v2 }
0x10bf   : > { %4177 = vmatmul.mubr.msk.bf16.gmra.mrb[68].mxu1 %vm829_vm5, %v2733_v13 }
0x10c0   : > { %4188 = vmatprep.mubr.msk.bf16.mxu1 %vm723_vm0, %v2824_v62 }
0x10c3   : > { %4187 = vmatpush3.bf16.xpose.msra.mxu1 %v2861_v59 }
0x10ca   : > { %4189 = vmatmul.mubr.msk.bf16.vlgmr.msra.gmra.mrb[72].mxu1 %vm723_vm0, %v2826_v21 }
0x10cb   : > { %4192 = vmatprep.mubr.msk.bf16.mxu1 %vm723_vm0, %v2828_v51 }
0x10d2   : > { %4193 = vmatmul.mubr.msk.bf16.gmra.mrb[76].mxu1 %vm723_vm0, %v2830_v43 }
0x1159   : > { %v6370_v28 = vpop.f32.mrb[64].mxu1 }
0x115a   : > { %v6372_v1 = vpop.f32.mrb[65].mxu1 }
0x115b   : > { %v6374_v63 = vpop.f32.mrb[66].mxu1 }
0x115c   : > { %v4417_v52 = vpack.i.bf16 %v6374_v63, %v6370_v28  ;;  %v6378_v41 = vpop.f32.mrb[67].mxu1  ;;  %v6871_v63 = vld [vmem:[#allocation49_spill] sm:$0xff] }
0x115d   : > { %v4412_v14 = vpack.i.bf16 %v6378_v41, %v6372_v1  ;;  %v6835_v1 = vld [vmem:[#allocation36_spill] sm:$0xff] }
0x1192   : > { %v6382_v12 = vpop.f32.mrb[68].mxu1 }
0x1193   : > { %v6384_v32 = vpop.f32.mrb[69].mxu1 }
0x1194   : > { %v6386_v7 = vpop.f32.mrb[70].mxu1 }
0x1195   : > { %v4487_v17 = vpack.i.bf16 %v6386_v7, %v6382_v12  ;;  %v6390_v25 = vpop.f32.mrb[71].mxu1 }
0x1196   : > { %v4482_v11 = vpack.i.bf16 %v6390_v25, %v6384_v32 }
0x119d   : > { %v4190_v42 = vpop.f32.mrb[72].mxu1 }
0x119e   : > { %v2897_v10 = vpop.f32.mrb[73].mxu1  ;;  %v2930_v31 = vmul.f32 %v6258_v16, %v4190_v42 }
0x119f   : > { %v2928_v50 = vmul.f32 %v6261_v5, %v2897_v10  ;;  %v4191_v26 = vpop.f32.mrb[74].mxu1 }
0x11a0   : > { %v2900_v18 = vpop.f32.mrb[75].mxu1  ;;  %v2938_v54 = vadd.f32 %v2930_v31, %v5357_v34  ;;  %v2931_v44 = vmul.f32 %v6269_v22, %v4191_v26 }
0x11a1   : > { %v2936_v15 = vadd.f32 %v2928_v50, %v5361_v35  ;;  %v2929_v0 = vmul.f32 %v6265_v36, %v2900_v18 }
0x11a2   : > { %v2939_v2 = vadd.f32 %v2931_v44, %v5364_v40  ;;  %v2950_v36 = vsel %vm829_vm5, %v2938_v54, -inf }
0x11a3   : > { %v2937_v37 = vadd.f32 %v2929_v0, %v5370_v45  ;;  %v2944_v38 = vsel %vm829_vm5, %v2936_v15, -inf }
0x11a4   : > { %2945 = vmax.xlane.f32.xlu0 %v2944_v38  ;;  %v2953_v40 = vsel %vm829_vm5, %v2939_v2, -inf }
0x11a5   : > { %v4194_v39 = vpop.f32.mrb[76].mxu1  ;;  %v2947_v16 = vsel %vm829_vm5, %v2937_v37, -inf }
0x11a6   : > { %2948 = vmax.xlane.f32.xlu1 %v2947_v16  ;;  %v2913_v5 = vpop.f32.mrb[77].mxu1  ;;  %v2934_v62 = vmul.f32 %v6276_v23, %v4194_v39 }
0x11a7   : > { %v2932_v35 = vmul.f32 %v6281_v19, %v2913_v5  ;;  %v4195_v13 = vpop.f32.mrb[78].mxu1 }
0x11a8   : > { %2951 = vmax.xlane.f32.xlu0 %v2950_v36  ;;  %v2916_v34 = vpop.f32.mrb[79].mxu1  ;;  %v2935_v22 = vmul.f32 %v6294_v30, %v4195_v13  ;;  %v2942_v30 = vadd.f32 %v2934_v62, %v5397_v6 }
0x11a9   : > { %v2933_v45 = vmul.f32 %v6300_v46, %v2916_v34  ;;  %v2940_v59 = vadd.f32 %v2932_v35, %v5388_v60 }
0x11aa   : > { %v2943_v19 = vadd.f32 %v2935_v22, %v5394_v3  ;;  %v2962_v60 = vsel %vm829_vm5, %v2942_v30, -inf }
0x11ab   : > { %v6411_v21 = vadd.f32 %v2933_v45, %v5403_v9  ;;  %v2956_v46 = vsel %vm829_vm5, %v2940_v59, -inf }
0x11ac   : > { %2954 = vmax.xlane.f32.xlu0 %v2953_v40  ;;  %v2965_v23 = vsel %vm829_vm5, %v2943_v19, -inf }
0x11ad   : > { %v2959_v51 = vsel %vm829_vm5, %v6411_v21, -inf }
0x11ae   : > { %2960 = vmax.xlane.f32.xlu1 %v2959_v51 }
0x11b0   : > { %2957 = vmax.xlane.f32.xlu0 %v2956_v46 }
0x11b2   : > { %2966 = vmax.xlane.f32.xlu1 %v2965_v23  ;;  %v6826_v23 = vpack.i.bf16 %v5842_v56, %v5836_v4  ;;  %v6829_v4 = vpack.i.bf16 %v6122_v29, %v6116_v61  ;;  %v6830_v56 = vpack.i.bf16 %v6242_v53, %v6236_v20  ;;  %v6832_v29 = vld [vmem:[#allocation31_spill] sm:$0xff]  ;;  %v6834_v53 = vld [vmem:[#allocation38_spill] sm:$0xff] }
0x11b3   : > { %v6833_v20 = vpack.i.bf16 %v5878_v48, %v6832_v29  ;;  %v6836_v41 = vpack.i.bf16 %v6834_v53, %v6835_v1  ;;  %v6844_v48 = vld [vmem:[#allocation25_spill] sm:$0xff] }
0x11b4   : > { %2963 = vmax.xlane.f32.xlu0 %v2962_v60 }
0x1231   : > { %v2946_v9 = vpop.xlane.xlu0 %2945 }
0x1232   : > { %v2968_v43 = vsub.f32 %v2936_v15, %v2946_v9  ;;  %v6827_v9 = vpack.i.bf16 %v5866_v57, %v5860_v47 }
0x1233   : > { %v2949_v42 = vpop.xlane.xlu1 %2948 }
0x1234   : > { %v2976_v31 = vmul.f32 1.442695, %v2968_v43  ;;  %v2969_v50 = vsub.f32 %v2937_v37, %v2949_v42 }
0x1235   : > { %v2952_v10 = vpop.xlane.xlu0 %2951 }
0x1236   : > { %v2970_v3 = vsub.f32 %v2938_v54, %v2952_v10  ;;  %v2978_v0 = vmul.f32 1.442695, %v2969_v50  ;;  %v6843_v10 = vld [vmem:[#allocation15_spill] sm:$0xff]  ;;  %v6847_v50 = vld [vmem:[#allocation29_spill] sm:$0xff] }
0x1238   : > { %v2980_v26 = vmul.f32 1.442695, %v2970_v3  ;;  %v6845_v3 = vld [vmem:[#allocation24_spill] sm:$0xff] }
0x1239   : > { %v2955_v18 = vpop.xlane.xlu0 %2954 }
0x123a   : > { %4770 = vpow2.f32 %v2980_v26  ;;  %v2971_v6 = vsub.f32 %v2939_v2, %v2955_v18  ;;  %v6848_v26 = vld [vmem:[#allocation28_spill] sm:$0xff] }
0x123b   : > { %4772 = vpow2.f32 %v2976_v31  ;;  %v6846_v31 = vpack.i.bf16 %v6844_v48, %v6845_v3  ;;  %v6849_v18 = vpack.i.bf16 %v6847_v50, %v6848_v26 }
0x123c   : > { %v2982_v44 = vmul.f32 1.442695, %v2971_v6  ;;  %v6850_v6 = vld [vmem:[#allocation34_spill] sm:$0xff] }
0x123d   : > { %v2958_v38 = vpop.xlane.xlu0 %2957 }
0x123e   : > { %4774 = vpow2.f32 %v2982_v44  ;;  %v2972_v39 = vsub.f32 %v2940_v59, %v2958_v38  ;;  %v6853_v38 = vld [vmem:[#allocation40_spill] sm:$0xff] }
0x123f   : > { %4776 = vpow2.f32 %v2978_v0  ;;  %v6851_v0 = vld [vmem:[#allocation33_spill] sm:$0xff] }
0x1240   : > { %v2984_v15 = vmul.f32 1.442695, %v2972_v39  ;;  %v6852_v44 = vpack.i.bf16 %v6850_v6, %v6851_v0  ;;  %v6854_v39 = vld [vmem:[#allocation39_spill] sm:$0xff] }
0x1241   : > { %v2964_v16 = vpop.xlane.xlu0 %2963 }
0x1242   : > { %v2974_v5 = vsub.f32 %v2942_v30, %v2964_v16  ;;  %v2961_v30 = vpop.xlane.xlu1 %2960  ;;  %v6855_v16 = vpack.i.bf16 %v6853_v38, %v6854_v39  ;;  %v4539_v38 = vld [vmem:[#allocation7 + $0x8] sm:$0xff]   ;;  %v4540_v39 = vld [vmem:[#allocation7 + $0x10] sm:$0xff]  }
0x1244   : > { %v6421_v35 = vpop.eup %4770  ;;  %v2988_v13 = vmul.f32 1.442695, %v2974_v5  ;;  %v6856_v5 = vld [vmem:[#allocation46_spill] sm:$0xff] }
0x1245   : > { %v2998_v54 = vsel %vm829_vm5, %v6421_v35, 0.0  ;;  %v6425_v37 = vpop.eup %4772 }
0x1246   : > { %4778 = vpow2.f32 %v2988_v13  ;;  %2999 = vadd.xlane.f32.xlu0 %v2998_v54  ;;  %v2992_v36 = vsel %vm829_vm5, %v6425_v37, 0.0  ;;  %v2967_v46 = vpop.xlane.xlu1 %2966  ;;  %v6859_v54 = vld [vmem:[#allocation27_spill] sm:$0xff] }
0x1247   : > { %4780 = vpow2.f32 %v2984_v15  ;;  %v2975_v60 = vsub.f32 %v2943_v19, %v2967_v46  ;;  %v6857_v15 = vld [vmem:[#allocation45_spill] sm:$0xff]  ;;  %v6866_v46 = vld [vmem:[#allocation35_spill] sm:$0xff] }
0x1248   : > { %v6427_v2 = vpop.eup %4774  ;;  %v6858_v13 = vpack.i.bf16 %v6856_v5, %v6857_v15 }
0x1249   : > { %v3001_v34 = vsel %vm829_vm5, %v6427_v2, 0.0  ;;  %v6433_v22 = vpop.eup %4776  ;;  %v2990_v43 = vmul.f32 1.442695, %v2975_v60  ;;  %v6868_v60 = vld [vmem:[#allocation43_spill] sm:$0xff] }
0x124a   : > { %2993 = vadd.xlane.f32.xlu0 %v2992_v36  ;;  %3002 = vadd.xlane.f32.xlu1 %v3001_v34  ;;  %v2995_v45 = vsel %vm829_vm5, %v6433_v22, 0.0  ;;  %v6860_v36 = vld [vmem:[#allocation26_spill] sm:$0xff] }
0x124b   : > { %4782 = vpow2.f32 %v2990_v43  ;;  %v6861_v34 = vpack.i.bf16 %v6859_v54, %v6860_v36 }
0x124e   : > { %2996 = vadd.xlane.f32.xlu1 %v2995_v45  ;;  %v6862_v45 = vld [vmem:[#allocation32_spill] sm:$0xff] }
0x1250   : > { %v6437_v62 = vpop.eup %4778 }
0x1251   : > { %v3010_v59 = vsel %vm829_vm5, %v6437_v62, 0.0  ;;  %v6441_v40 = vpop.eup %4780 }
0x1252   : > { %3011 = vadd.xlane.f32.xlu0 %v3010_v59  ;;  %v3004_v51 = vsel %vm829_vm5, %v6441_v40, 0.0  ;;  %v6863_v59 = vld [vmem:[#allocation30_spill] sm:$0xff] }
0x1255   : > { %v6472_v47 = vpop.eup %4782 }
0x1256   : > { %3005 = vadd.xlane.f32.xlu0 %v3004_v51  ;;  %v3013_v57 = vsel %vm829_vm5, %v6472_v47, 0.0  ;;  %v6864_v51 = vpack.i.bf16 %v6862_v45, %v6863_v59 }
0x125f   : > { %3038 = vrot.lane.b32.xlu1 %v5432_v55, %s5026_s18  ;;  %v2973_v55 = vsub.f32 %v6411_v21, %v2961_v30  ;;  %v6838_v21 = vld [vmem:[#allocation42_spill] sm:$0xff]  ;;  %v6865_v30 = vld [vmem:[#allocation37_spill] sm:$0xff] }
0x1263   : > { %3040 = vrot.lane.b32.xlu1 %v5454_v33, %s5026_s18  ;;  %v6828_v33 = vpack.i.bf16 %v6002_v49, %v5996_v27  ;;  %v6831_v49 = vpack.i.bf16 %v5854_v8, %v5848_v58  ;;  %v6840_v58 = vld [vmem:[#allocation50_spill] sm:$0xff]  ;;  %v6841_v8 = vld [vmem:[#allocation48_spill] sm:$0xff] }
0x1264   : > { %v6842_v42 = vpack.i.bf16 %v6840_v58, %v6841_v8 }
0x126c   : > { %3036 = vrot.lane.b32.xlu0 %v5436_v24, %s5026_s18  ;;  %v2986_v24 = vmul.f32 1.442695, %v2973_v55 }
0x126e   : > { %4784 = vpow2.f32 %v2986_v24 }
0x1270   : > { %4363 = vrot.lane.b32.xlu0 %v6826_v23, %s5026_s18  ;;  %v6867_v23 = vpack.i.bf16 %v6865_v30, %v6866_v46 }
0x1274   : > { %4373 = vrot.lane.b32.xlu0 %v6827_v9, %s5025_s13  ;;  %v6869_v9 = vld [vmem:[#allocation41_spill] sm:$0xff] }
0x1275   : > { %v6870_v28 = vpack.i.bf16 %v6868_v60, %v6869_v9 }
0x1278   : > { %4383 = vrot.lane.b32.xlu0 %v6828_v33, %s5024_s9  ;;  %v6480_v27 = vpop.eup %4784 }
0x1279   : > { %v3007_v61 = vsel %vm829_vm5, %v6480_v27, 0.0 }
0x127c   : > { %4393 = vrot.lane.b32.xlu0 %v6829_v4, %s5023_s30 }
0x1280   : > { %4403 = vrot.lane.b32.xlu0 %v6830_v56, %s5022_s26 }
0x1284   : > { %4413 = vrot.lane.b32.xlu0 %v4412_v14, %s5021_s20  ;;  %v6837_v14 = vld [vmem:[#allocation44_spill] sm:$0xff] }
0x1285   : > { %v6839_v19 = vpack.i.bf16 %v6837_v14, %v6838_v21 }
0x1287   : > { %3014 = vadd.xlane.f32.xlu1 %v3013_v57 }
0x1288   : > { %4423 = vrot.lane.b32.xlu0 %v6831_v49, %s5026_s18 }
0x128b   : > { %3008 = vadd.xlane.f32.xlu1 %v3007_v61 }
0x128c   : > { %4433 = vrot.lane.b32.xlu0 %v6833_v20, %s5025_s13 }
0x1290   : > { %4443 = vrot.lane.b32.xlu0 %v6836_v41, %s5024_s9 }
0x1294   : > { %4453 = vrot.lane.b32.xlu0 %v6839_v19, %s5023_s30 }
0x1298   : > { %4463 = vrot.lane.b32.xlu0 %v6842_v42, %s5022_s26 }
0x129c   : > { %3042 = vrot.lane.b32.xlu1 %v6843_v10, %s5026_s18 }
0x12a0   : > { %4368 = vrot.lane.b32.xlu1 %v6846_v31, %s5026_s18 }
0x12a4   : > { %4378 = vrot.lane.b32.xlu1 %v6849_v18, %s5025_s13 }
0x12a8   : > { %4388 = vrot.lane.b32.xlu1 %v6852_v44, %s5024_s9 }
0x12ac   : > { %4398 = vrot.lane.b32.xlu1 %v6855_v16, %s5023_s30  ;;  %v4545_v16 = vld [vmem:[#allocation7 + $0x38] sm:$0xff]  }
0x12b0   : > { %4408 = vrot.lane.b32.xlu1 %v6858_v13, %s5022_s26 }
0x12b4   : > { %4418 = vrot.lane.b32.xlu1 %v4417_v52, %s5021_s20  ;;  %v6872_v52 = vld [vmem:[#allocation47_spill] sm:$0xff] }
0x12b5   : > { %v6873_v55 = vpack.i.bf16 %v6871_v63, %v6872_v52 }
0x12b8   : > { %4428 = vrot.lane.b32.xlu1 %v6861_v34, %s5026_s18 }
0x12bc   : > { %4438 = vrot.lane.b32.xlu1 %v6864_v51, %s5025_s13 }
0x12c0   : > { %4448 = vrot.lane.b32.xlu1 %v6867_v23, %s5024_s9 }
0x12c4   : > { %4458 = vrot.lane.b32.xlu1 %v6870_v28, %s5023_s30  ;;  %s5027_s30 = smov [#allocation10]  }
0x12c5   : > { %s4936_s9 = sshll.u32 %s5027_s30, 4  ;;  %s4937_s9 = int_to_ptr.vmem [resolvable:$false] %s4936_s9 }
0x12c6   : > { %s4938_s13 = scalar_lea.vmem %s4937_s9, 2048  ;;  %p4939_p12 = scmp.lt.s32.totalorder %s6689_s8, %s4937_s9 }
0x12c8   : > { %4468 = vrot.lane.b32.xlu1 %v6873_v55, %s5022_s26  ;;  %s4932_s26 = scalar_lea.vmem %s6689_s8, 1024 }
0x12c9   : > { %p4933_p10 = scmp.ne.s32.totalorder %s6689_s8, %s4932_s26  ;;  %p4940_p2 = scmp.lt.s32.totalorder %s4938_s13, %s4932_s26 }
0x12cb   : > { %p4934_p3 = pnand %p4933_p10, %p5210_p5  ;;  %p4941_p1 = por %p4940_p2, %p4939_p12 }
0x12cd   : > { %p4935_p7 = pneg %p4934_p3 }
0x12cf   : > { %p4942_p4 = pnand %p4941_p1, %p4935_p7 }
0x12d3   : > { %v3000_v43 = vpop.xlane.xlu0 %2999 }
0x12d7   : > { %v2994_v33 = vpop.xlane.xlu0 %2993  ;;  %v3003_v24 = vpop.xlane.xlu1 %3002 }
0x12d8   : > { %4786 = vrcp.f32 %v2994_v33 }
0x12db   : > { %v2997_v4 = vpop.xlane.xlu1 %2996 }
0x12dc   : > { %4788 = vrcp.f32 %v2997_v4 }
0x12dd   : > { %4790 = vrcp.f32 %v3003_v24 }
0x12de   : > { %4792 = vrcp.f32 %v3000_v43 }
0x12df   : > { %v3012_v56 = vpop.xlane.xlu0 %3011  ;;  %v3039_v29 = vpop.permute.xlu1 %3038 }
0x12e2   : > { %v4787_v49 = vpop.eup %4786 }
0x12e3   : > { %v3006_v57 = vpop.xlane.xlu0 %3005  ;;  %v3024_v53 = vmul.f32 %v4787_v49, %v6425_v37  ;;  %v3041_v14 = vpop.permute.xlu1 %3040 }
0x12e6   : > { %v4789_v61 = vpop.eup %4788 }
0x12e7   : > { %v3037_v20 = vpop.permute.xlu0 %3036  ;;  %v3025_v1 = vmul.f32 %v4789_v61, %v6433_v22  ;;  %v4791_v19 = vpop.eup %4790 }
0x12e8   : > { %4196 = vmatprep.subr.bf16.mxu0 %v3037_v20  ;;  %v4793_v22 = vpop.eup %4792  ;;  %v3027_v58 = vmul.f32 %v4791_v19, %v6427_v2 }
0x12e9   : > { %4197 = vmatpush3.bf16.msra.mxu0 %v3037_v20  ;;  %v3032_v41 = vpack.c.bf16 %v3025_v1, %v3024_v53  ;;  %v3026_v42 = vmul.f32 %v4793_v22, %v6421_v35  ;;  %v4538_v35 = vld [vmem:[#allocation7] sm:$0xff]  }
0x12ea   : > { %4198 = vmatprep.subr.bf16.mxu0 %v3039_v29 }
0x12eb   : > { %4204 = vmatprep.mubr.msk.bf16.mxu0 %vm829_vm5, %v3032_v41  ;;  %v3033_v10 = vpack.c.bf16 %v3027_v58, %v3026_v42  ;;  %v4364_v60 = vpop.permute.xlu0 %4363 }
0x12ed   : > { %4199 = vmatpush3.bf16.msra.mxu0 %v3039_v29 }
0x12ee   : > { %4200 = vmatprep.subr.bf16.mxu0 %v3041_v14 }
0x12ef   : > { %v4374_v28 = vpop.permute.xlu0 %4373 }
0x12f0   : > { %v4376_v49 = vunpack.i.h.bf16 %v4374_v28  ;;  %v4375_v61 = vunpack.i.l.bf16 %v4374_v28 }
0x12f1   : > { %4201 = vmatpush3.bf16.msra.mxu0 %v3041_v14 }
0x12f3   : > { %v4384_v7 = vpop.permute.xlu0 %4383 }
0x12f4   : > { %v4386_v29 = vunpack.i.h.bf16 %v4384_v7  ;;  %v4385_v20 = vunpack.i.l.bf16 %v4384_v7 }
0x12f7   : > { %v4394_v63 = vpop.permute.xlu0 %4393 }
0x12f8   : > { %v4396_v53 = vunpack.i.h.bf16 %v4394_v63  ;;  %v4395_v1 = vunpack.i.l.bf16 %v4394_v63 }
0x12fb   : > { %v4404_v25 = vpop.permute.xlu0 %4403 }
0x12fc   : > { %v4406_v58 = vunpack.i.h.bf16 %v4404_v25 }
0x12ff   : > { %v4414_v52 = vpop.permute.xlu0 %4413 }
0x1303   : > { %v4424_v43 = vpop.permute.xlu0 %4423 }
0x1307   : > { %v4434_v24 = vpop.permute.xlu0 %4433 }
0x130b   : > { %v4444_v41 = vpop.permute.xlu0 %4443 }
0x1314   : > { %v3015_v21 = vpop.xlane.xlu1 %3014 }
0x1315   : > { %4794 = vrcp.f32 %v3015_v21  ;;  %v6874_v21 = vld [vmem:[#allocation19_spill] sm:$0xff] }
0x1316   : > { %4796 = vrcp.f32 %v3006_v57  ;;  %v4365_v57 = vunpack.i.l.bf16 %v4364_v60 }
0x1317   : > { %4798 = vrcp.f32 %v3012_v56  ;;  %v4366_v56 = vunpack.i.h.bf16 %v4364_v60 }
0x1318   : > { %v3009_v37 = vpop.xlane.xlu1 %3008 }
0x1319   : > { %4800 = vrcp.f32 %v3009_v37  ;;  %v3350_v19 = vsel %vm723_vm0, %v6874_v21, %v4366_v56  ;;  %v6875_v37 = vld [vmem:[#allocation17_spill] sm:$0xff] }
0x131a   : > { %v3349_v22 = vsel %vm723_vm0, %v6875_v37, %v4365_v57 }
0x131b   : > { %v3358_v42 = vsel %vm3357_vm10, %v3349_v22, %v4375_v61 }
0x131c   : > { %v3043_v8 = vpop.permute.xlu1 %3042 }
0x131d   : > { %4202 = vmatprep.subr.bf16.mxu0 %v3043_v8 }
0x131e   : > { %4203 = vmatpush3.bf16.msra.mxu0 %v3043_v8  ;;  %v4405_v8 = vunpack.i.l.bf16 %v4404_v25  ;;  %v6878_v25 = vld [vmem:[#allocation18_spill] sm:$0xff] }
0x131f   : > { %v4795_v48 = vpop.eup %4794  ;;  %4212 = vmatprep.subr.bf16.mxu0 %v4538_v35 }
0x1320   : > { %v4797_v3 = vpop.eup %4796  ;;  %v3031_v26 = vmul.f32 %v4795_v48, %v6472_v47  ;;  %v4541_v47 = vld [vmem:[#allocation7 + $0x18] sm:$0xff]   ;;  %v6574_v9 = vpop.permute.xlu1 %4368  ;;  %v4416_v48 = vunpack.i.h.bf16 %v4414_v52 }
0x1321   : > { %4205 = vmatmul.mubr.msk.bf16.vlgmr.msra.gmra.mrb[64].mxu0 %vm829_vm5, %v3033_v10  ;;  %v4799_v31 = vpop.eup %4798  ;;  %v3028_v18 = vmul.f32 %v4797_v3, %v6441_v40  ;;  %v4542_v40 = vld [vmem:[#allocation7 + $0x20] sm:$0xff]   ;;  %v3359_v10 = vsel %vm3357_vm10, %v3350_v19, %v4376_v49  ;;  %v4415_v3 = vunpack.i.l.bf16 %v4414_v52 }
0x1322   : > { %v3030_v2 = vmul.f32 %v4799_v31, %v6437_v62  ;;  %4213 = vmatpush3.bf16.msra.mxu0 %v4538_v35  ;;  %v4543_v62 = vld [vmem:[#allocation7 + $0x28] sm:$0xff]   ;;  %v3367_v31 = vsel %vm3366_vm11, %v3358_v42, %v4385_v20 }
0x1323   : > { %v4801_v50 = vpop.eup %4800  ;;  %4214 = vmatprep.subr.bf16.mxu0 %v4539_v38 }
0x1324   : > { %v3029_v6 = vmul.f32 %v4801_v50, %v6480_v27  ;;  %v3035_v44 = vpack.c.bf16 %v3031_v26, %v3030_v2  ;;  %v4544_v27 = vld [vmem:[#allocation7 + $0x30] sm:$0xff]   ;;  %v6576_v12 = vpop.permute.xlu1 %4378  ;;  %v3368_v50 = vsel %vm3366_vm11, %v3359_v10, %v4386_v29  ;;  %v4426_v26 = vunpack.i.h.bf16 %v4424_v43 }
0x1325   : > { %v3376_v2 = vsel %vm829_vm5, %v3368_v50, %v4396_v53 }
0x1326   : > { %v3034_v0 = vpack.c.bf16 %v3029_v6, %v3028_v18  ;;  %4215 = vmatpush3.bf16.msra.mxu0 %v4539_v38  ;;  %v4425_v18 = vunpack.i.l.bf16 %v4424_v43  ;;  %v3375_v6 = vsel %vm829_vm5, %v3367_v31, %v4395_v1  ;;  %v3385_v38 = vsel %vm3383_vm12, %v3376_v2, %v4406_v58  ;;  %v6879_v43 = vld [vmem:[#allocation16_spill] sm:$0xff]  ;;  %v6880_v31 = vld [vmem:[#allocation22_spill] sm:$0xff] }
0x1327   : > { %4216 = vmatprep.subr.bf16.mxu0 %v4540_v39  ;;  %v3384_v35 = vsel %vm3383_vm12, %v3375_v6, %v4405_v8 }
0x1328   : > { %4208 = vmatprep.mubr.msk.bf16.mxu0 %vm829_vm5, %v3034_v0  ;;  %v4436_v0 = vunpack.i.h.bf16 %v4434_v24 }
0x1329   : > { %4209 = vmatmul.mubr.msk.bf16.gmra.mrb[68].mxu0 %vm829_vm5, %v3035_v44  ;;  %v4435_v44 = vunpack.i.l.bf16 %v4434_v24 }
0x132a   : > { %4217 = vmatpush3.bf16.msra.mxu0 %v4540_v39  ;;  %v4445_v39 = vunpack.i.l.bf16 %v4444_v41 }
0x132b   : > { %4218 = vmatprep.subr.bf16.mxu0 %v4541_v47 }
0x132e   : > { %4219 = vmatpush3.bf16.msra.mxu0 %v4541_v47  ;;  %v6605_v47 = vsel %vm3392_vm13, %v3384_v35, %v4415_v3 }
0x132f   : > { %4220 = vmatprep.subr.bf16.mxu0 %v4542_v40 }
0x1332   : > { %4221 = vmatpush3.bf16.msra.mxu0 %v4542_v40  ;;  %v6608_v40 = vsel %vm3392_vm13, %v3385_v38, %v4416_v48 }
0x1333   : > { %4222 = vmatprep.subr.bf16.mxu0 %v4543_v62 }
0x1336   : > { %4223 = vmatpush3.bf16.msra.mxu0 %v4543_v62  ;;  %v4454_v62 = vpop.permute.xlu0 %4453 }
0x1337   : > { %4224 = vmatprep.subr.bf16.mxu0 %v4544_v27  ;;  %v4456_v28 = vunpack.i.h.bf16 %v4454_v62  ;;  %v4455_v7 = vunpack.i.l.bf16 %v4454_v62 }
0x133a   : > { %4225 = vmatpush3.bf16.msra.mxu0 %v4544_v27  ;;  %v4464_v57 = vpop.permute.xlu0 %4463 }
0x133b   : > { %4226 = vmatprep.subr.bf16.mxu0 %v4545_v16  ;;  %v4466_v22 = vunpack.i.h.bf16 %v4464_v57  ;;  %v4465_v58 = vunpack.i.l.bf16 %v4464_v57 }
0x133e   : > { %4227 = vmatpush3.bf16.msra.mxu0 %v4545_v16  ;;  %v6876_v16 = vld [vmem:[#allocation23_spill] sm:$0xff] }
0x13f4   : > { %v4206_v5 = vpop.f32.mrb[64].mxu0 }
0x13f5   : > { %v3094_v15 = vpop.f32.mrb[65].mxu0 }
0x13f6   : > { %v4207_v13 = vpop.f32.mrb[66].mxu0 }
0x13f7   : > { %v4472_v54 = vpack.i.bf16 %v4207_v13, %v4206_v5  ;;  %v3097_v36 = vpop.f32.mrb[67].mxu0  ;;  %v3354_v5 = vsel %vm723_vm0, %v6876_v16, %v4426_v26 }
0x13f8   : > { %v4477_v34 = vpack.i.bf16 %v3097_v36, %v3094_v15  ;;  %v6877_v15 = vld [vmem:[#allocation21_spill] sm:$0xff]  ;;  %v4370_v36 = vunpack.i.l.bf16 %v6574_v9 }
0x13f9   : > { %4473 = vrot.lane.b32.xlu1 %v4472_v54, %s5020_s19  ;;  %v3353_v13 = vsel %vm723_vm0, %v6877_v15, %v4425_v18  ;;  %v4371_v54 = vunpack.i.h.bf16 %v6574_v9 }
0x13fa   : > { %4478 = vrot.lane.b32.xlu0 %v4477_v34, %s5020_s19  ;;  %v3362_v34 = vsel %vm3357_vm10, %v3353_v13, %v4435_v44  ;;  %v3351_v24 = vsel %vm723_vm0, %v6879_v43, %v4370_v36  ;;  %v6881_v36 = vld [vmem:[#allocation20_spill] sm:$0xff] }
0x13fb   : > { %v3352_v52 = vsel %vm723_vm0, %v6878_v25, %v4371_v54 }
0x13fc   : > { %v4210_v45 = vpop.f32.mrb[68].mxu0 }
0x13fd   : > { %4488 = vrot.lane.b32.xlu1 %v4487_v17, %s5021_s20  ;;  %v3110_v59 = vpop.f32.mrb[69].mxu0  ;;  %v6578_v17 = vpop.permute.xlu1 %4388 }
0x13fe   : > { %4483 = vrot.lane.b32.xlu0 %v4482_v11, %s5021_s20  ;;  %v4211_v51 = vpop.f32.mrb[70].mxu0  ;;  %v4390_v60 = vunpack.i.l.bf16 %v6578_v17  ;;  %s6694_s20 = scalar_lea.hbm %s6744_s6, %s3779_s27 }
0x13ff   : > { %v4497_v30 = vpack.i.bf16 %v4211_v51, %v4210_v45  ;;  %v3113_v46 = vpop.f32.mrb[71].mxu0  ;;  %v3363_v45 = vsel %vm3357_vm10, %v3354_v5, %v4436_v0  ;;  %v4380_v51 = vunpack.i.l.bf16 %v6576_v12 }
0x1400   : > { %v4492_v23 = vpack.i.bf16 %v3113_v46, %v3110_v59  ;;  %v4381_v59 = vunpack.i.h.bf16 %v6576_v12  ;;  %v3371_v46 = vsel %vm3366_vm11, %v3362_v34, %v4445_v39 }
0x1401   : > { %4498 = vrot.lane.b32.xlu1 %v4497_v30, %s5020_s19  ;;  %v6580_v32 = vpop.permute.xlu1 %4398  ;;  %v4446_v30 = vunpack.i.h.bf16 %v4444_v41  ;;  %v3360_v49 = vsel %vm3357_vm10, %v3351_v24, %v4380_v51 }
0x1402   : > { %4493 = vrot.lane.b32.xlu0 %v4492_v23, %s5020_s19  ;;  %v4391_v23 = vunpack.i.h.bf16 %v6578_v17  ;;  %v4401_v63 = vunpack.i.h.bf16 %v6580_v32  ;;  %v4400_v9 = vunpack.i.l.bf16 %v6580_v32  ;;  %v3361_v17 = vsel %vm3357_vm10, %v3352_v52, %v4381_v59 }
0x1403   : > { %v3372_v20 = vsel %vm3366_vm11, %v3363_v45, %v4446_v30  ;;  %v3369_v53 = vsel %vm3366_vm11, %v3360_v49, %v4390_v60 }
0x1404   : > { %v3370_v1 = vsel %vm3366_vm11, %v3361_v17, %v4391_v23  ;;  %v3380_v21 = vsel %vm829_vm5, %v3372_v20, %v4456_v28  ;;  %v3377_v19 = vsel %vm829_vm5, %v3369_v53, %v4400_v9 }
0x1405   : > { %v6582_v11 = vpop.permute.xlu1 %4408  ;;  %v3378_v37 = vsel %vm829_vm5, %v3370_v1, %v4401_v63  ;;  %v3389_v63 = vsel %vm3383_vm12, %v3380_v21, %v4466_v22 }
0x1406   : > { %v4411_v12 = vunpack.i.h.bf16 %v6582_v11  ;;  %v4410_v56 = vunpack.i.l.bf16 %v6582_v11  ;;  %v3379_v11 = vsel %vm829_vm5, %v3371_v46, %v4455_v7 }
0x1408   : > { %v3387_v8 = vsel %vm3383_vm12, %v3378_v37, %v4411_v12  ;;  %v3764_v37 = vld [vmem:[%s6742_s4] ss:$0 sm:$0xff] }
0x1409   : > { %v6584_v55 = vpop.permute.xlu1 %4418 }
0x140a   : > { %v4421_v61 = vunpack.i.h.bf16 %v6584_v55  ;;  %v4420_v29 = vunpack.i.l.bf16 %v6584_v55  ;;  %v3386_v55 = vsel %vm3383_vm12, %v3377_v19, %v4410_v56 }
0x140c   : > { %v3395_v42 = vsel %vm3392_vm13, %v3386_v55, %v4420_v29  ;;  %v3396_v10 = vsel %vm3392_vm13, %v3387_v8, %v4421_v61 }
0x140d   : > { %v6586_v33 = vpop.permute.xlu1 %4428 }
0x140e   : > { %v4431_v41 = vunpack.i.h.bf16 %v6586_v33  ;;  %v4430_v48 = vunpack.i.l.bf16 %v6586_v33 }
0x1410   : > { %v3356_v50 = vsel %vm723_vm0, %v6880_v31, %v4431_v41  ;;  %v3355_v34 = vsel %vm723_vm0, %v6881_v36, %v4430_v48 }
0x1411   : > { %v6588_v4 = vpop.permute.xlu1 %4438 }
0x1412   : > { %v4441_v26 = vunpack.i.h.bf16 %v6588_v4  ;;  %v4440_v0 = vunpack.i.l.bf16 %v6588_v4 }
0x1414   : > { %v3364_v30 = vsel %vm3357_vm10, %v3355_v34, %v4440_v0  ;;  %v3365_v46 = vsel %vm3357_vm10, %v3356_v50, %v4441_v26 }
0x1415   : > { %v6590_v14 = vpop.permute.xlu1 %4448 }
0x1416   : > { %v4451_v44 = vunpack.i.h.bf16 %v6590_v14  ;;  %v4450_v39 = vunpack.i.l.bf16 %v6590_v14 }
0x1418   : > { %v3373_v60 = vsel %vm3366_vm11, %v3364_v30, %v4450_v39 }
0x1419   : > { %v6610_v27 = vpop.permute.xlu1 %4458 }
0x141a   : > { %v4461_v33 = vunpack.i.h.bf16 %v6610_v27  ;;  %v4460_v5 = vunpack.i.l.bf16 %v6610_v27 }
0x141c   : > { %v3381_v9 = vsel %vm829_vm5, %v3373_v60, %v4460_v5 }
0x141d   : > { %v4469_v32 = vpop.permute.xlu1 %4468 }
0x141e   : > { %v4471_v14 = vunpack.i.h.bf16 %v4469_v32  ;;  %v4470_v45 = vunpack.i.l.bf16 %v4469_v32 }
0x1420   : > { %v3390_v43 = vsel %vm3383_vm12, %v3381_v9, %v4470_v45 }
0x146b   : > { %v4474_v3 = vpop.permute.xlu1 %4473 }
0x146c   : > { %v4476_v18 = vunpack.i.h.bf16 %v4474_v3  ;;  %v4475_v6 = vunpack.i.l.bf16 %v4474_v3  ;;  %v4479_v2 = vpop.permute.xlu0 %4478 }
0x146d   : > { %v4481_v35 = vunpack.i.h.bf16 %v4479_v2  ;;  %v4480_v38 = vunpack.i.l.bf16 %v4479_v2 }
0x146e   : > { %v3404_v62 = vsel %vm3401_vm14, %v3395_v42, %v4475_v6  ;;  %v3405_v16 = vsel %vm3401_vm14, %v3396_v10, %v4476_v18 }
0x146f   : > { %v3411_v15 = vpack.c.bf16 %v3405_v16, %v3404_v62  ;;  %v4489_v13 = vpop.permute.xlu1 %4488  ;;  %v3402_v54 = vsel %vm3401_vm14, %v6605_v47, %v4480_v38  ;;  %v3403_v4 = vsel %vm3401_vm14, %v6608_v40, %v4481_v35  ;;  %v3374_v47 = vsel %vm3366_vm11, %v3365_v46, %v4451_v44 }
0x1470   : > { %v4484_v59 = vpop.permute.xlu0 %4483  ;;  %v3410_v51 = vpack.c.bf16 %v3403_v4, %v3402_v54  ;;  %v4491_v27 = vunpack.i.h.bf16 %v4489_v13  ;;  %v4490_v23 = vunpack.i.l.bf16 %v4489_v13  ;;  %v3388_v40 = vsel %vm3383_vm12, %v3379_v11, %v4465_v58 }
0x1471   : > { %v4486_v28 = vunpack.i.h.bf16 %v4484_v59  ;;  %v4485_v7 = vunpack.i.l.bf16 %v4484_v59  ;;  %v3382_v25 = vsel %vm829_vm5, %v3374_v47, %v4461_v33 }
0x1472   : > { %4228 = vmatprep.mubr.bf16.mxu0 %v3410_v51  ;;  %v3391_v24 = vsel %vm3383_vm12, %v3382_v25, %v4471_v14  ;;  %v3399_v49 = vsel %vm3392_vm13, %v3390_v43, %v4490_v23 }
0x1473   : > { %v4499_v52 = vpop.permute.xlu1 %4498  ;;  %4229 = vmatmul.mubr.bf16.vlgmr.msra.gmra.mrb[72].mxu0 %v3411_v15  ;;  %v3400_v17 = vsel %vm3392_vm13, %v3391_v24, %v4491_v27  ;;  %v3398_v32 = vsel %vm3392_vm13, %v3389_v63, %v4486_v28  ;;  %v3397_v20 = vsel %vm3392_vm13, %v3388_v40, %v4485_v7 }
0x1474   : > { %v4501_v12 = vunpack.i.h.bf16 %v4499_v52  ;;  %v4500_v56 = vunpack.i.l.bf16 %v4499_v52  ;;  %v4494_v57 = vpop.permute.xlu0 %4493 }
0x1475   : > { %v4496_v61 = vunpack.i.h.bf16 %v4494_v57  ;;  %v4495_v29 = vunpack.i.l.bf16 %v4494_v57 }
0x1476   : > { %v3408_v53 = vsel %vm3401_vm14, %v3399_v49, %v4500_v56  ;;  %v3409_v1 = vsel %vm3401_vm14, %v3400_v17, %v4501_v12 }
0x1477   : > { %v3406_v41 = vsel %vm3401_vm14, %v3397_v20, %v4495_v29  ;;  %v3407_v11 = vsel %vm3401_vm14, %v3398_v32, %v4496_v61  ;;  %v3413_v21 = vpack.c.bf16 %v3409_v1, %v3408_v53 }
0x1478   : > { %v3412_v19 = vpack.c.bf16 %v3407_v11, %v3406_v41 }
0x147a   : > { %4232 = vmatprep.mubr.bf16.mxu0 %v3412_v19 }
0x147b   : > { %4233 = vmatmul.mubr.bf16.gmra.mrb[76].mxu0 %v3413_v21 }
0x1546   : > { %v4230_v22 = vpop.f32.mrb[72].mxu0 }
0x1547   : > { %v3511_v58 = vadd.f32 %v4230_v22, %v3764_v37  ;;  %v3502_v55 = vpop.f32.mrb[73].mxu0 }
0x1548   : > { %v3503_v8 = vadd.f32 %v3764_v37, %v3502_v55  ;;  %v4231_v42 = vpop.f32.mrb[74].mxu0 }
0x1549   : > { %3535 = vst [vmem:[%s313_s16 + $0x10] sm:$0xff] %v3511_v58  ;;  %v3514_v10 = vadd.f32 %v4231_v42, %v3764_v37  ;;  %v3505_v48 = vpop.f32.mrb[75].mxu0 }
0x154a   : > { %3533 = vst [vmem:[%s313_s16] sm:$0xff] %v3503_v8  ;;  %v3506_v3 = vadd.f32 %v3764_v37, %v3505_v48 }
0x154b   : > { %3536 = vst [vmem:[%s313_s16 + $0x18] sm:$0xff] %v3514_v10 }
0x154c   : > { %3534 = vst [vmem:[%s313_s16 + $0x8] sm:$0xff] %v3506_v3 }
0x154e   : > { %v4234_v31 = vpop.f32.mrb[76].mxu0 }
0x154f   : > { %v3527_v50 = vadd.f32 %v4234_v31, %v3764_v37  ;;  %v3518_v26 = vpop.f32.mrb[77].mxu0 }
0x1550   : > { %v3519_v18 = vadd.f32 %v3764_v37, %v3518_v26  ;;  %v4235_v6 = vpop.f32.mrb[78].mxu0 }
0x1551   : > { %3539 = vst [vmem:[%s313_s16 + $0x30] sm:$0xff] %v3527_v50  ;;  %v3530_v2 = vadd.f32 %v4235_v6, %v3764_v37  ;;  %v3521_v0 = vpop.f32.mrb[79].mxu0 }
0x1552   : > { %3537 = vst [vmem:[%s313_s16 + $0x20] sm:$0xff] %v3519_v18  ;;  %v3522_v44 = vadd.f32 %v3764_v37, %v3521_v0 }
0x1553   : > { %3540 = vst [vmem:[%s313_s16 + $0x38] sm:$0xff] %v3530_v2 }
0x1554   : > { %3538 = vst [vmem:[%s313_s16 + $0x28] sm:$0xff] %v3522_v44 }
0x1555   : > { %4945 = shalt.err (!%p4942_p4)
}
0x1556   : > { %s4946_s18 = scalar_lea.hbm %s6694_s20, 1024  ;;  %s4950_s7 = scalar_lea.hbm %s6744_s6, 2048 }
0x1557   : > { %p4947_p9 = scmp.ne.s32.totalorder %s6694_s20, %s4946_s18  ;;  %p4951_p8 = scmp.lt.u32.totalorder %s6694_s20, %s6744_s6 }
0x1558   : > { %p4952_p13 = scmp.lt.u32.totalorder %s4950_s7, %s4946_s18  ;;  %p4954_p10 = scmp.lt.u32.totalorder %s4946_s18, %s6694_s20 }
0x1559   : > { %p4948_p0 = pnand %p4947_p9, %p5210_p5 }
0x155a   : > { %p4953_p6 = por %p4952_p13, %p4951_p8 }
0x155b   : > { %p4949_p11 = pneg %p4948_p0 }
0x155c   : > { %p4955_p3 = por %p4954_p10, %p4953_p6 }
0x155e   : > { %p4956_p7 = pnand %p4955_p3, %p4949_p11 }
0x1560   : > { %4959 = shalt.err (!%p4956_p7)
}
0x1561   : > { %s5028_s29 = smov 128   ;;  %s5029_s19 = smov 8  }
0x1562   : > { %4282 = dma.vmem_to_hbm [thread:$0]  (%p5210_p5), %s6689_s8, 1024, %s6694_s20, %s3542_s25, %s5028_s29, %s5028_s29, %s5029_s19  }
0x1563 PF: > { %s3570_s26 = sand.u32 1, %s4994_s21   ;;  %p6882_p12 = scmp.ne.s32.totalorder %s6777_s28, 0 }
0x1564   : > { %p6883_p2 = scmp.ge.s32.totalorder %s5006_s24, 2  ;;  %s3571_s30 = scalar_lea.sflag [#allocation4], %s3570_s26 }
0x1566   : > { %p4299_p1 = pnand %p6883_p2, %p6882_p12 }
0x1568   : > { %4989 = dma.done.wait (!%p4299_p1), %s3571_s30, 1024  }
0x1569   : > { %4991 = vsyncadd (!%p4299_p1), %s3571_s30, 4294966272  ;;  %p21_p4 = scmp.ge.s32.totalorder %s5196_s12, 4   ;;  %s6884_s21 = smov %s4998_s22 }
0x156a   : > { %s6885_s22 = smov %s5002_s23  ;;  %s6886_s23 = smov %s5206_s15 }
0x156b   : > { %s6887_s24 = smov %s5196_s12  ;;  %23 = sbr.rel (!%p21_p4) target bundleno = 7 (0x7), region = 101 }
0x1572   :  { %3576 = vsyncpa [#allocation3], 1 }
0x1573   :  { %3578 = vsyncpa [#allocation3 + $0x1], 1 }
0x1574   :  { %3579 = vsyncpa [#allocation6], 1 }
0x1575   :  { %3580 = vsyncpa [#allocation9], 1 }
0x1576   :  { %3581 = vsyncpa [#allocation4], 1 }
0x1577   :  { %3583 = vsyncpa [#allocation4 + $0x1], 1 }

</bundles_post_ra>
